<compile_context>
chip_gen: v7x
topology: tpu7x:2x2x1
jax: 0.10.0
libtpu: 0.0.40
codegen_flags: <defaults>
</compile_context>

<pallas_src>
import math

import numpy as np

import jax
import jax.numpy as jnp
from jax import lax
from jax.experimental import pallas as pl
from jax.experimental.pallas import tpu as pltpu


_LEAKY_SLOPE = 0.2
_IN_EPS = 1e-5


# ----------------------------------------------------------------------------
# Fused kernel: all conv blocks of one batch group per grid step.
# ----------------------------------------------------------------------------
def _make_fused_kernel(plan, slope, eps):
    """plan: tuple of (n_blk, m_out, norm, act) per layer (static ints/bools).

    Kernel ref order: [x_ref, <per-layer mats...>, o_ref] where per-layer mats
    are (S, Wr) followed by (R, P) for normed layers or (bias_row) otherwise.
    """

    def kernel(*refs):
        x_ref = refs[0]
        o_ref = refs[-1]

        xb = x_ref[...]
        # (bg, cin, h, w) -> (bg*cin*h, w): leading-dim collapse only (h is a
        # multiple of 8, so this is layout-preserving -- no data movement).
        a = xb.reshape(-1, xb.shape[-1]).astype(jnp.float32)

        idx = 1
        for (n_blk, m_out, norm, act) in plan:
            s_ref, wr_ref = refs[idx], refs[idx + 1]
            idx += 2

            # Row selection (folds stride + zero row-padding + batch stacking;
            # for layer 1 also the NCHW planar->interleaved relayout).
            rows = jnp.dot(s_ref[...], a,
                           preferred_element_type=jnp.float32)   # (n_blk*m_out, kl)
            # Lane-concat the n_blk row blocks -> single stacked-K conv dot.
            cat = jnp.concatenate(
                [rows[g * m_out:(g + 1) * m_out, :] for g in range(n_blk)],
                axis=1)                                           # (m_out, n_blk*kl)
            y = jnp.dot(cat, wr_ref[...],
                        preferred_element_type=jnp.float32)       # (m_out, w_out)

            if norm:
                # InstanceNorm2d (affine=False); conv bias skipped (cancels).
                # R broadcasts per-sample row means, P = Gm @ Gt broadcasts
                # per-channel lane means -> mean/E[x^2] land directly in the
                # full (m_out, w_out) layout (no lane-sparse intermediates).
                r_ref, p_ref = refs[idx], refs[idx + 1]
                idx += 2
                mean = jnp.dot(
                    jnp.dot(r_ref[...], y, preferred_element_type=jnp.float32),
                    p_ref[...], preferred_element_type=jnp.float32)
                ex2 = jnp.dot(
                    jnp.dot(r_ref[...], y * y, preferred_element_type=jnp.float32),
                    p_ref[...], preferred_element_type=jnp.float32)
                var = jnp.maximum(ex2 - mean * mean, 0.0)
                y = (y - mean) * lax.rsqrt(var + eps)             # EUP rsqrt
            else:
                b_ref = refs[idx]
                idx += 1
                y = y + b_ref[...]                                # (1, w_out)

            if act:
                y = jnp.where(y >= 0.0, y, slope * y)             # LeakyReLU
            # TODO(synk): dropout is identity (inference mode).
            a = y

        o_ref[...] = a.astype(o_ref.dtype)

    return kernel


# ----------------------------------------------------------------------------
# One-time parameter preparation (outside the per-forward path).
# ----------------------------------------------------------------------------
def prepare_discriminator(layer_params, height, width, batch_group):
    """layer_params: list of (w OIHW, b, stride, norm, act).

    Returns (plan, mats, out_meta).  All constant matrices fold the batch
    group `batch_group` (samples stacked along sublanes).
    """
    bg = batch_group
    plan, mats = [], []
    h, wd = height, width
    cout = None
    first = True
    for (w, b, stride, norm, act) in layer_params:
        w = np.asarray(w, dtype=np.float32)
        b = np.asarray(b, dtype=np.float32)
        cout, cin, kh_sz, kw_sz = w.shape
        assert kh_sz == 3 and kw_sz == 3, "only k=3 supported"
        ho = (h + 2 - 3) // stride + 1
        wo = (wd + 2 - 3) // stride + 1
        mo = bg * ho
        w_out = wo * cout

        if first:
            # Input rows are the raw NCHW flatten: row (b*cin + c)*h + i, lanes w.
            mi = bg * cin * h
            n_blk = cin * 3
            S = np.zeros((n_blk * mo, mi), np.float32)
            for c in range(cin):
                for kh in range(3):
                    g = c * 3 + kh
                    for bb in range(bg):
                        for o in range(ho):
                            i = stride * o + kh - 1
                            if 0 <= i < h:
                                S[g * mo + bb * ho + o, (bb * cin + c) * h + i] = 1.0
            # Wr rows indexed (c, kh, wj); cols (wo_pos*cout + f).
            Wr = np.zeros((n_blk * wd, w_out), np.float32)
            for c in range(cin):
                for kh in range(3):
                    g = c * 3 + kh
                    for o in range(wo):
                        for kw in range(3):
                            wj = stride * o + kw - 1
                            if 0 <= wj < wd:
                                Wr[g * wd + wj, o * cout:(o + 1) * cout] += w[:, c, kh, kw]
        else:
            # Input rows: (b, i) -> row b*h + i; lanes interleaved (wi*cin + c).
            mi = bg * h
            n_blk = 3
            S = np.zeros((n_blk * mo, mi), np.float32)
            for kh in range(3):
                for bb in range(bg):
                    for o in range(ho):
                        i = stride * o + kh - 1
                        if 0 <= i < h:
                            S[kh * mo + bb * ho + o, bb * h + i] = 1.0
            k_lane = wd * cin
            Wr = np.zeros((n_blk * k_lane, w_out), np.float32)
            for kh in range(3):
                for o in range(wo):
                    for kw in range(3):
                        wj = stride * o + kw - 1
                        if 0 <= wj < wd:
                            Wr[kh * k_lane + wj * cin:kh * k_lane + (wj + 1) * cin,
                               o * cout:(o + 1) * cout] += w[:, :, kh, kw].T

        mats.append(jnp.asarray(S))
        mats.append(jnp.asarray(Wr))

        if norm:
            # R: per-sample row-mean + broadcast back (folds 1/ho).
            R = np.zeros((mo, mo), np.float32)
            for bb in range(bg):
                R[bb * ho:(bb + 1) * ho, bb * ho:(bb + 1) * ho] = 1.0 / ho
            # P = Gm @ Gt: per-channel lane-mean + broadcast back (folds 1/wo).
            P = np.zeros((w_out, w_out), np.float32)
            eye = np.eye(cout, dtype=np.float32) / wo
            for o in range(wo):
                for o2 in range(wo):
                    P[o * cout:(o + 1) * cout, o2 * cout:(o2 + 1) * cout] = eye
            mats.append(jnp.asarray(R))
            mats.append(jnp.asarray(P))
        else:
            brow = np.tile(b, wo)[None, :].astype(np.float32)    # (1, wo*cout)
            mats.append(jnp.asarray(brow))

        plan.append((n_blk, mo, bool(norm), bool(act)))
        h, wd = ho, wo
        first = False

    return tuple(plan), mats, (h, wd, cout)


def pick_batch_group(n):
    """Samples per grid step.  Fold the whole (small) batch into one step for
    maximum MXU M; once the batch is >= 4 and even, use a 2-step parallel grid
    so both v7x TensorCores stay busy."""
    if n >= 4 and n % 2 == 0:
        return n // 2
    return n


# ----------------------------------------------------------------------------
# Forward pass: one fused pallas_call; grid = batch groups.
# ----------------------------------------------------------------------------
def patch_discriminator_forward(x_nchw, plan, mats, out_meta, batch_group,
                                *, slope=_LEAKY_SLOPE, eps=_IN_EPS):
    n, cin, h, wd = x_nchw.shape
    bg = batch_group
    assert n % bg == 0, "batch must be divisible by the batch group"
    g = n // bg
    ho_f, wo_f, cout_f = out_meta
    mo_f = bg * ho_f
    wout_f = wo_f * cout_f

    kernel = _make_fused_kernel(plan, slope, eps)

    # Raw NCHW goes straight in: the planar relayout is folded into S of the
    # first layer -- no wrapper transpose / im2col.
    in_specs = [pl.BlockSpec((bg, cin, h, wd), lambda i: (i, 0, 0, 0))]
    for m in mats:
        # Constant matrices: index_map never changes, so single-buffer them.
        in_specs.append(pl.BlockSpec(tuple(m.shape), lambda i: (0, 0),
                                     pipeline_mode=pl.Buffered(1)))

    out = pl.pallas_call(
        kernel,
        out_shape=jax.ShapeDtypeStruct((g, mo_f, wout_f), jnp.float32),
        grid_spec=pltpu.PrefetchScalarGridSpec(
            num_scalar_prefetch=0,
            grid=(g,),
            in_specs=in_specs,
            out_specs=pl.BlockSpec((None, mo_f, wout_f), lambda i: (i, 0, 0)),
        ),
        compiler_params=pltpu.CompilerParams(
            dimension_semantics=("parallel",),
        ),
    )(x_nchw, *mats)

    out = out.reshape(n, ho_f, wo_f, cout_f)        # (g, bg*ho, wo*cout) flatten
    if cout_f == 1:
        # NHWC -> NCHW is a pure reshape when out_channels == 1 (no transpose).
        return out.reshape(n, 1, ho_f, wo_f)
    return jnp.transpose(out, (0, 3, 1, 2))


# ----------------------------------------------------------------------------
# Pure-JAX reference (XLA conv) for a correctness self-check.
# ----------------------------------------------------------------------------
def _reference_forward(x_nchw, layer_params, slope=_LEAKY_SLOPE, eps=_IN_EPS):
    x = x_nchw.astype(jnp.float32)
    for (w, b, stride, norm, act) in layer_params:
        y = lax.conv_general_dilated(
            x, w.astype(jnp.float32),
            window_strides=(stride, stride),
            padding=((1, 1), (1, 1)),
            dimension_numbers=("NCHW", "OIHW", "NCHW"),
            precision=lax.Precision.HIGHEST,
        )
        y = y + b.reshape(1, -1, 1, 1)
        if norm:
            mean = jnp.mean(y, axis=(2, 3), keepdims=True)
            var = jnp.mean((y - mean) ** 2, axis=(2, 3), keepdims=True)
            y = (y - mean) * lax.rsqrt(var + eps)
        if act:
            y = jnp.where(y >= 0.0, y, slope * y)
        x = y
    return x


# ----------------------------------------------------------------------------
# Deterministic parameter init (PyTorch Conv2d default-style uniform bounds)
# ----------------------------------------------------------------------------
def init_params(key, in_channels=2, out_channels=1, channels=(16, 32, 64), k=3):
    layer_defs = [(in_channels, channels[0], 2, False, True)]
    for i in range(len(channels) - 1):
        layer_defs.append((channels[i], channels[i + 1], 2, True, True))
    layer_defs.append((channels[-1], out_channels, 1, False, False))

    params = []
    for (cin, cout, stride, norm, act) in layer_defs:
        key, wk, bk = jax.random.split(key, 3)
        fan_in = cin * k * k
        bound = 1.0 / math.sqrt(fan_in)
        w = jax.random.uniform(wk, (cout, cin, k, k), jnp.float32,
                               minval=-bound, maxval=bound)
        b = jax.random.uniform(bk, (cout,), jnp.float32,
                               minval=-bound, maxval=bound)
        params.append((w, b, stride, norm, act))
    return params


if __name__ == "__main__":
    key = jax.random.PRNGKey(0)
    key, xkey = jax.random.split(key)

    # Input: NCHW, batch=2, in_channels=2, spatial=32x32.
    x = jax.random.normal(xkey, (2, 2, 32, 32), dtype=jnp.float32)
    params = init_params(key)

    bg = pick_batch_group(x.shape[0])               # -> 2 (whole batch, grid=1)
    plan, mats, out_meta = prepare_discriminator(params, 32, 32, bg)
    fwd = jax.jit(lambda xx: patch_discriminator_forward(xx, plan, mats,
                                                         out_meta, bg))

    out = jax.block_until_ready(fwd(x))

    # 3 stride-2 blocks: 32 -> 16 -> 8 -> 4; final stride-1 conv -> (2, 1, 4, 4)
    assert out.shape == (2, 1, 4, 4), out.shape
    assert bool(jnp.all(jnp.isfinite(out)))

    ref = jax.block_until_ready(_reference_forward(x, params))
    np.testing.assert_allclose(np.asarray(out), np.asarray(ref),
                               rtol=2e-3, atol=2e-3)

    print("KERNEL_OK")
</pallas_src>

<mosaic_0001>
module attributes {stable_mosaic.version = 11 : i64} {
  func.func @kernel(%arg0: i32, %arg1: memref<2x2x32x32xf32, #tpu.memory_space<vmem>>, %arg2: memref<192x128xf32, #tpu.memory_space<vmem>>, %arg3: memref<192x256xf32, #tpu.memory_space<vmem>>, %arg4: memref<1x256xf32, #tpu.memory_space<vmem>>, %arg5: memref<48x32xf32, #tpu.memory_space<vmem>>, %arg6: memref<768x256xf32, #tpu.memory_space<vmem>>, %arg7: memref<16x16xf32, #tpu.memory_space<vmem>>, %arg8: memref<256x256xf32, #tpu.memory_space<vmem>>, %arg9: memref<24x16xf32, #tpu.memory_space<vmem>>, %arg10: memref<768x256xf32, #tpu.memory_space<vmem>>, %arg11: memref<8x8xf32, #tpu.memory_space<vmem>>, %arg12: memref<256x256xf32, #tpu.memory_space<vmem>>, %arg13: memref<24x8xf32, #tpu.memory_space<vmem>>, %arg14: memref<768x4xf32, #tpu.memory_space<vmem>>, %arg15: memref<1x4xf32, #tpu.memory_space<vmem>>, %arg16: memref<1x8x4xf32, #tpu.memory_space<vmem>>) attributes {dimension_semantics = [#tpu.dimension_semantics<parallel>], iteration_bounds = array<i64: 1>, scalar_prefetch = 0 : i64, scratch_operands = 0 : i64, tpu.core_type = #tpu.core_type<tc>, window_params = [{transform_indices = @transform_0, window_bounds = array<i64: 2, 2, 32, 32>}, {pipeline_mode = #tpu.pipeline_mode<synchronous>, transform_indices = @transform_1, window_bounds = array<i64: 192, 128>}, {pipeline_mode = #tpu.pipeline_mode<synchronous>, transform_indices = @transform_2, window_bounds = array<i64: 192, 256>}, {pipeline_mode = #tpu.pipeline_mode<synchronous>, transform_indices = @transform_3, window_bounds = array<i64: 1, 256>}, {pipeline_mode = #tpu.pipeline_mode<synchronous>, transform_indices = @transform_4, window_bounds = array<i64: 48, 32>}, {pipeline_mode = #tpu.pipeline_mode<synchronous>, transform_indices = @transform_5, window_bounds = array<i64: 768, 256>}, {pipeline_mode = #tpu.pipeline_mode<synchronous>, transform_indices = @transform_6, window_bounds = array<i64: 16, 16>}, {pipeline_mode = #tpu.pipeline_mode<synchronous>, transform_indices = @transform_7, window_bounds = array<i64: 256, 256>}, {pipeline_mode = #tpu.pipeline_mode<synchronous>, transform_indices = @transform_8, window_bounds = array<i64: 24, 16>}, {pipeline_mode = #tpu.pipeline_mode<synchronous>, transform_indices = @transform_9, window_bounds = array<i64: 768, 256>}, {pipeline_mode = #tpu.pipeline_mode<synchronous>, transform_indices = @transform_10, window_bounds = array<i64: 8, 8>}, {pipeline_mode = #tpu.pipeline_mode<synchronous>, transform_indices = @transform_11, window_bounds = array<i64: 256, 256>}, {pipeline_mode = #tpu.pipeline_mode<synchronous>, transform_indices = @transform_12, window_bounds = array<i64: 24, 8>}, {pipeline_mode = #tpu.pipeline_mode<synchronous>, transform_indices = @transform_13, window_bounds = array<i64: 768, 4>}, {pipeline_mode = #tpu.pipeline_mode<synchronous>, transform_indices = @transform_14, window_bounds = array<i64: 1, 4>}, {transform_indices = @transform_15, window_bounds = array<i64: 1, 8, 4>}]} {
    %c0 = arith.constant 0 : index
    %c0_0 = arith.constant 0 : index
    %c0_1 = arith.constant 0 : index
    %c0_2 = arith.constant 0 : index
    %0 = vector.load %arg1[%c0, %c0_0, %c0_1, %c0_2] : memref<2x2x32x32xf32, #tpu.memory_space<vmem>>, vector<2x2x32x32xf32>
    %1 = vector.shape_cast %0 : vector<2x2x32x32xf32> to vector<128x32xf32>
    %c0_3 = arith.constant 0 : index
    %c0_4 = arith.constant 0 : index
    %2 = vector.load %arg2[%c0_3, %c0_4] : memref<192x128xf32, #tpu.memory_space<vmem>>, vector<192x128xf32>
    %cst = arith.constant dense<0.000000e+00> : vector<192x32xf32>
    %3 = tpu.matmul %2, %1, %cst {dimension_numbers = #tpu.dot_dimension_numbers<[1], [0], [0], [1], [0, 0, 1, 1], [], []>} : vector<192x128xf32>, vector<128x32xf32>, vector<192x32xf32> -> vector<192x32xf32>
    %4 = vector.extract_strided_slice %3 {offsets = [0, 0], sizes = [32, 32], strides = [1, 1]} : vector<192x32xf32> to vector<32x32xf32>
    %5 = vector.extract_strided_slice %3 {offsets = [32, 0], sizes = [32, 32], strides = [1, 1]} : vector<192x32xf32> to vector<32x32xf32>
    %6 = vector.extract_strided_slice %3 {offsets = [64, 0], sizes = [32, 32], strides = [1, 1]} : vector<192x32xf32> to vector<32x32xf32>
    %7 = vector.extract_strided_slice %3 {offsets = [96, 0], sizes = [32, 32], strides = [1, 1]} : vector<192x32xf32> to vector<32x32xf32>
    %8 = vector.extract_strided_slice %3 {offsets = [128, 0], sizes = [32, 32], strides = [1, 1]} : vector<192x32xf32> to vector<32x32xf32>
    %9 = vector.extract_strided_slice %3 {offsets = [160, 0], sizes = [32, 32], strides = [1, 1]} : vector<192x32xf32> to vector<32x32xf32>
    %10 = tpu.concatenate %4, %5, %6, %7, %8, %9 in 1 : vector<32x32xf32>, vector<32x32xf32>, vector<32x32xf32>, vector<32x32xf32>, vector<32x32xf32>, vector<32x32xf32> -> vector<32x192xf32>
    %c0_5 = arith.constant 0 : index
    %c0_6 = arith.constant 0 : index
    %11 = vector.load %arg3[%c0_5, %c0_6] : memref<192x256xf32, #tpu.memory_space<vmem>>, vector<192x256xf32>
    %cst_7 = arith.constant dense<0.000000e+00> : vector<32x256xf32>
    %12 = tpu.matmul %10, %11, %cst_7 {dimension_numbers = #tpu.dot_dimension_numbers<[1], [0], [0], [1], [0, 0, 1, 1], [], []>} : vector<32x192xf32>, vector<192x256xf32>, vector<32x256xf32> -> vector<32x256xf32>
    %c0_8 = arith.constant 0 : index
    %c0_9 = arith.constant 0 : index
    %13 = vector.load %arg4[%c0_8, %c0_9] : memref<1x256xf32, #tpu.memory_space<vmem>>, vector<1x256xf32>
    %14 = vector.broadcast %13 : vector<1x256xf32> to vector<32x256xf32>
    %15 = arith.addf %12, %14 : vector<32x256xf32>
    %cst_10 = arith.constant 0.000000e+00 : f32
    %16 = vector.broadcast %cst_10 : f32 to vector<32x256xf32>
    %17 = arith.cmpf oge, %15, %16 : vector<32x256xf32>
    %cst_11 = arith.constant 2.000000e-01 : f32
    %18 = vector.broadcast %cst_11 : f32 to vector<32x256xf32>
    %19 = arith.mulf %18, %15 : vector<32x256xf32>
    %20 = arith.select %17, %15, %19 : vector<32x256xi1>, vector<32x256xf32>
    %c0_12 = arith.constant 0 : index
    %c0_13 = arith.constant 0 : index
    %21 = vector.load %arg5[%c0_12, %c0_13] : memref<48x32xf32, #tpu.memory_space<vmem>>, vector<48x32xf32>
    %cst_14 = arith.constant dense<0.000000e+00> : vector<48x256xf32>
    %22 = tpu.matmul %21, %20, %cst_14 {dimension_numbers = #tpu.dot_dimension_numbers<[1], [0], [0], [1], [0, 0, 1, 1], [], []>} : vector<48x32xf32>, vector<32x256xf32>, vector<48x256xf32> -> vector<48x256xf32>
    %23 = vector.extract_strided_slice %22 {offsets = [0, 0], sizes = [16, 256], strides = [1, 1]} : vector<48x256xf32> to vector<16x256xf32>
    %24 = vector.extract_strided_slice %22 {offsets = [16, 0], sizes = [16, 256], strides = [1, 1]} : vector<48x256xf32> to vector<16x256xf32>
    %25 = vector.extract_strided_slice %22 {offsets = [32, 0], sizes = [16, 256], strides = [1, 1]} : vector<48x256xf32> to vector<16x256xf32>
    %26 = tpu.concatenate %23, %24, %25 in 1 : vector<16x256xf32>, vector<16x256xf32>, vector<16x256xf32> -> vector<16x768xf32>
    %c0_15 = arith.constant 0 : index
    %c0_16 = arith.constant 0 : index
    %27 = vector.load %arg6[%c0_15, %c0_16] : memref<768x256xf32, #tpu.memory_space<vmem>>, vector<768x256xf32>
    %cst_17 = arith.constant dense<0.000000e+00> : vector<16x256xf32>
    %28 = tpu.matmul %26, %27, %cst_17 {dimension_numbers = #tpu.dot_dimension_numbers<[1], [0], [0], [1], [0, 0, 1, 1], [], []>} : vector<16x768xf32>, vector<768x256xf32>, vector<16x256xf32> -> vector<16x256xf32>
    %c0_18 = arith.constant 0 : index
    %c0_19 = arith.constant 0 : index
    %29 = vector.load %arg7[%c0_18, %c0_19] : memref<16x16xf32, #tpu.memory_space<vmem>>, vector<16x16xf32>
    %cst_20 = arith.constant dense<0.000000e+00> : vector<16x256xf32>
    %30 = tpu.matmul %29, %28, %cst_20 {dimension_numbers = #tpu.dot_dimension_numbers<[1], [0], [0], [1], [0, 0, 1, 1], [], []>} : vector<16x16xf32>, vector<16x256xf32>, vector<16x256xf32> -> vector<16x256xf32>
    %c0_21 = arith.constant 0 : index
    %c0_22 = arith.constant 0 : index
    %31 = vector.load %arg8[%c0_21, %c0_22] : memref<256x256xf32, #tpu.memory_space<vmem>>, vector<256x256xf32>
    %cst_23 = arith.constant dense<0.000000e+00> : vector<16x256xf32>
    %32 = tpu.matmul %30, %31, %cst_23 {dimension_numbers = #tpu.dot_dimension_numbers<[1], [0], [0], [1], [0, 0, 1, 1], [], []>} : vector<16x256xf32>, vector<256x256xf32>, vector<16x256xf32> -> vector<16x256xf32>
    %c0_24 = arith.constant 0 : index
    %c0_25 = arith.constant 0 : index
    %33 = vector.load %arg7[%c0_24, %c0_25] : memref<16x16xf32, #tpu.memory_space<vmem>>, vector<16x16xf32>
    %34 = arith.mulf %28, %28 : vector<16x256xf32>
    %cst_26 = arith.constant dense<0.000000e+00> : vector<16x256xf32>
    %35 = tpu.matmul %33, %34, %cst_26 {dimension_numbers = #tpu.dot_dimension_numbers<[1], [0], [0], [1], [0, 0, 1, 1], [], []>} : vector<16x16xf32>, vector<16x256xf32>, vector<16x256xf32> -> vector<16x256xf32>
    %c0_27 = arith.constant 0 : index
    %c0_28 = arith.constant 0 : index
    %36 = vector.load %arg8[%c0_27, %c0_28] : memref<256x256xf32, #tpu.memory_space<vmem>>, vector<256x256xf32>
    %cst_29 = arith.constant dense<0.000000e+00> : vector<16x256xf32>
    %37 = tpu.matmul %35, %36, %cst_29 {dimension_numbers = #tpu.dot_dimension_numbers<[1], [0], [0], [1], [0, 0, 1, 1], [], []>} : vector<16x256xf32>, vector<256x256xf32>, vector<16x256xf32> -> vector<16x256xf32>
    %38 = arith.mulf %32, %32 : vector<16x256xf32>
    %39 = arith.subf %37, %38 : vector<16x256xf32>
    %cst_30 = arith.constant 0.000000e+00 : f32
    %40 = vector.broadcast %cst_30 : f32 to vector<16x256xf32>
    %41 = arith.maximumf %39, %40 : vector<16x256xf32>
    %42 = arith.subf %28, %32 : vector<16x256xf32>
    %cst_31 = arith.constant 9.99999974E-6 : f32
    %43 = vector.broadcast %cst_31 : f32 to vector<16x256xf32>
    %44 = arith.addf %41, %43 : vector<16x256xf32>
    %45 = math.rsqrt %44 : vector<16x256xf32>
    %46 = arith.mulf %42, %45 : vector<16x256xf32>
    %cst_32 = arith.constant 0.000000e+00 : f32
    %47 = vector.broadcast %cst_32 : f32 to vector<16x256xf32>
    %48 = arith.cmpf oge, %46, %47 : vector<16x256xf32>
    %cst_33 = arith.constant 2.000000e-01 : f32
    %49 = vector.broadcast %cst_33 : f32 to vector<16x256xf32>
    %50 = arith.mulf %49, %46 : vector<16x256xf32>
    %51 = arith.select %48, %46, %50 : vector<16x256xi1>, vector<16x256xf32>
    %c0_34 = arith.constant 0 : index
    %c0_35 = arith.constant 0 : index
    %52 = vector.load %arg9[%c0_34, %c0_35] : memref<24x16xf32, #tpu.memory_space<vmem>>, vector<24x16xf32>
    %cst_36 = arith.constant dense<0.000000e+00> : vector<24x256xf32>
    %53 = tpu.matmul %52, %51, %cst_36 {dimension_numbers = #tpu.dot_dimension_numbers<[1], [0], [0], [1], [0, 0, 1, 1], [], []>} : vector<24x16xf32>, vector<16x256xf32>, vector<24x256xf32> -> vector<24x256xf32>
    %54 = vector.extract_strided_slice %53 {offsets = [0, 0], sizes = [8, 256], strides = [1, 1]} : vector<24x256xf32> to vector<8x256xf32>
    %55 = vector.extract_strided_slice %53 {offsets = [8, 0], sizes = [8, 256], strides = [1, 1]} : vector<24x256xf32> to vector<8x256xf32>
    %56 = vector.extract_strided_slice %53 {offsets = [16, 0], sizes = [8, 256], strides = [1, 1]} : vector<24x256xf32> to vector<8x256xf32>
    %57 = tpu.concatenate %54, %55, %56 in 1 : vector<8x256xf32>, vector<8x256xf32>, vector<8x256xf32> -> vector<8x768xf32>
    %c0_37 = arith.constant 0 : index
    %c0_38 = arith.constant 0 : index
    %58 = vector.load %arg10[%c0_37, %c0_38] : memref<768x256xf32, #tpu.memory_space<vmem>>, vector<768x256xf32>
    %cst_39 = arith.constant dense<0.000000e+00> : vector<8x256xf32>
    %59 = tpu.matmul %57, %58, %cst_39 {dimension_numbers = #tpu.dot_dimension_numbers<[1], [0], [0], [1], [0, 0, 1, 1], [], []>} : vector<8x768xf32>, vector<768x256xf32>, vector<8x256xf32> -> vector<8x256xf32>
    %c0_40 = arith.constant 0 : index
    %c0_41 = arith.constant 0 : index
    %60 = vector.load %arg11[%c0_40, %c0_41] : memref<8x8xf32, #tpu.memory_space<vmem>>, vector<8x8xf32>
    %cst_42 = arith.constant dense<0.000000e+00> : vector<8x256xf32>
    %61 = tpu.matmul %60, %59, %cst_42 {dimension_numbers = #tpu.dot_dimension_numbers<[1], [0], [0], [1], [0, 0, 1, 1], [], []>} : vector<8x8xf32>, vector<8x256xf32>, vector<8x256xf32> -> vector<8x256xf32>
    %c0_43 = arith.constant 0 : index
    %c0_44 = arith.constant 0 : index
    %62 = vector.load %arg12[%c0_43, %c0_44] : memref<256x256xf32, #tpu.memory_space<vmem>>, vector<256x256xf32>
    %cst_45 = arith.constant dense<0.000000e+00> : vector<8x256xf32>
    %63 = tpu.matmul %61, %62, %cst_45 {dimension_numbers = #tpu.dot_dimension_numbers<[1], [0], [0], [1], [0, 0, 1, 1], [], []>} : vector<8x256xf32>, vector<256x256xf32>, vector<8x256xf32> -> vector<8x256xf32>
    %c0_46 = arith.constant 0 : index
    %c0_47 = arith.constant 0 : index
    %64 = vector.load %arg11[%c0_46, %c0_47] : memref<8x8xf32, #tpu.memory_space<vmem>>, vector<8x8xf32>
    %65 = arith.mulf %59, %59 : vector<8x256xf32>
    %cst_48 = arith.constant dense<0.000000e+00> : vector<8x256xf32>
    %66 = tpu.matmul %64, %65, %cst_48 {dimension_numbers = #tpu.dot_dimension_numbers<[1], [0], [0], [1], [0, 0, 1, 1], [], []>} : vector<8x8xf32>, vector<8x256xf32>, vector<8x256xf32> -> vector<8x256xf32>
    %c0_49 = arith.constant 0 : index
    %c0_50 = arith.constant 0 : index
    %67 = vector.load %arg12[%c0_49, %c0_50] : memref<256x256xf32, #tpu.memory_space<vmem>>, vector<256x256xf32>
    %cst_51 = arith.constant dense<0.000000e+00> : vector<8x256xf32>
    %68 = tpu.matmul %66, %67, %cst_51 {dimension_numbers = #tpu.dot_dimension_numbers<[1], [0], [0], [1], [0, 0, 1, 1], [], []>} : vector<8x256xf32>, vector<256x256xf32>, vector<8x256xf32> -> vector<8x256xf32>
    %69 = arith.mulf %63, %63 : vector<8x256xf32>
    %70 = arith.subf %68, %69 : vector<8x256xf32>
    %cst_52 = arith.constant 0.000000e+00 : f32
    %71 = vector.broadcast %cst_52 : f32 to vector<8x256xf32>
    %72 = arith.maximumf %70, %71 : vector<8x256xf32>
    %73 = arith.subf %59, %63 : vector<8x256xf32>
    %cst_53 = arith.constant 9.99999974E-6 : f32
    %74 = vector.broadcast %cst_53 : f32 to vector<8x256xf32>
    %75 = arith.addf %72, %74 : vector<8x256xf32>
    %76 = math.rsqrt %75 : vector<8x256xf32>
    %77 = arith.mulf %73, %76 : vector<8x256xf32>
    %cst_54 = arith.constant 0.000000e+00 : f32
    %78 = vector.broadcast %cst_54 : f32 to vector<8x256xf32>
    %79 = arith.cmpf oge, %77, %78 : vector<8x256xf32>
    %cst_55 = arith.constant 2.000000e-01 : f32
    %80 = vector.broadcast %cst_55 : f32 to vector<8x256xf32>
    %81 = arith.mulf %80, %77 : vector<8x256xf32>
    %82 = arith.select %79, %77, %81 : vector<8x256xi1>, vector<8x256xf32>
    %c0_56 = arith.constant 0 : index
    %c0_57 = arith.constant 0 : index
    %83 = vector.load %arg13[%c0_56, %c0_57] : memref<24x8xf32, #tpu.memory_space<vmem>>, vector<24x8xf32>
    %cst_58 = arith.constant dense<0.000000e+00> : vector<24x256xf32>
    %84 = tpu.matmul %83, %82, %cst_58 {dimension_numbers = #tpu.dot_dimension_numbers<[1], [0], [0], [1], [0, 0, 1, 1], [], []>} : vector<24x8xf32>, vector<8x256xf32>, vector<24x256xf32> -> vector<24x256xf32>
    %85 = vector.extract_strided_slice %84 {offsets = [0, 0], sizes = [8, 256], strides = [1, 1]} : vector<24x256xf32> to vector<8x256xf32>
    %86 = vector.extract_strided_slice %84 {offsets = [8, 0], sizes = [8, 256], strides = [1, 1]} : vector<24x256xf32> to vector<8x256xf32>
    %87 = vector.extract_strided_slice %84 {offsets = [16, 0], sizes = [8, 256], strides = [1, 1]} : vector<24x256xf32> to vector<8x256xf32>
    %88 = tpu.concatenate %85, %86, %87 in 1 : vector<8x256xf32>, vector<8x256xf32>, vector<8x256xf32> -> vector<8x768xf32>
    %c0_59 = arith.constant 0 : index
    %c0_60 = arith.constant 0 : index
    %89 = vector.load %arg14[%c0_59, %c0_60] : memref<768x4xf32, #tpu.memory_space<vmem>>, vector<768x4xf32>
    %cst_61 = arith.constant dense<0.000000e+00> : vector<8x4xf32>
    %90 = tpu.matmul %88, %89, %cst_61 {dimension_numbers = #tpu.dot_dimension_numbers<[1], [0], [0], [1], [0, 0, 1, 1], [], []>} : vector<8x768xf32>, vector<768x4xf32>, vector<8x4xf32> -> vector<8x4xf32>
    %c0_62 = arith.constant 0 : index
    %c0_63 = arith.constant 0 : index
    %91 = vector.load %arg15[%c0_62, %c0_63] : memref<1x4xf32, #tpu.memory_space<vmem>>, vector<1x4xf32>
    %92 = vector.broadcast %91 : vector<1x4xf32> to vector<8x4xf32>
    %93 = arith.addf %90, %92 : vector<8x4xf32>
    %c0_64 = arith.constant 0 : index
    %c0_65 = arith.constant 0 : index
    %c0_66 = arith.constant 0 : index
    %94 = vector.load %arg16[%c0_64, %c0_65, %c0_66] : memref<1x8x4xf32, #tpu.memory_space<vmem>>, vector<1x8x4xf32>
    %95 = vector.shape_cast %94 : vector<1x8x4xf32> to vector<8x4xf32>
    %96 = vector.shape_cast %93 : vector<8x4xf32> to vector<1x8x4xf32>
    tpu.vector_store %arg16[%c0_64, %c0_65, %c0_66], %96 {strides = array<i32>} : memref<1x8x4xf32, #tpu.memory_space<vmem>>, vector<1x8x4xf32>,
    return
  }
  func.func @transform_0(%arg0: i32) -> (i32, i32, i32, i32) {
    %c0_i32 = arith.constant 0 : i32
    %c0_i32_0 = arith.constant 0 : i32
    %c0_i32_1 = arith.constant 0 : i32
    %c0_i32_2 = arith.constant 0 : i32
    return %arg0, %c0_i32, %c0_i32_0, %c0_i32_1 : i32, i32, i32, i32
  }
  func.func @transform_1(%arg0: i32) -> (i32, i32) {
    %c0_i32 = arith.constant 0 : i32
    %c0_i32_0 = arith.constant 0 : i32
    %c0_i32_1 = arith.constant 0 : i32
    return %c0_i32, %c0_i32_0 : i32, i32
  }
  func.func @transform_2(%arg0: i32) -> (i32, i32) {
    %c0_i32 = arith.constant 0 : i32
    %c0_i32_0 = arith.constant 0 : i32
    %c0_i32_1 = arith.constant 0 : i32
    return %c0_i32, %c0_i32_0 : i32, i32
  }
  func.func @transform_3(%arg0: i32) -> (i32, i32) {
    %c0_i32 = arith.constant 0 : i32
    %c0_i32_0 = arith.constant 0 : i32
    %c0_i32_1 = arith.constant 0 : i32
    return %c0_i32, %c0_i32_0 : i32, i32
  }
  func.func @transform_4(%arg0: i32) -> (i32, i32) {
    %c0_i32 = arith.constant 0 : i32
    %c0_i32_0 = arith.constant 0 : i32
    %c0_i32_1 = arith.constant 0 : i32
    return %c0_i32, %c0_i32_0 : i32, i32
  }
  func.func @transform_5(%arg0: i32) -> (i32, i32) {
    %c0_i32 = arith.constant 0 : i32
    %c0_i32_0 = arith.constant 0 : i32
    %c0_i32_1 = arith.constant 0 : i32
    return %c0_i32, %c0_i32_0 : i32, i32
  }
  func.func @transform_6(%arg0: i32) -> (i32, i32) {
    %c0_i32 = arith.constant 0 : i32
    %c0_i32_0 = arith.constant 0 : i32
    %c0_i32_1 = arith.constant 0 : i32
    return %c0_i32, %c0_i32_0 : i32, i32
  }
  func.func @transform_7(%arg0: i32) -> (i32, i32) {
    %c0_i32 = arith.constant 0 : i32
    %c0_i32_0 = arith.constant 0 : i32
    %c0_i32_1 = arith.constant 0 : i32
    return %c0_i32, %c0_i32_0 : i32, i32
  }
  func.func @transform_8(%arg0: i32) -> (i32, i32) {
    %c0_i32 = arith.constant 0 : i32
    %c0_i32_0 = arith.constant 0 : i32
    %c0_i32_1 = arith.constant 0 : i32
    return %c0_i32, %c0_i32_0 : i32, i32
  }
  func.func @transform_9(%arg0: i32) -> (i32, i32) {
    %c0_i32 = arith.constant 0 : i32
    %c0_i32_0 = arith.constant 0 : i32
    %c0_i32_1 = arith.constant 0 : i32
    return %c0_i32, %c0_i32_0 : i32, i32
  }
  func.func @transform_10(%arg0: i32) -> (i32, i32) {
    %c0_i32 = arith.constant 0 : i32
    %c0_i32_0 = arith.constant 0 : i32
    %c0_i32_1 = arith.constant 0 : i32
    return %c0_i32, %c0_i32_0 : i32, i32
  }
  func.func @transform_11(%arg0: i32) -> (i32, i32) {
    %c0_i32 = arith.constant 0 : i32
    %c0_i32_0 = arith.constant 0 : i32
    %c0_i32_1 = arith.constant 0 : i32
    return %c0_i32, %c0_i32_0 : i32, i32
  }
  func.func @transform_12(%arg0: i32) -> (i32, i32) {
    %c0_i32 = arith.constant 0 : i32
    %c0_i32_0 = arith.constant 0 : i32
    %c0_i32_1 = arith.constant 0 : i32
    return %c0_i32, %c0_i32_0 : i32, i32
  }
  func.func @transform_13(%arg0: i32) -> (i32, i32) {
    %c0_i32 = arith.constant 0 : i32
    %c0_i32_0 = arith.constant 0 : i32
    %c0_i32_1 = arith.constant 0 : i32
    return %c0_i32, %c0_i32_0 : i32, i32
  }
  func.func @transform_14(%arg0: i32) -> (i32, i32) {
    %c0_i32 = arith.constant 0 : i32
    %c0_i32_0 = arith.constant 0 : i32
    %c0_i32_1 = arith.constant 0 : i32
    return %c0_i32, %c0_i32_0 : i32, i32
  }
  func.func @transform_15(%arg0: i32) -> (i32, i32, i32) {
    %c0_i32 = arith.constant 0 : i32
    %c0_i32_0 = arith.constant 0 : i32
    %c0_i32_1 = arith.constant 0 : i32
    return %arg0, %c0_i32, %c0_i32_0 : i32, i32, i32
  }
}

</mosaic_0001>

<bundles_post_ra>
// kernel: _lambda_.1
= control target key start
LH: loop header
LB: loop body
LE: loop exit
PB: predicated region body
PF: predicated region fallthrough
CT: control target
= control target key end

     0   :  { %20 = vsyncpa [#allocation3], 0  ;;  %s5177_s0 = inlined_call_operand.hbm [shape: f32[2,2,32,32], index: 0, kind: input, shape index: {}]   ;;  %s5178_s1 = inlined_call_operand.hbm [shape: f32[192,128], index: 1, kind: input, shape index: {}]   ;;  %s5179_s2 = inlined_call_operand.hbm [shape: f32[192,256], index: 2, kind: input, shape index: {}]   ;;  %s5180_s3 = inlined_call_operand.hbm [shape: f32[1,256], index: 3, kind: input, shape index: {}]   ;;  %s5181_s4 = inlined_call_operand.hbm [shape: f32[48,32], index: 4, kind: input, shape index: {}]   ;;  %s5182_s5 = inlined_call_operand.hbm [shape: f32[768,256], index: 5, kind: input, shape index: {}]   ;;  %s5183_s6 = inlined_call_operand.hbm [shape: f32[16,16], index: 6, kind: input, shape index: {}]   ;;  %s5184_s7 = inlined_call_operand.hbm [shape: f32[256,256], index: 7, kind: input, shape index: {}]   ;;  %s5185_s8 = inlined_call_operand.vmem [shape: f32[24,16], index: 8, kind: input, shape index: {}]   ;;  %s5186_s9 = inlined_call_operand.hbm [shape: f32[768,256], index: 9, kind: input, shape index: {}]   ;;  %s5187_s10 = inlined_call_operand.hbm [shape: f32[8,8], index: 10, kind: input, shape index: {}]   ;;  %s5188_s11 = inlined_call_operand.hbm [shape: f32[256,256], index: 11, kind: input, shape index: {}]   ;;  %s5189_s12 = inlined_call_operand.vmem [shape: f32[24,8], index: 12, kind: input, shape index: {}]   ;;  %s5190_s13 = inlined_call_operand.hbm [shape: f32[768,4], index: 13, kind: input, shape index: {}]   ;;  %s5191_s14 = inlined_call_operand.vmem [shape: f32[1,4], index: 14, kind: input, shape index: {}]   ;;  %s5192_s15 = inlined_call_operand.hbm [shape: f32[1,8,4], index: 15, kind: output, shape index: {}]  }
   0x1   :  { %21 = vsyncpa [#allocation6], 0 }
   0x2   :  { %22 = vsyncpa [#allocation9], 0 }
   0x3   :  { %23 = vsyncpa [#allocation12], 0 }
   0x4   :  { %24 = vsyncpa [#allocation15], 0 }
   0x5   :  { %25 = vsyncpa [#allocation18], 0 }
   0x6   :  { %26 = vsyncpa [#allocation21], 0 }
   0x7   :  { %27 = vsyncpa [#allocation4], 0  ;;  %s4426_s18 = smov [#allocation5]   ;;  %s4427_s20 = smov [#allocation8]  }
   0x8   :  { %s45_s19 = sshll.u32 %s4426_s18, 4  ;;  %s70_s21 = sshll.u32 %s4427_s20, 4  ;;  %s46_s19 = int_to_ptr.vmem [resolvable:$true] %s45_s19  ;;  %s71_s21 = int_to_ptr.vmem [resolvable:$true] %s70_s21 }
   0x9   :  { %s4124_s24 = scalar_lea.hbm %s5178_s1, 3072 }
   0xa   :  { %p4125_p0 = scmp.ne.s32.totalorder %s5178_s1, %s4124_s24  ;;  %p4128_p1 = scmp.lt.u32.totalorder %s4124_s24, %s5178_s1 }
   0xc   :  { %p4130_p2 = pnand %p4128_p1, %p4125_p0 }
   0xe   :  { %4133 = shalt.err (!%p4130_p2)
}
   0xf   :  { %s4134_s29 = scalar_lea.vmem %s46_s19, 3072  ;;  %p4139_p4 = scmp.lt.s32.totalorder %s46_s19, %s46_s19 }
  0x10   :  { %p4135_p3 = scmp.ne.s32.totalorder %s46_s19, %s4134_s29  ;;  %p4140_p5 = scmp.lt.s32.totalorder %s4134_s29, %s4134_s29 }
  0x12   :  { %p4141_p6 = por %p4140_p5, %p4139_p4 }
  0x14   :  { %p4142_p7 = pnand %p4141_p6, %p4135_p3 }
  0x16   :  { %4145 = shalt.err (!%p4142_p7)
}
  0x17   :  { %s4428_s30 = smov 128   ;;  %s4429_s16 = smov 8  }
  0x18   :  { %51 = dma.hbm_to_vmem [thread:$0]  %s5178_s1, 3072, %s46_s19, [#allocation6], %s4428_s30, %s4428_s30, %s4429_s16  }
  0x19   :  { %s4146_s23 = scalar_lea.hbm %s5180_s3, 32 }
  0x1a   :  { %p4147_p8 = scmp.ne.s32.totalorder %s5180_s3, %s4146_s23  ;;  %p4150_p9 = scmp.lt.u32.totalorder %s4146_s23, %s5180_s3 }
  0x1c   :  { %p4152_p10 = pnand %p4150_p9, %p4147_p8 }
  0x1e   :  { %4155 = shalt.err (!%p4152_p10)
}
  0x1f   :  { %s4156_s28 = scalar_lea.vmem %s71_s21, 32  ;;  %p4161_p12 = scmp.lt.s32.totalorder %s71_s21, %s71_s21 }
  0x20   :  { %p4157_p11 = scmp.ne.s32.totalorder %s71_s21, %s4156_s28  ;;  %p4162_p13 = scmp.lt.s32.totalorder %s4156_s28, %s4156_s28 }
  0x22   :  { %p4163_p0 = por %p4162_p13, %p4161_p12 }
  0x24   :  { %p4164_p1 = pnand %p4163_p0, %p4157_p11 }
  0x26   :  { %4167 = shalt.err (!%p4164_p1)
}
  0x27   :  { %73 = dma.hbm_to_vmem [thread:$0]  %s5180_s3, 32, %s71_s21, [#allocation9]  }
  0x28   :  { %s4430_s29 = smov [#allocation11]   ;;  %s4431_s18 = smov [#allocation14]  }
  0x29   :  { %s91_s17 = sshll.u32 %s4430_s29, 4  ;;  %s115_s20 = sshll.u32 %s4431_s18, 4  ;;  %s92_s17 = int_to_ptr.vmem [resolvable:$true] %s91_s17  ;;  %s4554_s20 = int_to_ptr.vmem [resolvable:$true] %s115_s20 }
  0x2a   :  { %s4168_s24 = scalar_lea.hbm %s5182_s5, 24576 }
  0x2b   :  { %p4169_p2 = scmp.ne.s32.totalorder %s5182_s5, %s4168_s24  ;;  %p4172_p3 = scmp.lt.u32.totalorder %s4168_s24, %s5182_s5 }
  0x2d   :  { %p4174_p4 = pnand %p4172_p3, %p4169_p2 }
  0x2f   :  { %4177 = shalt.err (!%p4174_p4)
}
  0x30   :  { %s4178_s3 = scalar_lea.vmem %s92_s17, 24576  ;;  %p4183_p6 = scmp.lt.s32.totalorder %s92_s17, %s92_s17 }
  0x31   :  { %p4179_p5 = scmp.ne.s32.totalorder %s92_s17, %s4178_s3  ;;  %p4184_p7 = scmp.lt.s32.totalorder %s4178_s3, %s4178_s3 }
  0x33   :  { %p4185_p8 = por %p4184_p7, %p4183_p6 }
  0x35   :  { %p4186_p9 = pnand %p4185_p8, %p4179_p5 }
  0x37   :  { %4189 = shalt.err (!%p4186_p9)
}
  0x38   :  { %s4432_s21 = smov 256   ;;  %s4433_s1 = smov 16  }
  0x39   :  { %97 = dma.hbm_to_vmem [thread:$0]  %s5182_s5, 24576, %s92_s17, [#allocation12], %s4432_s21, %s4432_s21, %s4433_s1  }
  0x3a   :  { %s4190_s23 = scalar_lea.hbm %s5184_s7, 8192 }
  0x3b   :  { %p4191_p10 = scmp.ne.s32.totalorder %s5184_s7, %s4190_s23  ;;  %p4194_p11 = scmp.lt.u32.totalorder %s4190_s23, %s5184_s7 }
  0x3d   :  { %p4196_p12 = pnand %p4194_p11, %p4191_p10 }
  0x3f   :  { %4199 = shalt.err (!%p4196_p12)
}
  0x40   :  { %s4200_s28 = scalar_lea.vmem %s4554_s20, 8192  ;;  %p4205_p0 = scmp.lt.s32.totalorder %s4554_s20, %s4554_s20 }
  0x41   :  { %p4201_p13 = scmp.ne.s32.totalorder %s4554_s20, %s4200_s28  ;;  %p4206_p1 = scmp.lt.s32.totalorder %s4200_s28, %s4200_s28 }
  0x43   :  { %p4207_p2 = por %p4206_p1, %p4205_p0 }
  0x45   :  { %p4208_p3 = pnand %p4207_p2, %p4201_p13 }
  0x47   :  { %4211 = shalt.err (!%p4208_p3)
}
  0x48   :  { %121 = dma.hbm_to_vmem [thread:$0]  %s5184_s7, 8192, %s4554_s20, [#allocation15], %s4432_s21, %s4432_s21, %s4433_s1  }
  0x49   :  { %s4434_s3 = smov [#allocation17]   ;;  %s4435_s29 = smov [#allocation2]  }
  0x4a   :  { %s142_s19 = sshll.u32 %s4434_s3, 4  ;;  %s33_s18 = sshll.u32 %s4435_s29, 4  ;;  %s143_s19 = int_to_ptr.vmem [resolvable:$true] %s142_s19  ;;  %s4591_s18 = int_to_ptr.vmem [resolvable:$true] %s33_s18 }
  0x4b   :  { %s4212_s24 = scalar_lea.hbm %s5187_s10, 128 }
  0x4c   :  { %p4213_p4 = scmp.ne.s32.totalorder %s5187_s10, %s4212_s24  ;;  %p4216_p5 = scmp.lt.u32.totalorder %s4212_s24, %s5187_s10 }
  0x4e   :  { %p4218_p6 = pnand %p4216_p5, %p4213_p4 }
  0x50   :  { %4221 = shalt.err (!%p4218_p6)
}
  0x51   :  { %s4222_s7 = scalar_lea.vmem %s143_s19, 128  ;;  %p4227_p8 = scmp.lt.s32.totalorder %s143_s19, %s143_s19 }
  0x52   :  { %p4223_p7 = scmp.ne.s32.totalorder %s143_s19, %s4222_s7  ;;  %p4228_p9 = scmp.lt.s32.totalorder %s4222_s7, %s4222_s7 }
  0x54   :  { %p4229_p10 = por %p4228_p9, %p4227_p8 }
  0x56   :  { %p4230_p11 = pnand %p4229_p10, %p4223_p7 }
  0x58   :  { %4233 = shalt.err (!%p4230_p11)
}
  0x59   :  { %145 = dma.hbm_to_vmem [thread:$0]  %s5187_s10, 128, %s143_s19, [#allocation18]  }
  0x5a   :  { %s4234_s29 = scalar_lea.hbm %s5177_s0, 2048 }
  0x5b   :  { %p4235_p12 = scmp.ne.s32.totalorder %s5177_s0, %s4234_s29  ;;  %p4238_p13 = scmp.lt.u32.totalorder %s4234_s29, %s5177_s0 }
  0x5d   :  { %p4240_p0 = pnand %p4238_p13, %p4235_p12 }
  0x5f   :  { %4243 = shalt.err (!%p4240_p0)
}
  0x60   :  { %s4244_s26 = scalar_lea.vmem %s4591_s18, 2048  ;;  %p4249_p2 = scmp.lt.s32.totalorder %s4591_s18, %s4591_s18 }
  0x61   :  { %p4245_p1 = scmp.ne.s32.totalorder %s4591_s18, %s4244_s26  ;;  %p4250_p3 = scmp.lt.s32.totalorder %s4244_s26, %s4244_s26 }
  0x63   :  { %p4251_p4 = por %p4250_p3, %p4249_p2 }
  0x65   :  { %p4252_p5 = pnand %p4251_p4, %p4245_p1 }
  0x67   :  { %4255 = shalt.err (!%p4252_p5)
}
  0x68   :  { %39 = dma.hbm_to_vmem [thread:$0]  %s5177_s0, 2048, %s4591_s18, [#allocation3], %s4428_s30, %s4428_s30, %s4429_s16  }
  0x69   :  { %s4436_s27 = smov [#allocation7]   ;;  %s4437_s7 = smov [#allocation10]  }
  0x6a   :  { %s57_s28 = sshll.u32 %s4436_s27, 4  ;;  %s79_s20 = sshll.u32 %s4437_s7, 4  ;;  %s58_s28 = int_to_ptr.vmem [resolvable:$true] %s57_s28  ;;  %s4625_s20 = int_to_ptr.vmem [resolvable:$true] %s79_s20 }
  0x6b   :  { %s4256_s3 = scalar_lea.hbm %s5179_s2, 6144 }
  0x6c   :  { %p4257_p6 = scmp.ne.s32.totalorder %s5179_s2, %s4256_s3  ;;  %p4260_p7 = scmp.lt.u32.totalorder %s4256_s3, %s5179_s2 }
  0x6e   :  { %p4262_p8 = pnand %p4260_p7, %p4257_p6 }
  0x70   :  { %4265 = shalt.err (!%p4262_p8)
}
  0x71   :  { %s4266_s0 = scalar_lea.vmem %s58_s28, 6144  ;;  %p4271_p10 = scmp.lt.s32.totalorder %s58_s28, %s58_s28 }
  0x72   :  { %p4267_p9 = scmp.ne.s32.totalorder %s58_s28, %s4266_s0  ;;  %p4272_p11 = scmp.lt.s32.totalorder %s4266_s0, %s4266_s0 }
  0x74   :  { %p4273_p12 = por %p4272_p11, %p4271_p10 }
  0x76   :  { %p4274_p13 = pnand %p4273_p12, %p4267_p9 }
  0x78   :  { %4277 = shalt.err (!%p4274_p13)
}
  0x79   :  { %63 = dma.hbm_to_vmem [thread:$0]  %s5179_s2, 6144, %s58_s28, [#allocation6], %s4432_s21, %s4432_s21, %s4433_s1  }
  0x7a   :  { %s4278_s19 = scalar_lea.hbm %s5181_s4, 768 }
  0x7b   :  { %p4279_p0 = scmp.ne.s32.totalorder %s5181_s4, %s4278_s19  ;;  %p4282_p1 = scmp.lt.u32.totalorder %s4278_s19, %s5181_s4 }
  0x7d   :  { %p4284_p2 = pnand %p4282_p1, %p4279_p0 }
  0x7f   :  { %4287 = shalt.err (!%p4284_p2)
}
  0x80   :  { %s4288_s3 = scalar_lea.vmem %s4625_s20, 768  ;;  %p4293_p4 = scmp.lt.s32.totalorder %s4625_s20, %s4625_s20 }
  0x81   :  { %p4289_p3 = scmp.ne.s32.totalorder %s4625_s20, %s4288_s3  ;;  %p4294_p5 = scmp.lt.s32.totalorder %s4288_s3, %s4288_s3 }
  0x83   :  { %p4295_p6 = por %p4294_p5, %p4293_p4 }
  0x85   :  { %p4296_p7 = pnand %p4295_p6, %p4289_p3 }
  0x87   :  { %4299 = shalt.err (!%p4296_p7)
}
  0x88   :  { %85 = dma.hbm_to_vmem [thread:$0]  %s5181_s4, 768, %s4625_s20, [#allocation9], %s4428_s30, %s4428_s30, %s4429_s16  }
  0x89   :  { %s4438_s29 = smov [#allocation13]   ;;  %s4439_s23 = smov [#allocation16]  }
  0x8a   :  { %s103_s22 = sshll.u32 %s4438_s29, 4  ;;  %s129_s24 = sshll.u32 %s4439_s23, 4  ;;  %s104_s22 = int_to_ptr.vmem [resolvable:$true] %s103_s22  ;;  %s4662_s24 = int_to_ptr.vmem [resolvable:$true] %s129_s24 }
  0x8b   :  { %s4300_s25 = scalar_lea.hbm %s5183_s6, 256 }
  0x8c   :  { %p4301_p8 = scmp.ne.s32.totalorder %s5183_s6, %s4300_s25  ;;  %p4304_p9 = scmp.lt.u32.totalorder %s4300_s25, %s5183_s6 }
  0x8e   :  { %p4306_p10 = pnand %p4304_p9, %p4301_p8 }
  0x90   :  { %4309 = shalt.err (!%p4306_p10)
}
  0x91   :  { %s4310_s4 = scalar_lea.vmem %s104_s22, 256  ;;  %p4315_p12 = scmp.lt.s32.totalorder %s104_s22, %s104_s22 }
  0x92   :  { %p4311_p11 = scmp.ne.s32.totalorder %s104_s22, %s4310_s4  ;;  %p4316_p13 = scmp.lt.s32.totalorder %s4310_s4, %s4310_s4 }
  0x94   :  { %p4317_p0 = por %p4316_p13, %p4315_p12 }
  0x96   :  { %p4318_p1 = pnand %p4317_p0, %p4311_p11 }
  0x98   :  { %4321 = shalt.err (!%p4318_p1)
}
  0x99   :  { %109 = dma.hbm_to_vmem [thread:$0]  %s5183_s6, 256, %s104_s22, [#allocation12], %s4428_s30, %s4428_s30, %s4429_s16  }
  0x9a   :  { %s4322_s3 = scalar_lea.hbm %s5186_s9, 24576 }
  0x9b   :  { %p4323_p2 = scmp.ne.s32.totalorder %s5186_s9, %s4322_s3  ;;  %p4326_p3 = scmp.lt.u32.totalorder %s4322_s3, %s5186_s9 }
  0x9d   :  { %p4328_p4 = pnand %p4326_p3, %p4323_p2 }
  0x9f   :  { %4331 = shalt.err (!%p4328_p4)
}
  0xa0   :  { %s4332_s0 = scalar_lea.vmem %s4662_s24, 24576  ;;  %p4337_p6 = scmp.lt.s32.totalorder %s4662_s24, %s4662_s24 }
  0xa1   :  { %p4333_p5 = scmp.ne.s32.totalorder %s4662_s24, %s4332_s0  ;;  %p4338_p7 = scmp.lt.s32.totalorder %s4332_s0, %s4332_s0 }
  0xa3   :  { %p4339_p8 = por %p4338_p7, %p4337_p6 }
  0xa5   :  { %p4340_p9 = pnand %p4339_p8, %p4333_p5 }
  0xa7   :  { %4343 = shalt.err (!%p4340_p9)
}
  0xa8   :  { %135 = dma.hbm_to_vmem [thread:$0]  %s5186_s9, 24576, %s4662_s24, [#allocation15], %s4432_s21, %s4432_s21, %s4433_s1  }
  0xa9   :  { %s4440_s18 = smov [#allocation19]   ;;  %s4441_s26 = smov [#allocation20]  }
  0xaa   :  { %s151_s25 = sshll.u32 %s4440_s18, 4  ;;  %s165_s10 = sshll.u32 %s4441_s26, 4  ;;  %s152_s25 = int_to_ptr.vmem [resolvable:$true] %s151_s25  ;;  %s4699_s10 = int_to_ptr.vmem [resolvable:$true] %s165_s10 }
  0xab   :  { %s4344_s4 = scalar_lea.hbm %s5188_s11, 8192 }
  0xac   :  { %p4345_p10 = scmp.ne.s32.totalorder %s5188_s11, %s4344_s4  ;;  %p4348_p11 = scmp.lt.u32.totalorder %s4344_s4, %s5188_s11 }
  0xae   :  { %p4350_p12 = pnand %p4348_p11, %p4345_p10 }
  0xb0   :  { %4353 = shalt.err (!%p4350_p12)
}
  0xb1   :  { %s4354_s9 = scalar_lea.vmem %s152_s25, 8192  ;;  %p4359_p0 = scmp.lt.s32.totalorder %s152_s25, %s152_s25 }
  0xb2   :  { %p4355_p13 = scmp.ne.s32.totalorder %s152_s25, %s4354_s9  ;;  %p4360_p1 = scmp.lt.s32.totalorder %s4354_s9, %s4354_s9 }
  0xb4   :  { %p4361_p2 = por %p4360_p1, %p4359_p0 }
  0xb6   :  { %p4362_p3 = pnand %p4361_p2, %p4355_p13 }
  0xb8   :  { %4365 = shalt.err (!%p4362_p3)
}
  0xb9   :  { %157 = dma.hbm_to_vmem [thread:$0]  %s5188_s11, 8192, %s152_s25, [#allocation18], %s4432_s21, %s4432_s21, %s4433_s1  }
  0xba   :  { %s4366_s29 = scalar_lea.hbm %s5190_s13, 12288 }
  0xbb   :  { %p4367_p4 = scmp.ne.s32.totalorder %s5190_s13, %s4366_s29  ;;  %p4370_p5 = scmp.lt.u32.totalorder %s4366_s29, %s5190_s13 }
  0xbd   :  { %p4372_p6 = pnand %p4370_p5, %p4367_p4 }
  0xbf   :  { %4375 = shalt.err (!%p4372_p6)
}
  0xc0   :  { %s4376_s18 = scalar_lea.vmem %s4699_s10, 12288  ;;  %p4381_p8 = scmp.lt.s32.totalorder %s4699_s10, %s4699_s10 }
  0xc1   :  { %p4377_p7 = scmp.ne.s32.totalorder %s4699_s10, %s4376_s18  ;;  %p4382_p9 = scmp.lt.s32.totalorder %s4376_s18, %s4376_s18 }
  0xc3   :  { %p4383_p10 = por %p4382_p9, %p4381_p8 }
  0xc5   :  { %p4384_p11 = pnand %p4383_p10, %p4377_p7 }
  0xc7   :  { %4387 = shalt.err (!%p4384_p11)
}
  0xc8   :  { %171 = dma.hbm_to_vmem [thread:$0]  %s5190_s13, 12288, %s4699_s10, [#allocation21], %s4428_s30, %s4428_s30, %s4429_s16  }
  0xc9   :  { %4410 = dma.done.wait [#allocation3], 2048  }
  0xca   :  { %4411 = vsyncadd [#allocation3], 4294965248 }
  0xcb   :  { %4412 = dma.done.wait [#allocation6], 9216  }
  0xcc   :  { %4413 = vsyncadd [#allocation6], 4294958080 }
  0xcd   :  { %4414 = dma.done.wait [#allocation9], 800  }
  0xce   :  { %4415 = vsyncadd [#allocation9], 4294966496 }
  0xcf   :  { %4416 = dma.done.wait [#allocation12], 24832  }
  0xd0   :  { %4417 = vsyncadd [#allocation12], 4294942464 }
  0xd1   :  { %4418 = dma.done.wait [#allocation15], 32768  }
  0xd2   :  { %4419 = vsyncadd [#allocation15], 4294934528 }
  0xd3   :  { %4420 = dma.done.wait [#allocation18], 8320  }
  0xd4   :  { %4421 = vsyncadd [#allocation18], 4294958976 }
  0xd5   :  { %4422 = dma.done.wait [#allocation21], 12288  }
  0xd6   :  { %4423 = vsyncadd [#allocation21], 4294955008  ;;  %v210_v0 = vld [vmem:[#allocation2] sm:$0xff]  ;;  %v211_v1 = vld [vmem:[#allocation2 + $0x8] sm:$0xff]  ;;  %s4442_s13 = smov 32   ;;  %s4443_s30 = smov 64  }
  0xd7   :  { %v212_v2 = vld [vmem:[#allocation2 + $0x10] sm:$0xff]  ;;  %v3218_v3 = vpack.c.bf16 %v211_v1, %v210_v0  ;;  %v213_v4 = vld [vmem:[#allocation2 + $0x18] sm:$0xff]  ;;  %v214_v6 = vld [vmem:[#allocation2 + $0x20] sm:$0xff]  ;;  %s4444_s16 = smov 96   ;;  %vm499_vm0 = vcmask 261120   ;;  %vm504_vm1 = vcmask 523264  }
  0xd8   :  { %v3222_v5 = vpack.c.bf16 %v213_v4, %v212_v2  ;;  %v215_v7 = vld [vmem:[#allocation2 + $0x28] sm:$0xff]  ;;  %v226_v9 = vld [vmem:[#allocation5] sm:$0xff]  ;;  %v216_v10 = vld [vmem:[#allocation2 + $0x30] sm:$0xff]  ;;  %vm509_vm2 = vcmask 785408   ;;  %vm1253_vm11 = vcmask 130048   ;;  %s4446_s24 = smov [#allocation22]  }
  0xd9   :  { %3219 = vmatprep.subr.bf16.mxu0 %v3218_v3  ;;  %v3226_v8 = vpack.c.bf16 %v215_v7, %v214_v6  ;;  %v217_v11 = vld [vmem:[#allocation2 + $0x38] sm:$0xff]  ;;  %3182 = vmatprep.mubr.f32.mxu0 %v226_v9  ;;  %v218_v13 = vld [vmem:[#allocation2 + $0x40] sm:$0xff]  ;;  %v219_v14 = vld [vmem:[#allocation2 + $0x48] sm:$0xff]  ;;  %s2967_s3 = sshll.u32 %s4446_s24, 4  ;;  %s2968_s3 = int_to_ptr.vmem [resolvable:$true] %s2967_s3 }
  0xda   :  { %3221 = vmatpush3.bf16.msra.mxu0 %v3218_v3  ;;  %v3230_v12 = vpack.c.bf16 %v217_v11, %v216_v10  ;;  %v3234_v15 = vpack.c.bf16 %v219_v14, %v218_v13  ;;  %v220_v16 = vld [vmem:[#allocation2 + $0x50] sm:$0xff]  ;;  %v221_v17 = vld [vmem:[#allocation2 + $0x58] sm:$0xff]  ;;  %v222_v19 = vld [vmem:[#allocation2 + $0x60] sm:$0xff]  ;;  %s4388_s2 = scalar_lea.vmem %s2968_s3, 128  ;;  %p4393_p13 = scmp.lt.s32.totalorder %s2968_s3, %s2968_s3 }
  0xdb   :  { %3223 = vmatprep.subr.bf16.mxu0 %v3222_v5  ;;  %v3238_v18 = vpack.c.bf16 %v221_v17, %v220_v16  ;;  %v223_v20 = vld [vmem:[#allocation2 + $0x68] sm:$0xff]  ;;  %v224_v22 = vld [vmem:[#allocation2 + $0x70] sm:$0xff]  ;;  %v225_v23 = vld [vmem:[#allocation2 + $0x78] sm:$0xff]  ;;  %p4389_p12 = scmp.ne.s32.totalorder %s2968_s3, %s4388_s2  ;;  %p4394_p0 = scmp.lt.s32.totalorder %s4388_s2, %s4388_s2 }
  0xdc   :  { %v3242_v21 = vpack.c.bf16 %v223_v20, %v222_v19  ;;  %v3246_v24 = vpack.c.bf16 %v225_v23, %v224_v22  ;;  %v227_v25 = vld [vmem:[#allocation5 + $0x8] sm:$0xff]  ;;  %v228_v26 = vld [vmem:[#allocation5 + $0x10] sm:$0xff]  ;;  %v229_v27 = vld [vmem:[#allocation5 + $0x18] sm:$0xff] }
  0xdd   :  { %v230_v28 = vld [vmem:[#allocation5 + $0x20] sm:$0xff]  ;;  %v231_v29 = vld [vmem:[#allocation5 + $0x28] sm:$0xff]  ;;  %v232_v30 = vld [vmem:[#allocation5 + $0x30] sm:$0xff]  ;;  %p4395_p1 = por %p4394_p0, %p4393_p13 }
  0xde   :  { %3225 = vmatpush3.bf16.msra.mxu0 %v3222_v5  ;;  %v233_v31 = vld [vmem:[#allocation5 + $0x38] sm:$0xff]  ;;  %v234_v32 = vld [vmem:[#allocation5 + $0x40] sm:$0xff]  ;;  %v235_v33 = vld [vmem:[#allocation5 + $0x48] sm:$0xff] }
  0xdf   :  { %3227 = vmatprep.subr.bf16.mxu0 %v3226_v8  ;;  %v236_v34 = vld [vmem:[#allocation5 + $0x50] sm:$0xff]  ;;  %v237_v35 = vld [vmem:[#allocation5 + $0x58] sm:$0xff]  ;;  %v238_v36 = vld [vmem:[#allocation5 + $0x60] sm:$0xff]  ;;  %p4396_p2 = pnand %p4395_p1, %p4389_p12 }
  0xe0   :  { %v239_v37 = vld [vmem:[#allocation5 + $0x68] sm:$0xff]  ;;  %v240_v38 = vld [vmem:[#allocation5 + $0x70] sm:$0xff]  ;;  %v241_v39 = vld [vmem:[#allocation5 + $0x78] sm:$0xff] }
  0xe1   :  { %v242_v40 = vld [vmem:[#allocation5 + $0x80] sm:$0xff]  ;;  %v243_v41 = vld [vmem:[#allocation5 + $0x88] sm:$0xff]  ;;  %v244_v42 = vld [vmem:[#allocation5 + $0x90] sm:$0xff] }
  0xe2   :  { %3229 = vmatpush3.bf16.msra.mxu0 %v3226_v8  ;;  %v245_v43 = vld [vmem:[#allocation5 + $0x98] sm:$0xff]  ;;  %v246_v44 = vld [vmem:[#allocation5 + $0xa0] sm:$0xff]  ;;  %v247_v45 = vld [vmem:[#allocation5 + $0xa8] sm:$0xff] }
  0xe3   :  { %3231 = vmatprep.subr.bf16.mxu0 %v3230_v12  ;;  %v248_v46 = vld [vmem:[#allocation5 + $0xb0] sm:$0xff]  ;;  %v249_v47 = vld [vmem:[#allocation5 + $0xb8] sm:$0xff]  ;;  %v519_v48 = vld [vmem:[#allocation7 + $0x8] sm:$0xff] }
  0xe4   :  { %v521_v49 = vld [vmem:[#allocation7 + $0x18] sm:$0xff]  ;;  %v518_v50 = vld [vmem:[#allocation7] sm:$0xff]  ;;  %v520_v52 = vld [vmem:[#allocation7 + $0x10] sm:$0xff] }
  0xe5   :  { %v3250_v51 = vpack.c.bf16 %v521_v49, %v519_v48  ;;  %v523_v53 = vld [vmem:[#allocation7 + $0x28] sm:$0xff]  ;;  %v525_v54 = vld [vmem:[#allocation7 + $0x38] sm:$0xff]  ;;  %v3252_v55 = vpack.c.bf16 %v520_v52, %v518_v50  ;;  %v522_v57 = vld [vmem:[#allocation7 + $0x20] sm:$0xff] }
  0xe6   :  { %3233 = vmatpush3.bf16.msra.mxu0 %v3230_v12  ;;  %v3254_v56 = vpack.c.bf16 %v525_v54, %v523_v53  ;;  %v524_v58 = vld [vmem:[#allocation7 + $0x30] sm:$0xff]  ;;  %v527_v59 = vld [vmem:[#allocation7 + $0x48] sm:$0xff]  ;;  %v529_v60 = vld [vmem:[#allocation7 + $0x58] sm:$0xff] }
  0xe7   :  { %3235 = vmatprep.subr.bf16.mxu0 %v3234_v15  ;;  %3251 = vmatprep.subr.bf16.mxu1 %v3250_v51  ;;  %v3256_v61 = vpack.c.bf16 %v524_v58, %v522_v57  ;;  %v3258_v62 = vpack.c.bf16 %v529_v60, %v527_v59  ;;  %v526_v63 = vld [vmem:[#allocation7 + $0x40] sm:$0xff]  ;;  %v528_v0 = vld [vmem:[#allocation7 + $0x50] sm:$0xff]  ;;  %v531_v1 = vld [vmem:[#allocation7 + $0x68] sm:$0xff] }
  0xe8   :  { %3253 = vmatpush1.bf16.msra.mxu1 %v3252_v55  ;;  %v533_v2 = vld [vmem:[#allocation7 + $0x78] sm:$0xff]  ;;  %v3260_v3 = vpack.c.bf16 %v528_v0, %v526_v63  ;;  %v530_v5 = vld [vmem:[#allocation7 + $0x60] sm:$0xff]  ;;  %v532_v6 = vld [vmem:[#allocation7 + $0x70] sm:$0xff] }
  0xe9   :  { %3255 = vmatprep.subr.bf16.mxu1 %v3254_v56  ;;  %v3262_v4 = vpack.c.bf16 %v533_v2, %v531_v1  ;;  %v3264_v7 = vpack.c.bf16 %v532_v6, %v530_v5  ;;  %v535_v8 = vld [vmem:[#allocation7 + $0x88] sm:$0xff]  ;;  %v537_v9 = vld [vmem:[#allocation7 + $0x98] sm:$0xff]  ;;  %v534_v11 = vld [vmem:[#allocation7 + $0x80] sm:$0xff] }
  0xea   :  { %3237 = vmatpush3.bf16.msra.mxu0 %v3234_v15  ;;  %v3266_v10 = vpack.c.bf16 %v537_v9, %v535_v8  ;;  %v536_v12 = vld [vmem:[#allocation7 + $0x90] sm:$0xff]  ;;  %v539_v14 = vld [vmem:[#allocation7 + $0xa8] sm:$0xff]  ;;  %v541_v15 = vld [vmem:[#allocation7 + $0xb8] sm:$0xff] }
  0xeb   :  { %3239 = vmatprep.subr.bf16.mxu0 %v3238_v18  ;;  %v3268_v13 = vpack.c.bf16 %v536_v12, %v534_v11  ;;  %v538_v16 = vld [vmem:[#allocation7 + $0xa0] sm:$0xff]  ;;  %v540_v19 = vld [vmem:[#allocation7 + $0xb0] sm:$0xff]  ;;  %v543_v23 = vld [vmem:[#allocation7 + $0xc8] sm:$0xff] }
  0xec   :  { %3257 = vmatpush1.bf16.msra.mxu1 %v3256_v61  ;;  %v555_v48 = vld [vmem:[#allocation7 + $0x128] sm:$0xff]  ;;  %v557_v49 = vld [vmem:[#allocation7 + $0x138] sm:$0xff]  ;;  %v554_v50 = vld [vmem:[#allocation7 + $0x120] sm:$0xff] }
  0xed   :  { %3259 = vmatprep.subr.bf16.mxu1 %v3258_v62  ;;  %v3286_v52 = vpack.c.bf16 %v557_v49, %v555_v48  ;;  %v556_v53 = vld [vmem:[#allocation7 + $0x130] sm:$0xff]  ;;  %v559_v54 = vld [vmem:[#allocation7 + $0x148] sm:$0xff]  ;;  %v561_v55 = vld [vmem:[#allocation7 + $0x158] sm:$0xff] }
  0xee   :  { %3241 = vmatpush3.bf16.msra.mxu0 %v3238_v18  ;;  %v3270_v18 = vpack.c.bf16 %v541_v15, %v539_v14  ;;  %v3288_v57 = vpack.c.bf16 %v556_v53, %v554_v50  ;;  %v3290_v58 = vpack.c.bf16 %v561_v55, %v559_v54  ;;  %v558_v59 = vld [vmem:[#allocation7 + $0x140] sm:$0xff]  ;;  %v560_v60 = vld [vmem:[#allocation7 + $0x150] sm:$0xff]  ;;  %v563_v62 = vld [vmem:[#allocation7 + $0x168] sm:$0xff] }
  0xef   :  { %3243 = vmatprep.subr.bf16.mxu0 %v3242_v21  ;;  %v565_v63 = vld [vmem:[#allocation7 + $0x178] sm:$0xff]  ;;  %v3292_v1 = vpack.c.bf16 %v560_v60, %v558_v59  ;;  %v564_v8 = vld [vmem:[#allocation7 + $0x170] sm:$0xff]  ;;  %v4445_v59 = vmov 0.0  }
  0xf0   :  { %3261 = vmatpush1.bf16.msra.mxu1 %v3260_v3  ;;  %v3294_v3 = vpack.c.bf16 %v565_v63, %v563_v62  ;;  %v829_v60 = vld [vmem:[#allocation11 + $0x8] sm:$0xff]  ;;  %v828_v62 = vld [vmem:[#allocation11] sm:$0xff]  ;;  %v830_v63 = vld [vmem:[#allocation11 + $0x10] sm:$0xff] }
  0xf1   :  { %3263 = vmatprep.subr.bf16.mxu1 %v3262_v4 }
  0xf2   :  { %3245 = vmatpush3.bf16.msra.mxu0 %v3242_v21  ;;  %v3272_v21 = vpack.c.bf16 %v540_v19, %v538_v16 }
  0xf3   :  { %3247 = vmatprep.subr.bf16.mxu0 %v3246_v24 }
  0xf4   :  { %3265 = vmatpush1.bf16.msra.mxu1 %v3264_v7  ;;  %v562_v7 = vld [vmem:[#allocation7 + $0x160] sm:$0xff] }
  0xf5   :  { %3267 = vmatprep.subr.bf16.mxu1 %v3266_v10  ;;  %v3296_v10 = vpack.c.bf16 %v564_v8, %v562_v7  ;;  %v839_v7 = vld [vmem:[#allocation11 + $0x58] sm:$0xff] }
  0xf6   :  { %3249 = vmatpush3.bf16.msra.mxu0 %v3246_v24  ;;  %v545_v24 = vld [vmem:[#allocation7 + $0xd8] sm:$0xff] }
  0xf8   :  { %3269 = vmatpush1.bf16.msra.mxu1 %v3268_v13 }
  0xf9   :  { %3183 = vmatmul.mubr.f32.vlgmr.msra.gmra.mrb[0].mxu0 %v227_v25  ;;  %3271 = vmatprep.subr.bf16.mxu1 %v3270_v18 }
  0xfa   :  { %3185 = vmatprep.mubr.f32.mxu0 %v228_v26  ;;  %v3274_v26 = vpack.c.bf16 %v545_v24, %v543_v23 }
  0xfc   :  { %3273 = vmatpush1.bf16.msra.mxu1 %v3272_v21 }
  0xfd   :  { %3186 = vmatmul.mubr.f32.gmra.mrb[2].mxu0 %v229_v27  ;;  %v542_v27 = vld [vmem:[#allocation7 + $0xc0] sm:$0xff]  ;;  %3275 = vmatprep.subr.bf16.mxu1 %v3274_v26 }
  0xfe   :  { %3188 = vmatprep.mubr.f32.mxu0 %v230_v28  ;;  %v544_v28 = vld [vmem:[#allocation7 + $0xd0] sm:$0xff] }
 0x101   :  { %3189 = vmatmul.mubr.f32.gmra.mrb[4].mxu0 %v231_v29  ;;  %v3276_v29 = vpack.c.bf16 %v544_v28, %v542_v27 }
 0x102   :  { %3191 = vmatprep.mubr.f32.mxu0 %v232_v30  ;;  %v547_v30 = vld [vmem:[#allocation7 + $0xe8] sm:$0xff] }
 0x103   :  { %3277 = vmatpush1.bf16.msra.mxu1 %v3276_v29 }
 0x105   :  { %3192 = vmatmul.mubr.f32.gmra.mrb[6].mxu0 %v233_v31  ;;  %v549_v31 = vld [vmem:[#allocation7 + $0xf8] sm:$0xff] }
 0x106   :  { %3194 = vmatprep.mubr.f32.mxu0 %v234_v32  ;;  %v546_v32 = vld [vmem:[#allocation7 + $0xe0] sm:$0xff] }
 0x109   :  { %3195 = vmatmul.mubr.f32.gmra.mrb[8].mxu0 %v235_v33 }
 0x10a   :  { %3197 = vmatprep.mubr.f32.mxu0 %v236_v34  ;;  %v3278_v34 = vpack.c.bf16 %v549_v31, %v547_v30 }
 0x10c   :  { %3279 = vmatprep.subr.bf16.mxu1 %v3278_v34 }
 0x10d   :  { %3198 = vmatmul.mubr.f32.gmra.mrb[10].mxu0 %v237_v35  ;;  %v548_v35 = vld [vmem:[#allocation7 + $0xf0] sm:$0xff] }
 0x10e   :  { %3200 = vmatprep.mubr.f32.mxu0 %v238_v36 }
 0x111   :  { %3201 = vmatmul.mubr.f32.gmra.mrb[12].mxu0 %v239_v37  ;;  %v3280_v37 = vpack.c.bf16 %v548_v35, %v546_v32 }
 0x112   :  { %3203 = vmatprep.mubr.f32.mxu0 %v240_v38 }
 0x113   :  { %3281 = vmatpush1.bf16.msra.mxu1 %v3280_v37 }
 0x115   :  { %3204 = vmatmul.mubr.f32.gmra.mrb[14].mxu0 %v241_v39 }
 0x116   :  { %3206 = vmatprep.mubr.f32.mxu0 %v242_v40  ;;  %v551_v40 = vld [vmem:[#allocation7 + $0x108] sm:$0xff] }
 0x119   :  { %3207 = vmatmul.mubr.f32.gmra.mrb[16].mxu0 %v243_v41  ;;  %v553_v41 = vld [vmem:[#allocation7 + $0x118] sm:$0xff] }
 0x11a   :  { %3209 = vmatprep.mubr.f32.mxu0 %v244_v42 }
 0x11d   :  { %3210 = vmatmul.mubr.f32.gmra.mrb[18].mxu0 %v245_v43  ;;  %v3282_v43 = vpack.c.bf16 %v553_v41, %v551_v40 }
 0x11e   :  { %3212 = vmatprep.mubr.f32.mxu0 %v246_v44  ;;  %v550_v44 = vld [vmem:[#allocation7 + $0x100] sm:$0xff] }
 0x11f   :  { %3283 = vmatprep.subr.bf16.mxu1 %v3282_v43 }
 0x121   :  { %3213 = vmatmul.mubr.f32.gmra.mrb[20].mxu0 %v247_v45  ;;  %v552_v45 = vld [vmem:[#allocation7 + $0x110] sm:$0xff] }
 0x122   :  { %3215 = vmatprep.mubr.f32.mxu0 %v248_v46 }
 0x125   :  { %3216 = vmatmul.mubr.f32.gmra.mrb[22].mxu0 %v249_v47  ;;  %v3284_v47 = vpack.c.bf16 %v552_v45, %v550_v44 }
 0x127   :  { %3285 = vmatpush1.bf16.msra.mxu1 %v3284_v47 }
 0x128   :  { %3287 = vmatprep.subr.bf16.mxu1 %v3286_v52 }
 0x12b   :  { %3289 = vmatpush1.bf16.msra.mxu1 %v3288_v57 }
 0x12c   :  { %3291 = vmatprep.subr.bf16.mxu1 %v3290_v58 }
 0x12f   :  { %3293 = vmatpush1.bf16.msra.mxu1 %v3292_v1  ;;  %v835_v1 = vld [vmem:[#allocation11 + $0x38] sm:$0xff] }
 0x130   :  { %3295 = vmatprep.subr.bf16.mxu1 %v3294_v3 }
 0x133   :  { %3297 = vmatpush1.bf16.msra.mxu1 %v3296_v10  ;;  %v836_v10 = vld [vmem:[#allocation11 + $0x40] sm:$0xff] }
 0x1cc   :  { %v4736_v17 = vpop.f32.mrb[0].mxu0 }
 0x1cd   :  { %v4738_v20 = vpop.f32.mrb[1].mxu0 }
 0x1d0   :  { %v4740_v22 = vpop.f32.mrb[2].mxu0 }
 0x1d1   :  { %v4742_v25 = vpop.f32.mrb[3].mxu0 }
 0x1d4   :  { %v3190_v33 = vpop.f32.mrb[4].mxu0 }
 0x1d5   :  { %v336_v36 = vpop.f32.mrb[5].mxu0 }
 0x1d6   :  { %v4087_v38 = vpack.i.bf16 %v3190_v33, %v336_v36 }
 0x1d8   :  { %4088 = vrot.lane.b32.xlu0 %v4087_v38, %s4442_s13  ;;  %v3193_v39 = vpop.f32.mrb[6].mxu0 }
 0x1d9   :  { %v346_v42 = vpop.f32.mrb[7].mxu0 }
 0x1da   :  { %v4102_v46 = vpack.i.bf16 %v3193_v39, %v346_v42 }
 0x1dc   :  { %v3196_v51 = vpop.f32.mrb[8].mxu0 }
 0x1dd   :  { %v356_v56 = vpop.f32.mrb[9].mxu0 }
 0x1de   :  { %v4092_v61 = vpack.i.bf16 %v3196_v51, %v356_v56 }
 0x1e0   :  { %4093 = vrot.lane.b32.xlu0 %v4092_v61, %s4443_s30  ;;  %v3199_v0 = vpop.f32.mrb[10].mxu0  ;;  %v831_v61 = vld [vmem:[#allocation11 + $0x18] sm:$0xff] }
 0x1e1   :  { %v366_v2 = vpop.f32.mrb[11].mxu0 }
 0x1e2   :  { %v4107_v4 = vpack.i.bf16 %v3199_v0, %v366_v2  ;;  %v833_v0 = vld [vmem:[#allocation11 + $0x28] sm:$0xff]  ;;  %v3308_v2 = vpack.c.bf16 %v830_v63, %v828_v62 }
 0x1e3   :  { %v3310_v3 = vpack.c.bf16 %v835_v1, %v833_v0  ;;  %v873_v62 = vld [vmem:[#allocation11 + $0x168] sm:$0xff]  ;;  %v872_v1 = vld [vmem:[#allocation11 + $0x160] sm:$0xff] }
 0x1e4   :  { %v3202_v5 = vpop.f32.mrb[12].mxu0 }
 0x1e5   :  { %v376_v6 = vpop.f32.mrb[13].mxu0 }
 0x1e6   :  { %v4097_v9 = vpack.i.bf16 %v3202_v5, %v376_v6  ;;  %v834_v5 = vld [vmem:[#allocation11 + $0x30] sm:$0xff]  ;;  %v837_v6 = vld [vmem:[#allocation11 + $0x48] sm:$0xff] }
 0x1e8   :  { %4098 = vrot.lane.b32.xlu1 %v4097_v9, %s4444_s16  ;;  %v3205_v11 = vpop.f32.mrb[14].mxu0  ;;  %v3314_v9 = vpack.c.bf16 %v839_v7, %v837_v6  ;;  %v876_v7 = vld [vmem:[#allocation11 + $0x180] sm:$0xff] }
 0x1e9   :  { %v386_v12 = vpop.f32.mrb[15].mxu0 }
 0x1ec   :  { %v3208_v13 = vpop.f32.mrb[16].mxu0 }
 0x1ed   :  { %v396_v14 = vpop.f32.mrb[17].mxu0 }
 0x1f0   :  { %v3211_v15 = vpop.f32.mrb[18].mxu0 }
 0x1f1   :  { %v406_v16 = vpop.f32.mrb[19].mxu0 }
 0x1f4   :  { %v3214_v18 = vpop.f32.mrb[20].mxu0 }
 0x1f5   :  { %489 = vrot.lane.b32.xlu0 %v3214_v18, %s4442_s13  ;;  %v416_v19 = vpop.f32.mrb[21].mxu0  ;;  %v842_v18 = vld [vmem:[#allocation11 + $0x70] sm:$0xff] }
 0x1f6   :  { %487 = vrot.lane.b32.xlu1 %v416_v19, %s4442_s13  ;;  %v845_v19 = vld [vmem:[#allocation11 + $0x88] sm:$0xff] }
 0x1f8   :  { %v3217_v21 = vpop.f32.mrb[22].mxu0 }
 0x1f9   :  { %4108 = vrot.lane.b32.xlu0 %v4107_v4, %s4443_s30  ;;  %v426_v23 = vpop.f32.mrb[23].mxu0  ;;  %v832_v4 = vld [vmem:[#allocation11 + $0x20] sm:$0xff] }
 0x1fa   :  { %4103 = vrot.lane.b32.xlu1 %v4102_v46, %s4442_s13  ;;  %v3312_v8 = vpack.c.bf16 %v834_v5, %v832_v4  ;;  %v879_v4 = vld [vmem:[#allocation11 + $0x198] sm:$0xff] }
 0x1fd   :  { %475 = vrot.lane.b32.xlu0 %v386_v12, %s4444_s16  ;;  %v841_v12 = vld [vmem:[#allocation11 + $0x68] sm:$0xff] }
 0x1fe   :  { %491 = vrot.lane.b32.xlu1 %v426_v23, %s4442_s13 }
 0x201   :  { %477 = vrot.lane.b32.xlu0 %v3205_v11, %s4444_s16  ;;  %v838_v11 = vld [vmem:[#allocation11 + $0x50] sm:$0xff] }
 0x202   :  { %493 = vrot.lane.b32.xlu1 %v3217_v21, %s4442_s13  ;;  %v847_v21 = vld [vmem:[#allocation11 + $0x98] sm:$0xff] }
 0x24a   :  { %v4089_v24 = vpop.permute.xlu0 %4088 }
 0x24b   :  { %v4090_v28 = vunpack.i.l.bf16 %v4089_v24  ;;  %v4091_v32 = vunpack.i.h.bf16 %v4089_v24  ;;  %v3322_v24 = vpack.c.bf16 %v847_v21, %v845_v19  ;;  %v884_v21 = vld [vmem:[#allocation11 + $0x1c0] sm:$0xff] }
 0x24d   :  { %v500_v34 = vsel %vm499_vm0, %v4738_v20, %v4090_v28  ;;  %v501_v20 = vsel %vm499_vm0, %v4736_v17, %v4091_v32  ;;  %v849_v28 = vld [vmem:[#allocation11 + $0xa8] sm:$0xff]  ;;  %v848_v32 = vld [vmem:[#allocation11 + $0xa0] sm:$0xff] }
 0x252   :  { %v4094_v26 = vpop.permute.xlu0 %4093 }
 0x253   :  { %v4095_v29 = vunpack.i.l.bf16 %v4094_v26  ;;  %v4096_v35 = vunpack.i.h.bf16 %v4094_v26  ;;  %v844_v26 = vld [vmem:[#allocation11 + $0x80] sm:$0xff] }
 0x255   :  { %v505_v37 = vsel %vm504_vm1, %v500_v34, %v4095_v29  ;;  %v506_v44 = vsel %vm504_vm1, %v501_v20, %v4096_v35  ;;  %v851_v29 = vld [vmem:[#allocation11 + $0xb8] sm:$0xff]  ;;  %v853_v34 = vld [vmem:[#allocation11 + $0xc8] sm:$0xff] }
 0x256   :  { %v855_v35 = vld [vmem:[#allocation11 + $0xd8] sm:$0xff] }
 0x25a   :  { %v4099_v27 = vpop.permute.xlu1 %4098 }
 0x25b   :  { %v4100_v30 = vunpack.i.l.bf16 %v4099_v27  ;;  %v4101_v38 = vunpack.i.h.bf16 %v4099_v27  ;;  %v846_v27 = vld [vmem:[#allocation11 + $0x90] sm:$0xff] }
 0x25d   :  { %v510_v39 = vsel %vm509_vm2, %v505_v37, %v4100_v30  ;;  %v511_v47 = vsel %vm509_vm2, %v506_v44, %v4101_v38  ;;  %v3324_v30 = vpack.c.bf16 %v846_v27, %v844_v26  ;;  %v3330_v37 = vpack.c.bf16 %v855_v35, %v853_v34  ;;  %v852_v38 = vld [vmem:[#allocation11 + $0xc0] sm:$0xff]  ;;  %v858_v44 = vld [vmem:[#allocation11 + $0xf0] sm:$0xff]  ;;  %v891_v26 = vld [vmem:[#allocation11 + $0x1f8] sm:$0xff] }
 0x25e   :  { %v566_v35 = vld [vmem:[#allocation8] sm:$0x3] }
 0x267   :  { %v490_v31 = vpop.permute.xlu0 %489 }
 0x268   :  { %v488_v33 = vpop.permute.xlu1 %487  ;;  %v515_v40 = vsel %vm499_vm0, %v3208_v13, %v490_v31  ;;  %v843_v13 = vld [vmem:[#allocation11 + $0x78] sm:$0xff]  ;;  %v3326_v31 = vpack.c.bf16 %v851_v29, %v849_v28  ;;  %v888_v29 = vld [vmem:[#allocation11 + $0x1e0] sm:$0xff] }
 0x269   :  { %v514_v36 = vsel %vm499_vm0, %v396_v14, %v488_v33  ;;  %v3316_v14 = vpack.c.bf16 %v838_v11, %v836_v10  ;;  %v850_v33 = vld [vmem:[#allocation11 + $0xb0] sm:$0xff]  ;;  %v883_v10 = vld [vmem:[#allocation11 + $0x1b8] sm:$0xff] }
 0x26a   :  { %2982 = vmatprep.mubr.msk.f32.mxu1 %vm504_vm1, %v514_v36  ;;  %v3328_v36 = vpack.c.bf16 %v850_v33, %v848_v32  ;;  %v568_v32 = vlaneseq }
 0x26b   :  { %v4109_v41 = vpop.permute.xlu0 %4108  ;;  %655 = vmatmul.mubr.f32.vlgmr.msra.gmra.mrb[0].mxu1 %v510_v39  ;;  %v854_v39 = vld [vmem:[#allocation11 + $0xd0] sm:$0xff] }
 0x26c   :  { %2983 = vmatprep.mubr.msk.f32.mxu1 %vm504_vm1, %v515_v40  ;;  %v4104_v42 = vpop.permute.xlu1 %4103  ;;  %v4110_v45 = vunpack.i.l.bf16 %v4109_v41  ;;  %v4111_v54 = vunpack.i.h.bf16 %v4109_v41  ;;  %v857_v40 = vld [vmem:[#allocation11 + $0xe8] sm:$0xff]  ;;  %v859_v41 = vld [vmem:[#allocation11 + $0xf8] sm:$0xff]  ;;  %v569_v33 = vshrl.u32 %v568_v32, 7 }
 0x26d   :  { %v4105_v43 = vunpack.i.l.bf16 %v4104_v42  ;;  %v4106_v46 = vunpack.i.h.bf16 %v4104_v42  ;;  %v3332_v42 = vpack.c.bf16 %v854_v39, %v852_v38  ;;  %v3334_v20 = vpack.c.bf16 %v859_v41, %v857_v40  ;;  %v903_v32 = vld [vmem:[#allocation11 + $0x258] sm:$0xff] }
 0x26e   :  { %v570_v34 = vsub.s32 0, %v569_v33 }
 0x26f   :  { %v476_v48 = vpop.permute.xlu0 %475  ;;  %661 = vmatmul.mubr.f32.gmra.mrb[2].mxu1 %v511_v47  ;;  %v502_v49 = vsel %vm499_vm0, %v4742_v25, %v4105_v43  ;;  %v503_v17 = vsel %vm499_vm0, %v4740_v22, %v4106_v46  ;;  %v3306_v22 = vpack.c.bf16 %v831_v61, %v829_v60  ;;  %v856_v43 = vld [vmem:[#allocation11 + $0xe0] sm:$0xff]  ;;  %v863_v46 = vld [vmem:[#allocation11 + $0x118] sm:$0xff]  ;;  %v870_v61 = vld [vmem:[#allocation11 + $0x150] sm:$0xff] }
 0x270   :  { %v492_v50 = vpop.permute.xlu1 %491  ;;  %v507_v51 = vsel %vm504_vm1, %v502_v49, %v4110_v45  ;;  %v508_v25 = vsel %vm504_vm1, %v503_v17, %v4111_v54  ;;  %v861_v45 = vld [vmem:[#allocation11 + $0x108] sm:$0xff]  ;;  %v3336_v47 = vpack.c.bf16 %v858_v44, %v856_v43  ;;  %v860_v49 = vld [vmem:[#allocation11 + $0x100] sm:$0xff] }
 0x271   :  { %v516_v52 = vsel %vm499_vm0, %v406_v16, %v492_v50  ;;  %v512_v53 = vsel %vm509_vm2, %v507_v51, %v476_v48  ;;  %3307 = vmatprep.subr.bf16.mxu0 %v3306_v22  ;;  %v840_v16 = vld [vmem:[#allocation11 + $0x60] sm:$0xff]  ;;  %v3338_v48 = vpack.c.bf16 %v863_v46, %v861_v45  ;;  %v862_v50 = vld [vmem:[#allocation11 + $0x110] sm:$0xff]  ;;  %v865_v51 = vld [vmem:[#allocation11 + $0x128] sm:$0xff] }
 0x272   :  { %2984 = vmatprep.mubr.msk.f32.mxu1 %vm504_vm1, %v516_v52  ;;  %3309 = vmatpush1.bf16.msra.mxu0 %v3308_v2  ;;  %v3320_v23 = vpack.c.bf16 %v842_v18, %v840_v16  ;;  %v867_v52 = vld [vmem:[#allocation11 + $0x138] sm:$0xff]  ;;  %v864_v54 = vld [vmem:[#allocation11 + $0x120] sm:$0xff]  ;;  %v874_v2 = vld [vmem:[#allocation11 + $0x170] sm:$0xff] }
 0x273   :  { %v478_v55 = vpop.permute.xlu0 %477  ;;  %667 = vmatmul.mubr.f32.gmra.mrb[4].mxu1 %v512_v53  ;;  %3311 = vmatprep.subr.bf16.mxu0 %v3310_v3  ;;  %v3340_v53 = vpack.c.bf16 %v862_v50, %v860_v49  ;;  %v3342_v17 = vpack.c.bf16 %v867_v52, %v865_v51  ;;  %v868_v60 = vld [vmem:[#allocation11 + $0x140] sm:$0xff]  ;;  %v875_v22 = vld [vmem:[#allocation11 + $0x178] sm:$0xff]  ;;  %v877_v3 = vld [vmem:[#allocation11 + $0x188] sm:$0xff]  ;;  %v3352_v5 = vpack.c.bf16 %v874_v2, %v872_v1 }
 0x274   :  { %v494_v56 = vpop.permute.xlu1 %493  ;;  %v513_v58 = vsel %vm509_vm2, %v508_v25, %v478_v55  ;;  %v866_v55 = vld [vmem:[#allocation11 + $0x130] sm:$0xff]  ;;  %v3348_v63 = vpack.c.bf16 %v870_v61, %v868_v60  ;;  %v3350_v0 = vpack.c.bf16 %v875_v22, %v873_v62  ;;  %v3354_v6 = vpack.c.bf16 %v879_v4, %v877_v3  ;;  %v887_v16 = vld [vmem:[#allocation11 + $0x1d8] sm:$0xff] }
 0x275   :  { %v517_v57 = vsel %vm499_vm0, %v3211_v15, %v494_v56  ;;  %v3318_v15 = vpack.c.bf16 %v843_v13, %v841_v12  ;;  %v869_v56 = vld [vmem:[#allocation11 + $0x148] sm:$0xff]  ;;  %v3344_v25 = vpack.c.bf16 %v866_v55, %v864_v54  ;;  %v880_v13 = vld [vmem:[#allocation11 + $0x1a0] sm:$0xff] }
 0x276   :  { %2985 = vmatprep.mubr.msk.f32.mxu1 %vm504_vm1, %v517_v57  ;;  %3313 = vmatpush1.bf16.msra.mxu0 %v3312_v8  ;;  %v871_v57 = vld [vmem:[#allocation11 + $0x158] sm:$0xff]  ;;  %v878_v8 = vld [vmem:[#allocation11 + $0x190] sm:$0xff] }
 0x277   :  { %673 = vmatmul.mubr.f32.gmra.mrb[6].mxu1 %v513_v58  ;;  %3315 = vmatprep.subr.bf16.mxu0 %v3314_v9  ;;  %v3346_v58 = vpack.c.bf16 %v871_v57, %v869_v56  ;;  %v881_v9 = vld [vmem:[#allocation11 + $0x1a8] sm:$0xff]  ;;  %v3356_v11 = vpack.c.bf16 %v878_v8, %v876_v7  ;;  %v703_v8 = vld [vmem:[#allocation10] sm:$0xff] }
 0x278   :  { %791 = vmatprep.mubr.f32.mxu1 %v4445_v59  ;;  %v3358_v12 = vpack.c.bf16 %v883_v10, %v881_v9  ;;  %v704_v9 = vld [vmem:[#allocation10 + $0x8] sm:$0xff]  ;;  %v705_v10 = vld [vmem:[#allocation10 + $0x10] sm:$0xff] }
 0x27a   :  { %3317 = vmatpush1.bf16.msra.mxu0 %v3316_v14  ;;  %v882_v14 = vld [vmem:[#allocation11 + $0x1b0] sm:$0xff] }
 0x27b   :  { %3319 = vmatprep.subr.bf16.mxu0 %v3318_v15  ;;  %v885_v15 = vld [vmem:[#allocation11 + $0x1c8] sm:$0xff]  ;;  %v3360_v18 = vpack.c.bf16 %v882_v14, %v880_v13  ;;  %v708_v13 = vld [vmem:[#allocation10 + $0x28] sm:$0xff] }
 0x27c   :  { %v3362_v19 = vpack.c.bf16 %v887_v16, %v885_v15  ;;  %v893_v14 = vld [vmem:[#allocation11 + $0x208] sm:$0xff]  ;;  %v895_v15 = vld [vmem:[#allocation11 + $0x218] sm:$0xff] }
 0x27d   :  { %v3370_v16 = vpack.c.bf16 %v895_v15, %v893_v14  ;;  %v924_v14 = vld [vmem:[#allocation11 + $0x300] sm:$0xff]  ;;  %v926_v15 = vld [vmem:[#allocation11 + $0x310] sm:$0xff] }
 0x27e   :  { %3321 = vmatpush1.bf16.msra.mxu0 %v3320_v23  ;;  %v886_v23 = vld [vmem:[#allocation11 + $0x1d0] sm:$0xff] }
 0x27f   :  { %3323 = vmatprep.subr.bf16.mxu0 %v3322_v24  ;;  %v889_v24 = vld [vmem:[#allocation11 + $0x1e8] sm:$0xff]  ;;  %v3364_v27 = vpack.c.bf16 %v886_v23, %v884_v21  ;;  %v899_v23 = vld [vmem:[#allocation11 + $0x238] sm:$0xff] }
 0x280   :  { %v3366_v28 = vpack.c.bf16 %v891_v26, %v889_v24  ;;  %v897_v21 = vld [vmem:[#allocation11 + $0x228] sm:$0xff] }
 0x282   :  { %3325 = vmatpush1.bf16.msra.mxu0 %v3324_v30  ;;  %v890_v30 = vld [vmem:[#allocation11 + $0x1f0] sm:$0xff] }
 0x283   :  { %3327 = vmatprep.subr.bf16.mxu0 %v3326_v31  ;;  %v3368_v31 = vpack.c.bf16 %v890_v30, %v888_v29  ;;  %v896_v29 = vld [vmem:[#allocation11 + $0x220] sm:$0xff]  ;;  %v898_v30 = vld [vmem:[#allocation11 + $0x230] sm:$0xff] }
 0x286   :  { %3329 = vmatpush1.bf16.msra.mxu0 %v3328_v36  ;;  %v574_v36 = vsub.s32 1, %v569_v33  ;;  %v3376_v33 = vpack.c.bf16 %v898_v30, %v896_v29  ;;  %v932_v30 = vld [vmem:[#allocation11 + $0x340] sm:$0xff] }
 0x287   :  { %3331 = vmatprep.subr.bf16.mxu0 %v3330_v37  ;;  %v571_v37 = vrot.slane %v566_v35, %v570_v34 }
 0x288   :  { %v575_v38 = vrot.slane %v566_v35, %v574_v36  ;;  %v900_v36 = vld [vmem:[#allocation11 + $0x240] sm:$0xff] }
 0x28a   :  { %3333 = vmatpush1.bf16.msra.mxu0 %v3332_v42 }
 0x28b   :  { %3335 = vmatprep.subr.bf16.mxu0 %v3334_v20 }
 0x28e   :  { %3337 = vmatpush1.bf16.msra.mxu0 %v3336_v47 }
 0x28f   :  { %3339 = vmatprep.subr.bf16.mxu0 %v3338_v48 }
 0x292   :  { %3341 = vmatpush1.bf16.msra.mxu0 %v3340_v53 }
 0x293   :  { %3343 = vmatprep.subr.bf16.mxu0 %v3342_v17 }
 0x296   :  { %3345 = vmatpush1.bf16.msra.mxu0 %v3344_v25 }
 0x297   :  { %3347 = vmatprep.subr.bf16.mxu0 %v3346_v58 }
 0x29a   :  { %3349 = vmatpush1.bf16.msra.mxu0 %v3348_v63 }
 0x29b   :  { %3351 = vmatprep.subr.bf16.mxu0 %v3350_v0 }
 0x29e   :  { %3353 = vmatpush1.bf16.msra.mxu0 %v3352_v5 }
 0x29f   :  { %3355 = vmatprep.subr.bf16.mxu0 %v3354_v6 }
 0x2a2   :  { %3357 = vmatpush1.bf16.msra.mxu0 %v3356_v11  ;;  %v706_v11 = vld [vmem:[#allocation10 + $0x18] sm:$0xff] }
 0x2a3   :  { %3359 = vmatprep.subr.bf16.mxu0 %v3358_v12  ;;  %v707_v12 = vld [vmem:[#allocation10 + $0x20] sm:$0xff] }
 0x2a6   :  { %3361 = vmatpush1.bf16.msra.mxu0 %v3360_v18  ;;  %v892_v18 = vld [vmem:[#allocation11 + $0x200] sm:$0xff] }
 0x2a7   :  { %3363 = vmatprep.subr.bf16.mxu0 %v3362_v19  ;;  %v894_v19 = vld [vmem:[#allocation11 + $0x210] sm:$0xff] }
 0x2a8   :  { %v3372_v26 = vpack.c.bf16 %v894_v19, %v892_v18  ;;  %v931_v18 = vld [vmem:[#allocation11 + $0x338] sm:$0xff]  ;;  %v3404_v19 = vpack.c.bf16 %v926_v15, %v924_v14  ;;  %v965_v14 = vld [vmem:[#allocation11 + $0x448] sm:$0xff] }
 0x2a9   :  { %v967_v15 = vld [vmem:[#allocation11 + $0x458] sm:$0xff] }
 0x2aa   :  { %3365 = vmatpush1.bf16.msra.mxu0 %v3364_v27 }
 0x2ab   :  { %3367 = vmatprep.subr.bf16.mxu0 %v3366_v28  ;;  %v3374_v28 = vpack.c.bf16 %v899_v23, %v897_v21  ;;  %v928_v23 = vld [vmem:[#allocation11 + $0x320] sm:$0xff] }
 0x2ae   :  { %3369 = vmatpush1.bf16.msra.mxu0 %v3368_v31  ;;  %v901_v31 = vld [vmem:[#allocation11 + $0x248] sm:$0xff] }
 0x2af   :  { %3371 = vmatprep.subr.bf16.mxu0 %v3370_v16  ;;  %v3378_v35 = vpack.c.bf16 %v903_v32, %v901_v31  ;;  %v929_v16 = vld [vmem:[#allocation11 + $0x328] sm:$0xff]  ;;  %v934_v31 = vld [vmem:[#allocation11 + $0x350] sm:$0xff] }
 0x2b0   :  { %v3406_v21 = vpack.c.bf16 %v931_v18, %v929_v16  ;;  %v937_v32 = vld [vmem:[#allocation11 + $0x368] sm:$0xff]  ;;  %v3442_v18 = vpack.c.bf16 %v967_v15, %v965_v14  ;;  %v1007_v15 = vld [vmem:[#allocation11 + $0x598] sm:$0xff] }
 0x2b1   :  { %v1005_v14 = vld [vmem:[#allocation11 + $0x588] sm:$0xff] }
 0x33e   :  { %v656_v39 = vpop.f32.mrb[0].mxu1 }
 0x33f   :  { %v657_v40 = vadd.f32 %v656_v39, %v571_v37  ;;  %v658_v41 = vpop.f32.mrb[1].mxu1  ;;  %v905_v39 = vld [vmem:[#allocation11 + $0x268] sm:$0xff] }
 0x340   :  { %v659_v42 = vadd.f32 %v658_v41, %v575_v38 }
 0x341   :  { %v687_v43 = vmul.f32 0.2, %v657_v40  ;;  %vm679_vm3 = vcmp.ge.f32.partialorder %v657_v40, 0.0 }
 0x342   :  { %v662_v20 = vpop.f32.mrb[2].mxu1  ;;  %v688_v46 = vmul.f32 0.2, %v659_v42  ;;  %vm680_vm4 = vcmp.ge.f32.partialorder %v659_v42, 0.0 }
 0x343   :  { %v663_v44 = vadd.f32 %v662_v20, %v571_v37  ;;  %v664_v45 = vpop.f32.mrb[3].mxu1  ;;  %v695_v51 = vsel %vm679_vm3, %v657_v40, %v687_v43  ;;  %v907_v40 = vld [vmem:[#allocation11 + $0x278] sm:$0xff]  ;;  %v904_v43 = vld [vmem:[#allocation11 + $0x260] sm:$0xff]  ;;  %vm2959_vm3 = vcmask 31744  }
 0x344   :  { %v665_v47 = vadd.f32 %v664_v45, %v575_v38  ;;  %v696_v56 = vsel %vm680_vm4, %v659_v42, %v688_v46  ;;  %v3382_v20 = vpack.c.bf16 %v907_v40, %v905_v39  ;;  %v909_v46 = vld [vmem:[#allocation11 + $0x288] sm:$0xff]  ;;  %v943_v39 = vld [vmem:[#allocation11 + $0x398] sm:$0xff] }
 0x345   :  { %vm681_vm5 = vcmp.ge.f32.partialorder %v663_v44, 0.0  ;;  %v689_v48 = vmul.f32 0.2, %v663_v44 }
 0x346   :  { %vm682_vm6 = vcmp.ge.f32.partialorder %v665_v47, 0.0  ;;  %v690_v49 = vmul.f32 0.2, %v665_v47  ;;  %v668_v50 = vpop.f32.mrb[4].mxu1 }
 0x347   :  { %v697_v52 = vsel %vm681_vm5, %v663_v44, %v689_v48  ;;  %v669_v53 = vadd.f32 %v668_v50, %v571_v37  ;;  %v670_v17 = vpop.f32.mrb[5].mxu1  ;;  %v906_v44 = vld [vmem:[#allocation11 + $0x270] sm:$0xff] }
 0x348   :  { %v3300_v54 = vpack.c.bf16 %v697_v52, %v695_v51  ;;  %v671_v55 = vadd.f32 %v670_v17, %v575_v38  ;;  %v698_v57 = vsel %vm682_vm6, %v665_v47, %v690_v49  ;;  %v911_v47 = vld [vmem:[#allocation11 + $0x298] sm:$0xff]  ;;  %v3384_v48 = vpack.c.bf16 %v906_v44, %v904_v43  ;;  %v908_v51 = vld [vmem:[#allocation11 + $0x280] sm:$0xff]  ;;  %v910_v52 = vld [vmem:[#allocation11 + $0x290] sm:$0xff] }
 0x349   :  { %v3298_v25 = vpack.c.bf16 %v698_v57, %v696_v56  ;;  %v691_v60 = vmul.f32 0.2, %v669_v53  ;;  %vm683_vm7 = vcmp.ge.f32.partialorder %v669_v53, 0.0  ;;  %v3386_v50 = vpack.c.bf16 %v911_v47, %v909_v46  ;;  %v913_v17 = vld [vmem:[#allocation11 + $0x2a8] sm:$0xff]  ;;  %v942_v43 = vld [vmem:[#allocation11 + $0x390] sm:$0xff] }
 0x34a   :  { %v674_v58 = vpop.f32.mrb[6].mxu1  ;;  %v692_v22 = vmul.f32 0.2, %v671_v55  ;;  %vm684_vm8 = vcmp.ge.f32.partialorder %v671_v55, 0.0  ;;  %v945_v44 = vld [vmem:[#allocation11 + $0x3a8] sm:$0xff] }
 0x34b   :  { %v675_v61 = vadd.f32 %v674_v58, %v571_v37  ;;  %v676_v62 = vpop.f32.mrb[7].mxu1  ;;  %3299 = vmatprep.subr.bf16.mxu1 %v3298_v25  ;;  %v699_v2 = vsel %vm683_vm7, %v669_v53, %v691_v60  ;;  %v902_v37 = vld [vmem:[#allocation11 + $0x250] sm:$0xff]  ;;  %v912_v25 = vld [vmem:[#allocation11 + $0x2a0] sm:$0xff] }
 0x34c   :  { %v677_v63 = vadd.f32 %v676_v62, %v575_v38  ;;  %3301 = vmatpush1.bf16.msra.mxu1 %v3300_v54  ;;  %v700_v5 = vsel %vm684_vm8, %v671_v55, %v692_v22  ;;  %v3380_v41 = vpack.c.bf16 %v902_v37, %v900_v36  ;;  %v915_v54 = vld [vmem:[#allocation11 + $0x2b8] sm:$0xff]  ;;  %v3388_v55 = vpack.c.bf16 %v910_v52, %v908_v51  ;;  %v914_v58 = vld [vmem:[#allocation11 + $0x2b0] sm:$0xff]  ;;  %v936_v36 = vld [vmem:[#allocation11 + $0x360] sm:$0xff] }
 0x34d   :  { %vm685_vm9 = vcmp.ge.f32.partialorder %v675_v61, 0.0  ;;  %v693_v0 = vmul.f32 0.2, %v675_v61  ;;  %v3390_v57 = vpack.c.bf16 %v915_v54, %v913_v17  ;;  %v919_v62 = vld [vmem:[#allocation11 + $0x2d8] sm:$0xff]  ;;  %v3392_v22 = vpack.c.bf16 %v914_v58, %v912_v25  ;;  %v938_v37 = vld [vmem:[#allocation11 + $0x370] sm:$0xff]  ;;  %v949_v51 = vld [vmem:[#allocation11 + $0x3c8] sm:$0xff] }
 0x34e   :  { %vm686_vm10 = vcmp.ge.f32.partialorder %v677_v63, 0.0  ;;  %v694_v1 = vmul.f32 0.2, %v677_v63  ;;  %v3416_v40 = vpack.c.bf16 %v938_v37, %v936_v36  ;;  %v951_v52 = vld [vmem:[#allocation11 + $0x3d8] sm:$0xff]  ;;  %v953_v25 = vld [vmem:[#allocation11 + $0x3e8] sm:$0xff]  ;;  %v976_v37 = vld [vmem:[#allocation11 + $0x4a0] sm:$0xff] }
 0x34f   :  { %v701_v3 = vsel %vm685_vm9, %v675_v61, %v693_v0  ;;  %v917_v61 = vld [vmem:[#allocation11 + $0x2c8] sm:$0xff]  ;;  %v3426_v54 = vpack.c.bf16 %v951_v52, %v949_v51  ;;  %v955_v58 = vld [vmem:[#allocation11 + $0x3f8] sm:$0xff] }
 0x350   :  { %v3304_v4 = vpack.c.bf16 %v701_v3, %v699_v2  ;;  %v702_v6 = vsel %vm686_vm10, %v677_v63, %v694_v1  ;;  %v3394_v0 = vpack.c.bf16 %v919_v62, %v917_v61  ;;  %v916_v1 = vld [vmem:[#allocation11 + $0x2c0] sm:$0xff]  ;;  %v918_v2 = vld [vmem:[#allocation11 + $0x2d0] sm:$0xff]  ;;  %v3430_v62 = vpack.c.bf16 %v955_v58, %v953_v25  ;;  %v989_v51 = vld [vmem:[#allocation11 + $0x508] sm:$0xff] }
 0x351   :  { %v3302_v7 = vpack.c.bf16 %v702_v6, %v700_v5  ;;  %v923_v5 = vld [vmem:[#allocation11 + $0x2f8] sm:$0xff]  ;;  %v3396_v6 = vpack.c.bf16 %v918_v2, %v916_v1  ;;  %v957_v1 = vld [vmem:[#allocation11 + $0x408] sm:$0xff] }
 0x352   :  { %v959_v2 = vld [vmem:[#allocation11 + $0x418] sm:$0xff]  ;;  %v993_v25 = vld [vmem:[#allocation11 + $0x528] sm:$0xff] }
 0x353   :  { %3303 = vmatprep.subr.bf16.mxu1 %v3302_v7  ;;  %v991_v52 = vld [vmem:[#allocation11 + $0x518] sm:$0xff] }
 0x354   :  { %3305 = vmatpush1.bf16.msra.mxu1 %v3304_v4  ;;  %v921_v4 = vld [vmem:[#allocation11 + $0x2e8] sm:$0xff]  ;;  %v995_v58 = vld [vmem:[#allocation11 + $0x538] sm:$0xff] }
 0x355   :  { %v3398_v7 = vpack.c.bf16 %v923_v5, %v921_v4  ;;  %v3434_v5 = vpack.c.bf16 %v959_v2, %v957_v1  ;;  %v997_v1 = vld [vmem:[#allocation11 + $0x548] sm:$0xff]  ;;  %v999_v2 = vld [vmem:[#allocation11 + $0x558] sm:$0xff] }
 0x357   :  { %2986 = vmatmul.mubr.msk.f32.vlgmr.msra.gmra.mrb[8].mxu1 %vm499_vm0, %v703_v8  ;;  %v920_v8 = vld [vmem:[#allocation11 + $0x2e0] sm:$0xff] }
 0x358   :  { %797 = vmatprep.mubr.f32.mxu1 %v4445_v59 }
 0x35b   :  { %2987 = vmatmul.mubr.msk.f32.gmra.mrb[10].mxu1 %vm499_vm0, %v704_v9  ;;  %v922_v9 = vld [vmem:[#allocation11 + $0x2f0] sm:$0xff] }
 0x35c   :  { %803 = vmatprep.mubr.f32.mxu1 %v4445_v59 }
 0x35f   :  { %2988 = vmatmul.mubr.msk.f32.gmra.mrb[12].mxu1 %vm499_vm0, %v705_v10  ;;  %v925_v10 = vld [vmem:[#allocation11 + $0x308] sm:$0xff] }
 0x360   :  { %809 = vmatprep.mubr.f32.mxu1 %v4445_v59 }
 0x363   :  { %2989 = vmatmul.mubr.msk.f32.gmra.mrb[14].mxu1 %vm499_vm0, %v706_v11  ;;  %v927_v11 = vld [vmem:[#allocation11 + $0x318] sm:$0xff] }
 0x364   :  { %815 = vmatprep.mubr.f32.mxu1 %v4445_v59 }
 0x367   :  { %2990 = vmatmul.mubr.msk.f32.gmra.mrb[16].mxu1 %vm499_vm0, %v707_v12  ;;  %v3400_v12 = vpack.c.bf16 %v922_v9, %v920_v8  ;;  %v961_v8 = vld [vmem:[#allocation11 + $0x428] sm:$0xff]  ;;  %v963_v9 = vld [vmem:[#allocation11 + $0x438] sm:$0xff] }
 0x368   :  { %821 = vmatprep.mubr.f32.mxu1 %v4445_v59 }
 0x36b   :  { %2991 = vmatmul.mubr.msk.f32.gmra.mrb[18].mxu1 %vm499_vm0, %v708_v13  ;;  %v3402_v13 = vpack.c.bf16 %v927_v11, %v925_v10  ;;  %v3438_v11 = vpack.c.bf16 %v963_v9, %v961_v8  ;;  %v1001_v8 = vld [vmem:[#allocation11 + $0x568] sm:$0xff]  ;;  %v1003_v9 = vld [vmem:[#allocation11 + $0x578] sm:$0xff]  ;;  %vm2177_vm0 = vcmask 64512  }
 0x36c   :  { %1324 = vmatprep.mubr.f32.mxu1 %v4445_v59 }
 0x42a   :  { %v793_v24 = vpop.f32.mrb[8].mxu1 }
 0x42b   :  { %v795_v27 = vpop.f32.mrb[9].mxu1 }
 0x42c   :  { %1084 = vmatprep.mubr.f32.mxu0 %v795_v27  ;;  %v935_v27 = vld [vmem:[#allocation11 + $0x358] sm:$0xff] }
 0x42d   :  { %1085 = vmatmul.mubr.f32.vlgmr.msra.gmra.mrb[24].mxu0 %v793_v24  ;;  %v930_v24 = vld [vmem:[#allocation11 + $0x330] sm:$0xff] }
 0x42e   :  { %3373 = vmatpush1.bf16.msra.mxu0 %v3372_v26  ;;  %v799_v34 = vpop.f32.mrb[10].mxu1  ;;  %v933_v26 = vld [vmem:[#allocation11 + $0x348] sm:$0xff] }
 0x42f   :  { %3375 = vmatprep.subr.bf16.mxu0 %v3374_v28  ;;  %v801_v38 = vpop.f32.mrb[11].mxu1  ;;  %v3408_v28 = vpack.c.bf16 %v930_v24, %v928_v23  ;;  %v3410_v29 = vpack.c.bf16 %v935_v27, %v933_v26  ;;  %v969_v23 = vld [vmem:[#allocation11 + $0x468] sm:$0xff]  ;;  %v971_v24 = vld [vmem:[#allocation11 + $0x478] sm:$0xff] }
 0x430   :  { %1090 = vmatprep.mubr.f32.mxu0 %v801_v38  ;;  %v941_v38 = vld [vmem:[#allocation11 + $0x388] sm:$0xff]  ;;  %v3446_v27 = vpack.c.bf16 %v971_v24, %v969_v23  ;;  %v1011_v24 = vld [vmem:[#allocation11 + $0x5b8] sm:$0xff] }
 0x431   :  { %1091 = vmatmul.mubr.f32.gmra.mrb[26].mxu0 %v799_v34  ;;  %v3412_v34 = vpack.c.bf16 %v934_v31, %v932_v30  ;;  %v975_v30 = vld [vmem:[#allocation11 + $0x498] sm:$0xff]  ;;  %v1009_v23 = vld [vmem:[#allocation11 + $0x5a8] sm:$0xff] }
 0x432   :  { %3377 = vmatpush1.bf16.msra.mxu0 %v3376_v33  ;;  %v4789_v42 = vpop.f32.mrb[12].mxu1  ;;  %v939_v33 = vld [vmem:[#allocation11 + $0x378] sm:$0xff] }
 0x433   :  { %3379 = vmatprep.subr.bf16.mxu0 %v3378_v35  ;;  %v807_v45 = vpop.f32.mrb[13].mxu1  ;;  %v3414_v35 = vpack.c.bf16 %v939_v33, %v937_v32  ;;  %v972_v32 = vld [vmem:[#allocation11 + $0x480] sm:$0xff]  ;;  %v974_v33 = vld [vmem:[#allocation11 + $0x490] sm:$0xff] }
 0x434   :  { %1161 = vmatprep.mubr.f32.mxu0 %v807_v45  ;;  %v947_v45 = vld [vmem:[#allocation11 + $0x3b8] sm:$0xff] }
 0x435   :  { %v3422_v47 = vpack.c.bf16 %v947_v45, %v945_v44  ;;  %v985_v44 = vld [vmem:[#allocation11 + $0x4e8] sm:$0xff]  ;;  %v987_v45 = vld [vmem:[#allocation11 + $0x4f8] sm:$0xff] }
 0x436   :  { %3381 = vmatpush1.bf16.msra.mxu0 %v3380_v41  ;;  %v4791_v49 = vpop.f32.mrb[14].mxu1  ;;  %v3418_v41 = vpack.c.bf16 %v943_v39, %v941_v38  ;;  %v981_v38 = vld [vmem:[#allocation11 + $0x4c8] sm:$0xff]  ;;  %v983_v39 = vld [vmem:[#allocation11 + $0x4d8] sm:$0xff] }
 0x437   :  { %3383 = vmatprep.subr.bf16.mxu0 %v3382_v20  ;;  %v4793_v53 = vpop.f32.mrb[15].mxu1  ;;  %v940_v20 = vld [vmem:[#allocation11 + $0x380] sm:$0xff] }
 0x438   :  { %v3420_v46 = vpack.c.bf16 %v942_v43, %v940_v20  ;;  %v980_v20 = vld [vmem:[#allocation11 + $0x4c0] sm:$0xff]  ;;  %v982_v43 = vld [vmem:[#allocation11 + $0x4d0] sm:$0xff] }
 0x43a   :  { %3385 = vmatpush1.bf16.msra.mxu0 %v3384_v48  ;;  %v4795_v56 = vpop.f32.mrb[16].mxu1  ;;  %v944_v48 = vld [vmem:[#allocation11 + $0x3a0] sm:$0xff] }
 0x43b   :  { %3387 = vmatprep.subr.bf16.mxu0 %v3386_v50  ;;  %v4797_v60 = vpop.f32.mrb[17].mxu1  ;;  %v946_v50 = vld [vmem:[#allocation11 + $0x3b0] sm:$0xff] }
 0x43c   :  { %v3424_v17 = vpack.c.bf16 %v946_v50, %v944_v48  ;;  %v984_v48 = vld [vmem:[#allocation11 + $0x4e0] sm:$0xff]  ;;  %v986_v50 = vld [vmem:[#allocation11 + $0x4f0] sm:$0xff] }
 0x43e   :  { %3389 = vmatpush1.bf16.msra.mxu0 %v3388_v55  ;;  %v4799_v63 = vpop.f32.mrb[18].mxu1  ;;  %v948_v55 = vld [vmem:[#allocation11 + $0x3c0] sm:$0xff] }
 0x43f   :  { %3391 = vmatprep.subr.bf16.mxu0 %v3390_v57  ;;  %v4801_v3 = vpop.f32.mrb[19].mxu1  ;;  %v950_v57 = vld [vmem:[#allocation11 + $0x3d0] sm:$0xff] }
 0x440   :  { %v3428_v61 = vpack.c.bf16 %v950_v57, %v948_v55  ;;  %v988_v55 = vld [vmem:[#allocation11 + $0x500] sm:$0xff]  ;;  %v990_v57 = vld [vmem:[#allocation11 + $0x510] sm:$0xff] }
 0x442   :  { %3393 = vmatpush1.bf16.msra.mxu0 %v3392_v22  ;;  %v952_v22 = vld [vmem:[#allocation11 + $0x3e0] sm:$0xff] }
 0x443   :  { %3395 = vmatprep.subr.bf16.mxu0 %v3394_v0  ;;  %v954_v0 = vld [vmem:[#allocation11 + $0x3f0] sm:$0xff] }
 0x444   :  { %v3432_v4 = vpack.c.bf16 %v954_v0, %v952_v22  ;;  %v992_v22 = vld [vmem:[#allocation11 + $0x520] sm:$0xff]  ;;  %v994_v0 = vld [vmem:[#allocation11 + $0x530] sm:$0xff] }
 0x446   :  { %3397 = vmatpush1.bf16.msra.mxu0 %v3396_v6  ;;  %v956_v6 = vld [vmem:[#allocation11 + $0x400] sm:$0xff] }
 0x447   :  { %3399 = vmatprep.subr.bf16.mxu0 %v3398_v7  ;;  %v958_v7 = vld [vmem:[#allocation11 + $0x410] sm:$0xff] }
 0x448   :  { %v3436_v10 = vpack.c.bf16 %v958_v7, %v956_v6  ;;  %v996_v6 = vld [vmem:[#allocation11 + $0x540] sm:$0xff]  ;;  %v998_v7 = vld [vmem:[#allocation11 + $0x550] sm:$0xff] }
 0x44a   :  { %3401 = vmatpush1.bf16.msra.mxu0 %v3400_v12  ;;  %v960_v12 = vld [vmem:[#allocation11 + $0x420] sm:$0xff] }
 0x44b   :  { %3403 = vmatprep.subr.bf16.mxu0 %v3402_v13  ;;  %v962_v13 = vld [vmem:[#allocation11 + $0x430] sm:$0xff] }
 0x44c   :  { %v3440_v16 = vpack.c.bf16 %v962_v13, %v960_v12  ;;  %v1000_v12 = vld [vmem:[#allocation11 + $0x560] sm:$0xff]  ;;  %v1002_v13 = vld [vmem:[#allocation11 + $0x570] sm:$0xff] }
 0x44e   :  { %3405 = vmatpush1.bf16.msra.mxu0 %v3404_v19  ;;  %v964_v19 = vld [vmem:[#allocation11 + $0x440] sm:$0xff] }
 0x44f   :  { %3407 = vmatprep.subr.bf16.mxu0 %v3406_v21  ;;  %v966_v21 = vld [vmem:[#allocation11 + $0x450] sm:$0xff] }
 0x450   :  { %v3444_v26 = vpack.c.bf16 %v966_v21, %v964_v19  ;;  %v1004_v19 = vld [vmem:[#allocation11 + $0x580] sm:$0xff]  ;;  %v1006_v21 = vld [vmem:[#allocation11 + $0x590] sm:$0xff] }
 0x452   :  { %3409 = vmatpush1.bf16.msra.mxu0 %v3408_v28  ;;  %v968_v28 = vld [vmem:[#allocation11 + $0x460] sm:$0xff] }
 0x453   :  { %3411 = vmatprep.subr.bf16.mxu0 %v3410_v29  ;;  %v973_v29 = vld [vmem:[#allocation11 + $0x488] sm:$0xff] }
 0x454   :  { %v3450_v31 = vpack.c.bf16 %v975_v30, %v973_v29  ;;  %v1013_v29 = vld [vmem:[#allocation11 + $0x5c8] sm:$0xff]  ;;  %v1015_v30 = vld [vmem:[#allocation11 + $0x5d8] sm:$0xff] }
 0x456   :  { %3413 = vmatpush1.bf16.msra.mxu0 %v3412_v34  ;;  %v977_v34 = vld [vmem:[#allocation11 + $0x4a8] sm:$0xff] }
 0x457   :  { %3415 = vmatprep.subr.bf16.mxu0 %v3414_v35  ;;  %v979_v35 = vld [vmem:[#allocation11 + $0x4b8] sm:$0xff] }
 0x458   :  { %v3454_v36 = vpack.c.bf16 %v979_v35, %v977_v34  ;;  %v1017_v34 = vld [vmem:[#allocation11 + $0x5e8] sm:$0xff]  ;;  %v1019_v35 = vld [vmem:[#allocation11 + $0x5f8] sm:$0xff] }
 0x45a   :  { %3417 = vmatpush1.bf16.msra.mxu0 %v3416_v40 }
 0x45b   :  { %3419 = vmatprep.subr.bf16.mxu0 %v3418_v41  ;;  %v3458_v41 = vpack.c.bf16 %v983_v39, %v981_v38 }
 0x45e   :  { %3421 = vmatpush1.bf16.msra.mxu0 %v3420_v46  ;;  %v3460_v46 = vpack.c.bf16 %v982_v43, %v980_v20  ;;  %v1340_v20 = vld [vmem:[#allocation14 + $0x18] sm:$0xff] }
 0x45f   :  { %3423 = vmatprep.subr.bf16.mxu0 %v3422_v47  ;;  %v3462_v47 = vpack.c.bf16 %v987_v45, %v985_v44 }
 0x462   :  { %3425 = vmatpush1.bf16.msra.mxu0 %v3424_v17  ;;  %v3464_v17 = vpack.c.bf16 %v986_v50, %v984_v48  ;;  %v1337_v50 = vld [vmem:[#allocation14] sm:$0xff] }
 0x463   :  { %3427 = vmatprep.subr.bf16.mxu0 %v3426_v54  ;;  %v3466_v54 = vpack.c.bf16 %v991_v52, %v989_v51  ;;  %v1339_v51 = vld [vmem:[#allocation14 + $0x10] sm:$0xff] }
 0x466   :  { %3429 = vmatpush1.bf16.msra.mxu0 %v3428_v61  ;;  %v3468_v61 = vpack.c.bf16 %v990_v57, %v988_v55  ;;  %v4845_v57 = vld [vmem:[#allocation13] sm:$0xff] }
 0x467   :  { %3431 = vmatprep.subr.bf16.mxu0 %v3430_v62  ;;  %v3470_v62 = vpack.c.bf16 %v995_v58, %v993_v25  ;;  %v4847_v25 = vpack.c.bf16 %v1339_v51, %v1337_v50  ;;  %v1374_v50 = vld [vmem:[#allocation14 + $0x128] sm:$0xff]  ;;  %v1376_v51 = vld [vmem:[#allocation14 + $0x138] sm:$0xff] }
 0x46a   :  { %3433 = vmatpush1.bf16.msra.mxu0 %v3432_v4  ;;  %v3472_v4 = vpack.c.bf16 %v994_v0, %v992_v22  ;;  %v1346_v22 = vld [vmem:[#allocation14 + $0x48] sm:$0xff]  ;;  %v1348_v0 = vld [vmem:[#allocation14 + $0x58] sm:$0xff] }
 0x46b   :  { %3435 = vmatprep.subr.bf16.mxu0 %v3434_v5  ;;  %v3474_v5 = vpack.c.bf16 %v999_v2, %v997_v1  ;;  %v4856_v1 = vld [vmem:[#allocation13 + $0x8] sm:$0xff] }
 0x46d   :  { %1162 = vmatmul.mubr.f32.vlgmr.msra.gmra.mrb[24].mxu0 %v4789_v42  ;;  %v970_v42 = vld [vmem:[#allocation11 + $0x470] sm:$0xff] }
 0x46e   :  { %3437 = vmatpush1.bf16.msra.mxu0 %v3436_v10  ;;  %1167 = vmatprep.mubr.f32.mxu0 %v4793_v53  ;;  %v3448_v53 = vpack.c.bf16 %v970_v42, %v968_v28  ;;  %v3476_v10 = vpack.c.bf16 %v998_v7, %v996_v6  ;;  %v1008_v28 = vld [vmem:[#allocation11 + $0x5a0] sm:$0xff]  ;;  %v1010_v42 = vld [vmem:[#allocation11 + $0x5b0] sm:$0xff]  ;;  %v1350_v7 = vld [vmem:[#allocation14 + $0x68] sm:$0xff] }
 0x46f   :  { %3439 = vmatprep.subr.bf16.mxu0 %v3438_v11  ;;  %v3478_v11 = vpack.c.bf16 %v1003_v9, %v1001_v8  ;;  %v1347_v6 = vld [vmem:[#allocation14 + $0x50] sm:$0xff]  ;;  %v1352_v8 = vld [vmem:[#allocation14 + $0x78] sm:$0xff] }
 0x471   :  { %1168 = vmatmul.mubr.f32.gmra.mrb[26].mxu0 %v4791_v49  ;;  %v3452_v49 = vpack.c.bf16 %v974_v33, %v972_v32  ;;  %v1012_v32 = vld [vmem:[#allocation11 + $0x5c0] sm:$0xff]  ;;  %v1014_v33 = vld [vmem:[#allocation11 + $0x5d0] sm:$0xff] }
 0x472   :  { %3441 = vmatpush1.bf16.msra.mxu0 %v3440_v16  ;;  %1238 = vmatprep.mubr.f32.mxu0 %v4797_v60  ;;  %v978_v60 = vld [vmem:[#allocation11 + $0x4b0] sm:$0xff]  ;;  %v3480_v16 = vpack.c.bf16 %v1002_v13, %v1000_v12  ;;  %v1351_v12 = vld [vmem:[#allocation14 + $0x70] sm:$0xff]  ;;  %v1354_v13 = vld [vmem:[#allocation14 + $0x88] sm:$0xff] }
 0x473   :  { %3443 = vmatprep.subr.bf16.mxu0 %v3442_v18  ;;  %v3456_v40 = vpack.c.bf16 %v978_v60, %v976_v37  ;;  %v3482_v18 = vpack.c.bf16 %v1007_v15, %v1005_v14  ;;  %v1016_v37 = vld [vmem:[#allocation11 + $0x5e0] sm:$0xff]  ;;  %v1018_v60 = vld [vmem:[#allocation11 + $0x5f0] sm:$0xff]  ;;  %v1356_v14 = vld [vmem:[#allocation14 + $0x98] sm:$0xff] }
 0x474   :  { %v3496_v38 = vpack.c.bf16 %v1018_v60, %v1016_v37  ;;  %v1367_v37 = vld [vmem:[#allocation14 + $0xf0] sm:$0xff]  ;;  %v1370_v60 = vld [vmem:[#allocation14 + $0x108] sm:$0xff] }
 0x476   :  { %3445 = vmatpush1.bf16.msra.mxu0 %v3444_v26  ;;  %v3484_v26 = vpack.c.bf16 %v1006_v21, %v1004_v19  ;;  %v1355_v19 = vld [vmem:[#allocation14 + $0x90] sm:$0xff]  ;;  %v1358_v21 = vld [vmem:[#allocation14 + $0xa8] sm:$0xff] }
 0x477   :  { %3447 = vmatprep.subr.bf16.mxu0 %v3446_v27  ;;  %v3486_v27 = vpack.c.bf16 %v1011_v24, %v1009_v23  ;;  %v1360_v23 = vld [vmem:[#allocation14 + $0xb8] sm:$0xff] }
 0x47a   :  { %3449 = vmatpush1.bf16.msra.mxu0 %v3448_v53  ;;  %v3488_v53 = vpack.c.bf16 %v1010_v42, %v1008_v28  ;;  %v1359_v28 = vld [vmem:[#allocation14 + $0xb0] sm:$0xff]  ;;  %v1362_v42 = vld [vmem:[#allocation14 + $0xc8] sm:$0xff] }
 0x47b   :  { %3451 = vmatprep.subr.bf16.mxu0 %v3450_v31  ;;  %v3490_v31 = vpack.c.bf16 %v1015_v30, %v1013_v29  ;;  %v1364_v29 = vld [vmem:[#allocation14 + $0xd8] sm:$0xff] }
 0x47e   :  { %3453 = vmatpush1.bf16.msra.mxu0 %v3452_v49  ;;  %v3492_v49 = vpack.c.bf16 %v1014_v33, %v1012_v32  ;;  %v1363_v32 = vld [vmem:[#allocation14 + $0xd0] sm:$0xff]  ;;  %v1366_v33 = vld [vmem:[#allocation14 + $0xe8] sm:$0xff] }
 0x47f   :  { %3455 = vmatprep.subr.bf16.mxu0 %v3454_v36  ;;  %v3494_v36 = vpack.c.bf16 %v1019_v35, %v1017_v34  ;;  %v1368_v34 = vld [vmem:[#allocation14 + $0xf8] sm:$0xff] }
 0x482   :  { %3457 = vmatpush1.bf16.msra.mxu0 %v3456_v40 }
 0x483   :  { %3459 = vmatprep.subr.bf16.mxu0 %v3458_v41  ;;  %v1338_v41 = vld [vmem:[#allocation14 + $0x8] sm:$0xff] }
 0x484   :  { %v4839_v48 = vpack.c.bf16 %v1340_v20, %v1338_v41 }
 0x486   :  { %3461 = vmatpush1.bf16.msra.mxu0 %v3460_v46 }
 0x487   :  { %3463 = vmatprep.subr.bf16.mxu0 %v3462_v47 }
 0x48a   :  { %3465 = vmatpush1.bf16.msra.mxu0 %v3464_v17  ;;  %v1342_v17 = vld [vmem:[#allocation14 + $0x28] sm:$0xff] }
 0x48b   :  { %3467 = vmatprep.subr.bf16.mxu0 %v3466_v54  ;;  %v1344_v54 = vld [vmem:[#allocation14 + $0x38] sm:$0xff] }
 0x48c   :  { %v4850_v58 = vpack.c.bf16 %v1344_v54, %v1342_v17  ;;  %v4905_v54 = vpack.c.bf16 %v1376_v51, %v1374_v50  ;;  %v1393_v50 = vld [vmem:[#allocation14 + $0x1c0] sm:$0xff]  ;;  %v1395_v51 = vld [vmem:[#allocation14 + $0x1d0] sm:$0xff] }
 0x48e   :  { %3469 = vmatpush1.bf16.msra.mxu0 %v3468_v61  ;;  %v1341_v61 = vld [vmem:[#allocation14 + $0x20] sm:$0xff] }
 0x48f   :  { %3471 = vmatprep.subr.bf16.mxu0 %v3470_v62  ;;  %v1343_v62 = vld [vmem:[#allocation14 + $0x30] sm:$0xff] }
 0x490   :  { %v4858_v2 = vpack.c.bf16 %v1343_v62, %v1341_v61  ;;  %v1373_v61 = vld [vmem:[#allocation14 + $0x120] sm:$0xff]  ;;  %v1375_v62 = vld [vmem:[#allocation14 + $0x130] sm:$0xff] }
 0x492   :  { %3473 = vmatpush1.bf16.msra.mxu0 %v3472_v4  ;;  %v4861_v4 = vpack.c.bf16 %v1348_v0, %v1346_v22  ;;  %v1378_v22 = vld [vmem:[#allocation14 + $0x148] sm:$0xff]  ;;  %v1380_v0 = vld [vmem:[#allocation14 + $0x158] sm:$0xff] }
 0x493   :  { %3475 = vmatprep.subr.bf16.mxu0 %v3474_v5  ;;  %v1345_v5 = vld [vmem:[#allocation14 + $0x40] sm:$0xff] }
 0x494   :  { %v4866_v9 = vpack.c.bf16 %v1347_v6, %v1345_v5  ;;  %v4908_v5 = vpack.c.bf16 %v1375_v62, %v1373_v61  ;;  %v4911_v6 = vpack.c.bf16 %v1380_v0, %v1378_v22  ;;  %v1398_v61 = vld [vmem:[#allocation14 + $0x1e8] sm:$0xff]  ;;  %v1400_v62 = vld [vmem:[#allocation14 + $0x1f8] sm:$0xff]  ;;  %v3560_v22 = vpack.c.bf16 %v1395_v51, %v1393_v50  ;;  %v1793_v50 = vld [vmem:[#allocation16 + $0xb0] sm:$0xff] }
 0x495   :  { %v3562_v0 = vpack.c.bf16 %v1400_v62, %v1398_v61  ;;  %v1796_v51 = vld [vmem:[#allocation16 + $0xc8] sm:$0xff]  ;;  %v1798_v61 = vld [vmem:[#allocation16 + $0xd8] sm:$0xff] }
 0x496   :  { %3477 = vmatpush1.bf16.msra.mxu0 %v3476_v10  ;;  %v4869_v10 = vpack.c.bf16 %v1352_v8, %v1350_v7  ;;  %v1377_v7 = vld [vmem:[#allocation14 + $0x140] sm:$0xff]  ;;  %v1379_v8 = vld [vmem:[#allocation14 + $0x150] sm:$0xff] }
 0x497   :  { %3479 = vmatprep.subr.bf16.mxu0 %v3478_v11  ;;  %v1349_v11 = vld [vmem:[#allocation14 + $0x60] sm:$0xff] }
 0x498   :  { %v4872_v15 = vpack.c.bf16 %v1351_v12, %v1349_v11  ;;  %v1382_v11 = vld [vmem:[#allocation14 + $0x168] sm:$0xff]  ;;  %v1384_v12 = vld [vmem:[#allocation14 + $0x178] sm:$0xff] }
 0x49a   :  { %3481 = vmatpush1.bf16.msra.mxu0 %v3480_v16  ;;  %v4875_v16 = vpack.c.bf16 %v1356_v14, %v1354_v13  ;;  %v4914_v13 = vpack.c.bf16 %v1379_v8, %v1377_v7  ;;  %v4917_v14 = vpack.c.bf16 %v1384_v12, %v1382_v11  ;;  %v1397_v7 = vld [vmem:[#allocation14 + $0x1e0] sm:$0xff]  ;;  %v1399_v8 = vld [vmem:[#allocation14 + $0x1f0] sm:$0xff] }
 0x49b   :  { %3483 = vmatprep.subr.bf16.mxu0 %v3482_v18  ;;  %v1353_v18 = vld [vmem:[#allocation14 + $0x80] sm:$0xff]  ;;  %v3564_v11 = vpack.c.bf16 %v1399_v8, %v1397_v7  ;;  %v1797_v7 = vld [vmem:[#allocation16 + $0xd0] sm:$0xff]  ;;  %v1800_v8 = vld [vmem:[#allocation16 + $0xe8] sm:$0xff] }
 0x49c   :  { %v4878_v24 = vpack.c.bf16 %v1355_v19, %v1353_v18  ;;  %v1381_v18 = vld [vmem:[#allocation14 + $0x160] sm:$0xff]  ;;  %v1383_v19 = vld [vmem:[#allocation14 + $0x170] sm:$0xff] }
 0x49e   :  { %3485 = vmatpush1.bf16.msra.mxu0 %v3484_v26  ;;  %v4881_v26 = vpack.c.bf16 %v1360_v23, %v1358_v21  ;;  %v1386_v21 = vld [vmem:[#allocation14 + $0x188] sm:$0xff]  ;;  %v1388_v23 = vld [vmem:[#allocation14 + $0x198] sm:$0xff] }
 0x49f   :  { %3487 = vmatprep.subr.bf16.mxu0 %v3486_v27  ;;  %v1357_v27 = vld [vmem:[#allocation14 + $0xa0] sm:$0xff] }
 0x4a0   :  { %v4884_v30 = vpack.c.bf16 %v1359_v28, %v1357_v27  ;;  %v4920_v27 = vpack.c.bf16 %v1383_v19, %v1381_v18  ;;  %v4923_v28 = vpack.c.bf16 %v1388_v23, %v1386_v21 }
 0x4a2   :  { %3489 = vmatpush1.bf16.msra.mxu0 %v3488_v53  ;;  %v4887_v53 = vpack.c.bf16 %v1364_v29, %v1362_v42  ;;  %v1385_v42 = vld [vmem:[#allocation14 + $0x180] sm:$0xff]  ;;  %v1387_v29 = vld [vmem:[#allocation14 + $0x190] sm:$0xff] }
 0x4a3   :  { %3491 = vmatprep.subr.bf16.mxu0 %v3490_v31  ;;  %v1361_v31 = vld [vmem:[#allocation14 + $0xc0] sm:$0xff] }
 0x4a4   :  { %v4890_v35 = vpack.c.bf16 %v1363_v32, %v1361_v31  ;;  %v1390_v31 = vld [vmem:[#allocation14 + $0x1a8] sm:$0xff]  ;;  %v1392_v32 = vld [vmem:[#allocation14 + $0x1b8] sm:$0xff] }
 0x4a6   :  { %3493 = vmatpush1.bf16.msra.mxu0 %v3492_v49  ;;  %v4893_v49 = vpack.c.bf16 %v1368_v34, %v1366_v33  ;;  %v4926_v33 = vpack.c.bf16 %v1387_v29, %v1385_v42  ;;  %v3554_v34 = vpack.c.bf16 %v1392_v32, %v1390_v31  ;;  %v1785_v42 = vld [vmem:[#allocation16 + $0x70] sm:$0xff]  ;;  %v1788_v29 = vld [vmem:[#allocation16 + $0x88] sm:$0xff]  ;;  %v1790_v31 = vld [vmem:[#allocation16 + $0x98] sm:$0xff] }
 0x4a7   :  { %3495 = vmatprep.subr.bf16.mxu0 %v3494_v36  ;;  %v1365_v36 = vld [vmem:[#allocation14 + $0xe0] sm:$0xff] }
 0x4a8   :  { %v4896_v41 = vpack.c.bf16 %v1367_v37, %v1365_v36  ;;  %v1389_v36 = vld [vmem:[#allocation14 + $0x1a0] sm:$0xff]  ;;  %v1391_v37 = vld [vmem:[#allocation14 + $0x1b0] sm:$0xff] }
 0x4aa   :  { %3497 = vmatpush1.bf16.msra.mxu0 %v3496_v38  ;;  %v1372_v38 = vld [vmem:[#allocation14 + $0x118] sm:$0xff] }
 0x4ab   :  { %v4899_v20 = vpack.c.bf16 %v1372_v38, %v1370_v60  ;;  %v1394_v60 = vld [vmem:[#allocation14 + $0x1c8] sm:$0xff]  ;;  %v1396_v38 = vld [vmem:[#allocation14 + $0x1d8] sm:$0xff] }
 0x4ad   :  { %1239 = vmatmul.mubr.f32.vlgmr.msra.gmra.mrb[24].mxu0 %v4795_v56 }
 0x4ae   :  { %1244 = vmatprep.mubr.f32.mxu0 %v4801_v3 }
 0x4b1   :  { %1245 = vmatmul.mubr.f32.gmra.mrb[26].mxu0 %v4799_v63 }
 0x4b2   :  { %1752 = vmatprep.mubr.f32.mxu0 %v4445_v59 }
 0x580   :  { %v4811_v39 = vpop.f32.mrb[24].mxu0 }
 0x581   :  { %v4813_v40 = vpop.f32.mrb[25].mxu0  ;;  %v4819_v44 = vmul.f32 %v4811_v39, %v4811_v39 }
 0x582   :  { %v4831_v45 = vmul.f32 %v4813_v40, %v4813_v40 }
 0x584   :  { %v4815_v43 = vpop.f32.mrb[26].mxu0 }
 0x585   :  { %v3500_v56 = vpack.c.bf16 %v4815_v43, %v4811_v39  ;;  %v4825_v63 = vmul.f32 %v4815_v43, %v4815_v43  ;;  %v4827_v3 = vpop.f32.mrb[27].mxu0 }
 0x586   :  { %v3498_v46 = vpack.c.bf16 %v4827_v3, %v4813_v40  ;;  %v4837_v47 = vmul.f32 %v4827_v3, %v4827_v3 }
 0x587   :  { %v3568_v52 = vpack.c.bf16 %v4825_v63, %v4819_v44 }
 0x588   :  { %3499 = vmatprep.subr.bf16.mxu1 %v3498_v46  ;;  %v3566_v55 = vpack.c.bf16 %v4837_v47, %v4831_v45  ;;  %v1371_v46 = vld [vmem:[#allocation14 + $0x110] sm:$0xff] }
 0x589   :  { %3501 = vmatpush1.bf16.msra.mxu1 %v3500_v56  ;;  %v1369_v56 = vld [vmem:[#allocation14 + $0x100] sm:$0xff] }
 0x58a   :  { %3503 = vmatprep.subr.bf16.mxu1 %v4839_v48  ;;  %v4902_v17 = vpack.c.bf16 %v1371_v46, %v1369_v56  ;;  %v3556_v56 = vpack.c.bf16 %v1391_v37, %v1389_v36  ;;  %v3558_v46 = vpack.c.bf16 %v1396_v38, %v1394_v60  ;;  %v1789_v36 = vld [vmem:[#allocation16 + $0x90] sm:$0xff]  ;;  %v1792_v37 = vld [vmem:[#allocation16 + $0xa8] sm:$0xff]  ;;  %v1794_v60 = vld [vmem:[#allocation16 + $0xb8] sm:$0xff] }
 0x58c   :  { %2992 = vmatmul.mubr.msk.f32.vlgmr.msra.gmra.mrb[20].mxu1 %vm1253_vm11, %v4845_v57 }
 0x58d   :  { %3505 = vmatpush1.bf16.msra.mxu1 %v4847_v25  ;;  %1330 = vmatprep.mubr.f32.mxu1 %v4445_v59 }
 0x58e   :  { %3507 = vmatprep.subr.bf16.mxu1 %v4850_v58 }
 0x590   :  { %2993 = vmatmul.mubr.msk.f32.gmra.mrb[22].mxu1 %vm1253_vm11, %v4856_v1 }
 0x591   :  { %3509 = vmatpush1.bf16.msra.mxu1 %v4858_v2 }
 0x592   :  { %3511 = vmatprep.subr.bf16.mxu1 %v4861_v4 }
 0x595   :  { %3513 = vmatpush1.bf16.msra.mxu1 %v4866_v9 }
 0x596   :  { %3515 = vmatprep.subr.bf16.mxu1 %v4869_v10 }
 0x599   :  { %3517 = vmatpush1.bf16.msra.mxu1 %v4872_v15 }
 0x59a   :  { %3519 = vmatprep.subr.bf16.mxu1 %v4875_v16 }
 0x59d   :  { %3521 = vmatpush1.bf16.msra.mxu1 %v4878_v24 }
 0x59e   :  { %3523 = vmatprep.subr.bf16.mxu1 %v4881_v26 }
 0x5a1   :  { %3525 = vmatpush1.bf16.msra.mxu1 %v4884_v30 }
 0x5a2   :  { %3527 = vmatprep.subr.bf16.mxu1 %v4887_v53 }
 0x5a5   :  { %3529 = vmatpush1.bf16.msra.mxu1 %v4890_v35 }
 0x5a6   :  { %3531 = vmatprep.subr.bf16.mxu1 %v4893_v49 }
 0x5a9   :  { %3533 = vmatpush1.bf16.msra.mxu1 %v4896_v41 }
 0x5aa   :  { %3535 = vmatprep.subr.bf16.mxu1 %v4899_v20 }
 0x5ad   :  { %3537 = vmatpush1.bf16.msra.mxu1 %v4902_v17 }
 0x5ae   :  { %3539 = vmatprep.subr.bf16.mxu1 %v4905_v54 }
 0x5b1   :  { %3541 = vmatpush1.bf16.msra.mxu1 %v4908_v5 }
 0x5b2   :  { %3543 = vmatprep.subr.bf16.mxu1 %v4911_v6 }
 0x5b5   :  { %3545 = vmatpush1.bf16.msra.mxu1 %v4914_v13 }
 0x5b6   :  { %3547 = vmatprep.subr.bf16.mxu1 %v4917_v14 }
 0x5b9   :  { %3549 = vmatpush1.bf16.msra.mxu1 %v4920_v27 }
 0x5ba   :  { %3551 = vmatprep.subr.bf16.mxu1 %v4923_v28 }
 0x5bd   :  { %3553 = vmatpush1.bf16.msra.mxu1 %v4926_v33 }
 0x5be   :  { %3555 = vmatprep.subr.bf16.mxu1 %v3554_v34 }
 0x5c1   :  { %3557 = vmatpush1.bf16.msra.mxu1 %v3556_v56 }
 0x5c2   :  { %3559 = vmatprep.subr.bf16.mxu1 %v3558_v46 }
 0x5c5   :  { %3561 = vmatpush1.bf16.msra.mxu1 %v3560_v22 }
 0x5c6   :  { %3563 = vmatprep.subr.bf16.mxu1 %v3562_v0 }
 0x5c9   :  { %3565 = vmatpush1.bf16.msra.mxu1 %v3564_v11 }
 0x5ca   :  { %3567 = vmatprep.subr.bf16.mxu1 %v3566_v55 }
 0x65f   :  { %v1326_v12 = vpop.f32.mrb[20].mxu1 }
 0x660   :  { %v1328_v18 = vpop.f32.mrb[21].mxu1 }
 0x661   :  { %1465 = vmatprep.mubr.f32.mxu1 %v1328_v18 }
 0x662   :  { %1466 = vmatmul.mubr.f32.vlgmr.msra.gmra.mrb[24].mxu1 %v1326_v12 }
 0x663   :  { %3569 = vmatpush1.bf16.msra.mxu1 %v3568_v52  ;;  %v1332_v19 = vpop.f32.mrb[22].mxu1 }
 0x664   :  { %v1334_v21 = vpop.f32.mrb[23].mxu1  ;;  %3571 = vmatprep.subr.bf16.mxu1 %v4839_v48 }
 0x665   :  { %1471 = vmatprep.mubr.f32.mxu1 %v1334_v21  ;;  %v1801_v21 = vld [vmem:[#allocation16 + $0xf0] sm:$0xff] }
 0x666   :  { %1472 = vmatmul.mubr.f32.gmra.mrb[26].mxu1 %v1332_v19  ;;  %v1799_v19 = vld [vmem:[#allocation16 + $0xe0] sm:$0xff] }
 0x667   :  { %1546 = vmatprep.mubr.f32.mxu1 %v4445_v59 }
 0x66a   :  { %2994 = vmatmul.mubr.msk.f32.vlgmr.msra.gmra.mrb[28].mxu1 %vm1253_vm11, %v4845_v57 }
 0x66b   :  { %1552 = vmatprep.mubr.f32.mxu1 %v4445_v59  ;;  %3573 = vmatpush1.bf16.msra.mxu1 %v4847_v25 }
 0x66c   :  { %3575 = vmatprep.subr.bf16.mxu1 %v4850_v58 }
 0x66e   :  { %2995 = vmatmul.mubr.msk.f32.gmra.mrb[30].mxu1 %vm1253_vm11, %v4856_v1 }
 0x66f   :  { %3577 = vmatpush1.bf16.msra.mxu1 %v4858_v2 }
 0x670   :  { %3579 = vmatprep.subr.bf16.mxu1 %v4861_v4  ;;  %v1772_v4 = vld [vmem:[#allocation16 + $0x8] sm:$0xff] }
 0x673   :  { %3581 = vmatpush1.bf16.msra.mxu1 %v4866_v9  ;;  %v1774_v9 = vld [vmem:[#allocation16 + $0x18] sm:$0xff] }
 0x674   :  { %3583 = vmatprep.subr.bf16.mxu1 %v4869_v10  ;;  %v1771_v10 = vld [vmem:[#allocation16] sm:$0xff] }
 0x677   :  { %3585 = vmatpush1.bf16.msra.mxu1 %v4872_v15  ;;  %v3638_v15 = vpack.c.bf16 %v1774_v9, %v1772_v4  ;;  %v1803_v4 = vld [vmem:[#allocation16 + $0x100] sm:$0xff]  ;;  %v1805_v9 = vld [vmem:[#allocation16 + $0x110] sm:$0xff] }
 0x678   :  { %3587 = vmatprep.subr.bf16.mxu1 %v4875_v16  ;;  %v1773_v16 = vld [vmem:[#allocation16 + $0x10] sm:$0xff] }
 0x67b   :  { %3589 = vmatpush1.bf16.msra.mxu1 %v4878_v24  ;;  %v1776_v24 = vld [vmem:[#allocation16 + $0x28] sm:$0xff] }
 0x67c   :  { %3591 = vmatprep.subr.bf16.mxu1 %v4881_v26  ;;  %v1778_v26 = vld [vmem:[#allocation16 + $0x38] sm:$0xff] }
 0x67f   :  { %3593 = vmatpush1.bf16.msra.mxu1 %v4884_v30  ;;  %v3640_v30 = vpack.c.bf16 %v1773_v16, %v1771_v10  ;;  %v1808_v10 = vld [vmem:[#allocation16 + $0x128] sm:$0xff]  ;;  %v3672_v16 = vpack.c.bf16 %v1805_v9, %v1803_v4 }
 0x680   :  { %3595 = vmatprep.subr.bf16.mxu1 %v4887_v53  ;;  %v3642_v53 = vpack.c.bf16 %v1778_v26, %v1776_v24  ;;  %v1807_v26 = vld [vmem:[#allocation16 + $0x120] sm:$0xff] }
 0x683   :  { %3597 = vmatpush1.bf16.msra.mxu1 %v4890_v35  ;;  %v1775_v35 = vld [vmem:[#allocation16 + $0x20] sm:$0xff] }
 0x684   :  { %3599 = vmatprep.subr.bf16.mxu1 %v4893_v49  ;;  %v1777_v49 = vld [vmem:[#allocation16 + $0x30] sm:$0xff] }
 0x687   :  { %3601 = vmatpush1.bf16.msra.mxu1 %v4896_v41  ;;  %v1780_v41 = vld [vmem:[#allocation16 + $0x48] sm:$0xff] }
 0x688   :  { %3603 = vmatprep.subr.bf16.mxu1 %v4899_v20  ;;  %v1782_v20 = vld [vmem:[#allocation16 + $0x58] sm:$0xff] }
 0x68b   :  { %3605 = vmatpush1.bf16.msra.mxu1 %v4902_v17  ;;  %v3644_v17 = vpack.c.bf16 %v1777_v49, %v1775_v35  ;;  %v1814_v35 = vld [vmem:[#allocation16 + $0x158] sm:$0xff] }
 0x68c   :  { %3607 = vmatprep.subr.bf16.mxu1 %v4905_v54  ;;  %v3646_v54 = vpack.c.bf16 %v1782_v20, %v1780_v41  ;;  %v1811_v20 = vld [vmem:[#allocation16 + $0x140] sm:$0xff] }
 0x68f   :  { %3609 = vmatpush1.bf16.msra.mxu1 %v4908_v5  ;;  %v1779_v5 = vld [vmem:[#allocation16 + $0x40] sm:$0xff] }
 0x690   :  { %3611 = vmatprep.subr.bf16.mxu1 %v4911_v6  ;;  %v1781_v6 = vld [vmem:[#allocation16 + $0x50] sm:$0xff] }
 0x691   :  { %v3648_v23 = vpack.c.bf16 %v1781_v6, %v1779_v5  ;;  %v1818_v5 = vld [vmem:[#allocation16 + $0x178] sm:$0xff] }
 0x693   :  { %3613 = vmatpush1.bf16.msra.mxu1 %v4914_v13  ;;  %v1784_v13 = vld [vmem:[#allocation16 + $0x68] sm:$0xff] }
 0x694   :  { %3615 = vmatprep.subr.bf16.mxu1 %v4917_v14  ;;  %v1786_v14 = vld [vmem:[#allocation16 + $0x78] sm:$0xff] }
 0x697   :  { %3617 = vmatpush1.bf16.msra.mxu1 %v4920_v27  ;;  %v3650_v27 = vpack.c.bf16 %v1786_v14, %v1784_v13  ;;  %v1815_v14 = vld [vmem:[#allocation16 + $0x160] sm:$0xff] }
 0x698   :  { %3619 = vmatprep.subr.bf16.mxu1 %v4923_v28  ;;  %v1783_v28 = vld [vmem:[#allocation16 + $0x60] sm:$0xff] }
 0x699   :  { %v3652_v32 = vpack.c.bf16 %v1785_v42, %v1783_v28  ;;  %v1822_v28 = vld [vmem:[#allocation16 + $0x198] sm:$0xff] }
 0x69b   :  { %3621 = vmatpush1.bf16.msra.mxu1 %v4926_v33  ;;  %v3654_v33 = vpack.c.bf16 %v1790_v31, %v1788_v29  ;;  %v1819_v31 = vld [vmem:[#allocation16 + $0x180] sm:$0xff] }
 0x69c   :  { %3623 = vmatprep.subr.bf16.mxu1 %v3554_v34  ;;  %v1787_v34 = vld [vmem:[#allocation16 + $0x80] sm:$0xff] }
 0x69d   :  { %v3656_v38 = vpack.c.bf16 %v1789_v36, %v1787_v34  ;;  %v1826_v34 = vld [vmem:[#allocation16 + $0x1b8] sm:$0xff] }
 0x69f   :  { %3625 = vmatpush1.bf16.msra.mxu1 %v3556_v56  ;;  %v3658_v56 = vpack.c.bf16 %v1794_v60, %v1792_v37  ;;  %v1823_v60 = vld [vmem:[#allocation16 + $0x1a0] sm:$0xff] }
 0x6a0   :  { %3627 = vmatprep.subr.bf16.mxu1 %v3558_v46  ;;  %v1791_v46 = vld [vmem:[#allocation16 + $0xa0] sm:$0xff] }
 0x6a1   :  { %v3660_v62 = vpack.c.bf16 %v1793_v50, %v1791_v46  ;;  %v1830_v46 = vld [vmem:[#allocation16 + $0x1d8] sm:$0xff] }
 0x6a3   :  { %3629 = vmatpush1.bf16.msra.mxu1 %v3560_v22  ;;  %v3662_v22 = vpack.c.bf16 %v1798_v61, %v1796_v51  ;;  %v1827_v61 = vld [vmem:[#allocation16 + $0x1c0] sm:$0xff] }
 0x6a4   :  { %3631 = vmatprep.subr.bf16.mxu1 %v3562_v0  ;;  %v1795_v0 = vld [vmem:[#allocation16 + $0xc0] sm:$0xff] }
 0x6a5   :  { %v3664_v12 = vpack.c.bf16 %v1797_v7, %v1795_v0  ;;  %v1834_v0 = vld [vmem:[#allocation16 + $0x1f8] sm:$0xff] }
 0x6a7   :  { %3633 = vmatpush1.bf16.msra.mxu1 %v3564_v11  ;;  %v1802_v11 = vld [vmem:[#allocation16 + $0xf8] sm:$0xff] }
 0x6a8   :  { %3639 = vmatprep.subr.bf16.mxu1 %v3638_v15  ;;  %v3666_v18 = vpack.c.bf16 %v1802_v11, %v1800_v8  ;;  %v1810_v15 = vld [vmem:[#allocation16 + $0x138] sm:$0xff]  ;;  %v1831_v11 = vld [vmem:[#allocation16 + $0x1e0] sm:$0xff] }
 0x6a9   :  { %v3674_v24 = vpack.c.bf16 %v1810_v15, %v1808_v10 }
 0x735   :  { %v4968_v44 = vpop.f32.mrb[24].mxu1 }
 0x736   :  { %v1648_v63 = vsub.f32 %v4811_v39, %v4968_v44  ;;  %v4972_v45 = vpop.f32.mrb[25].mxu1 }
 0x737   :  { %v1649_v47 = vsub.f32 %v4813_v40, %v4972_v45 }
 0x739   :  { %v4976_v48 = vpop.f32.mrb[26].mxu1 }
 0x73a   :  { %v1650_v52 = vsub.f32 %v4815_v43, %v4976_v48  ;;  %v4980_v55 = vpop.f32.mrb[27].mxu1  ;;  %v1638_v4 = vmul.f32 %v4976_v48, %v4976_v48  ;;  %v1676_v43 = vld [vmem:[%s5185_s8] sm:$0xff]  ;;  %v1678_v48 = vld [vmem:[%s5185_s8 + $0x10] sm:$0xff] }
 0x73b   :  { %v1651_v57 = vsub.f32 %v4827_v3, %v4980_v55  ;;  %v1639_v10 = vmul.f32 %v4980_v55, %v4980_v55  ;;  %v1677_v3 = vld [vmem:[%s5185_s8 + $0x8] sm:$0xff]  ;;  %v1838_v55 = vld [vmem:[#allocation16 + $0x218] sm:$0xff] }
 0x73d   :  { %v1548_v25 = vpop.f32.mrb[28].mxu1 }
 0x73e   :  { %v1550_v58 = vpop.f32.mrb[29].mxu1 }
 0x73f   :  { %1623 = vmatprep.mubr.f32.mxu1 %v1550_v58  ;;  %v1806_v58 = vld [vmem:[#allocation16 + $0x118] sm:$0xff] }
 0x740   :  { %1624 = vmatmul.mubr.f32.vlgmr.msra.gmra.mrb[32].mxu1 %v1548_v25  ;;  %v1804_v25 = vld [vmem:[#allocation16 + $0x108] sm:$0xff] }
 0x741   :  { %v1554_v1 = vpop.f32.mrb[30].mxu1  ;;  %3641 = vmatpush1.bf16.msra.mxu1 %v3640_v30  ;;  %v1809_v30 = vld [vmem:[#allocation16 + $0x130] sm:$0xff] }
 0x742   :  { %v1556_v2 = vpop.f32.mrb[31].mxu1  ;;  %3643 = vmatprep.subr.bf16.mxu1 %v3642_v53  ;;  %v1812_v53 = vld [vmem:[#allocation16 + $0x148] sm:$0xff]  ;;  %v3676_v49 = vpack.c.bf16 %v1809_v30, %v1807_v26 }
 0x743   :  { %1629 = vmatprep.mubr.f32.mxu1 %v1556_v2  ;;  %v3670_v2 = vpack.c.bf16 %v1806_v58, %v1804_v25  ;;  %v3678_v41 = vpack.c.bf16 %v1814_v35, %v1812_v53 }
 0x744   :  { %1630 = vmatmul.mubr.f32.gmra.mrb[34].mxu1 %v1554_v1  ;;  %v3668_v1 = vpack.c.bf16 %v1801_v21, %v1799_v19  ;;  %v1636_v19 = vmul.f32 %v4968_v44, %v4968_v44  ;;  %v1637_v21 = vmul.f32 %v4972_v45, %v4972_v45 }
 0x745   :  { %3645 = vmatpush1.bf16.msra.mxu1 %v3644_v17  ;;  %v1813_v17 = vld [vmem:[#allocation16 + $0x150] sm:$0xff] }
 0x746   :  { %3647 = vmatprep.subr.bf16.mxu1 %v3646_v54  ;;  %v1816_v54 = vld [vmem:[#allocation16 + $0x168] sm:$0xff]  ;;  %v3680_v6 = vpack.c.bf16 %v1813_v17, %v1811_v20 }
 0x747   :  { %v3682_v13 = vpack.c.bf16 %v1818_v5, %v1816_v54 }
 0x749   :  { %3649 = vmatpush1.bf16.msra.mxu1 %v3648_v23  ;;  %v1817_v23 = vld [vmem:[#allocation16 + $0x170] sm:$0xff] }
 0x74a   :  { %3651 = vmatprep.subr.bf16.mxu1 %v3650_v27  ;;  %v1820_v27 = vld [vmem:[#allocation16 + $0x188] sm:$0xff]  ;;  %v3684_v42 = vpack.c.bf16 %v1817_v23, %v1815_v14 }
 0x74b   :  { %v3686_v29 = vpack.c.bf16 %v1822_v28, %v1820_v27 }
 0x74d   :  { %3653 = vmatpush1.bf16.msra.mxu1 %v3652_v32  ;;  %v1821_v32 = vld [vmem:[#allocation16 + $0x190] sm:$0xff] }
 0x74e   :  { %3655 = vmatprep.subr.bf16.mxu1 %v3654_v33  ;;  %v1824_v33 = vld [vmem:[#allocation16 + $0x1a8] sm:$0xff]  ;;  %v3688_v36 = vpack.c.bf16 %v1821_v32, %v1819_v31 }
 0x74f   :  { %v3690_v37 = vpack.c.bf16 %v1826_v34, %v1824_v33  ;;  %v1835_v33 = vld [vmem:[#allocation16 + $0x200] sm:$0xff]  ;;  %v1837_v34 = vld [vmem:[#allocation16 + $0x210] sm:$0xff] }
 0x751   :  { %3657 = vmatpush1.bf16.msra.mxu1 %v3656_v38  ;;  %v1825_v38 = vld [vmem:[#allocation16 + $0x1b0] sm:$0xff] }
 0x752   :  { %3659 = vmatprep.subr.bf16.mxu1 %v3658_v56  ;;  %v1828_v56 = vld [vmem:[#allocation16 + $0x1c8] sm:$0xff]  ;;  %v3692_v50 = vpack.c.bf16 %v1825_v38, %v1823_v60  ;;  %v3704_v38 = vpack.c.bf16 %v1837_v34, %v1835_v33  ;;  %v1878_v33 = vld [vmem:[#allocation16 + $0x358] sm:$0xff] }
 0x753   :  { %v3694_v51 = vpack.c.bf16 %v1830_v46, %v1828_v56 }
 0x755   :  { %3661 = vmatpush1.bf16.msra.mxu1 %v3660_v62  ;;  %v1829_v62 = vld [vmem:[#allocation16 + $0x1d0] sm:$0xff] }
 0x756   :  { %3663 = vmatprep.subr.bf16.mxu1 %v3662_v22  ;;  %v1832_v22 = vld [vmem:[#allocation16 + $0x1e8] sm:$0xff]  ;;  %v3696_v7 = vpack.c.bf16 %v1829_v62, %v1827_v61  ;;  %v1846_v62 = vld [vmem:[#allocation16 + $0x258] sm:$0xff] }
 0x757   :  { %v3698_v8 = vpack.c.bf16 %v1834_v0, %v1832_v22  ;;  %v1844_v61 = vld [vmem:[#allocation16 + $0x248] sm:$0xff] }
 0x759   :  { %3665 = vmatpush1.bf16.msra.mxu1 %v3664_v12  ;;  %v1833_v12 = vld [vmem:[#allocation16 + $0x1f0] sm:$0xff] }
 0x75a   :  { %3667 = vmatprep.subr.bf16.mxu1 %v3666_v18  ;;  %v3700_v18 = vpack.c.bf16 %v1833_v12, %v1831_v11  ;;  %v1845_v11 = vld [vmem:[#allocation16 + $0x250] sm:$0xff] }
 0x75d   :  { %3669 = vmatpush1.bf16.msra.mxu1 %v3668_v1 }
 0x75e   :  { %3671 = vmatprep.subr.bf16.mxu1 %v3670_v2 }
 0x761   :  { %3673 = vmatpush1.bf16.msra.mxu1 %v3672_v16 }
 0x762   :  { %3675 = vmatprep.subr.bf16.mxu1 %v3674_v24 }
 0x765   :  { %3677 = vmatpush1.bf16.msra.mxu1 %v3676_v49 }
 0x766   :  { %3679 = vmatprep.subr.bf16.mxu1 %v3678_v41 }
 0x769   :  { %3681 = vmatpush1.bf16.msra.mxu1 %v3680_v6 }
 0x76a   :  { %3683 = vmatprep.subr.bf16.mxu1 %v3682_v13 }
 0x76d   :  { %3685 = vmatpush1.bf16.msra.mxu1 %v3684_v42 }
 0x76e   :  { %3687 = vmatprep.subr.bf16.mxu1 %v3686_v29 }
 0x771   :  { %3689 = vmatpush1.bf16.msra.mxu1 %v3688_v36  ;;  %v1840_v36 = vld [vmem:[#allocation16 + $0x228] sm:$0xff] }
 0x772   :  { %3691 = vmatprep.subr.bf16.mxu1 %v3690_v37  ;;  %v1842_v37 = vld [vmem:[#allocation16 + $0x238] sm:$0xff] }
 0x773   :  { %v3706_v46 = vpack.c.bf16 %v1842_v37, %v1840_v36  ;;  %v1875_v37 = vld [vmem:[#allocation16 + $0x340] sm:$0xff] }
 0x775   :  { %3693 = vmatpush1.bf16.msra.mxu1 %v3692_v50  ;;  %v1839_v50 = vld [vmem:[#allocation16 + $0x220] sm:$0xff] }
 0x776   :  { %3695 = vmatprep.subr.bf16.mxu1 %v3694_v51  ;;  %v1841_v51 = vld [vmem:[#allocation16 + $0x230] sm:$0xff] }
 0x777   :  { %v3708_v22 = vpack.c.bf16 %v1841_v51, %v1839_v50  ;;  %v1879_v51 = vld [vmem:[#allocation16 + $0x360] sm:$0xff] }
 0x779   :  { %3697 = vmatpush1.bf16.msra.mxu1 %v3696_v7  ;;  %v3710_v7 = vpack.c.bf16 %v1846_v62, %v1844_v61  ;;  %v1881_v61 = vld [vmem:[#allocation16 + $0x370] sm:$0xff]  ;;  %v1884_v62 = vld [vmem:[#allocation16 + $0x388] sm:$0xff] }
 0x77a   :  { %3699 = vmatprep.subr.bf16.mxu1 %v3698_v8  ;;  %v1843_v8 = vld [vmem:[#allocation16 + $0x240] sm:$0xff] }
 0x77d   :  { %3701 = vmatpush1.bf16.msra.mxu1 %v3700_v18  ;;  %v1848_v18 = vld [vmem:[#allocation16 + $0x268] sm:$0xff] }
 0x813   :  { %v1625_v25 = vpop.f32.mrb[32].mxu1 }
 0x814   :  { %v1640_v58 = vsub.f32 %v1625_v25, %v1636_v19  ;;  %v1627_v1 = vpop.f32.mrb[33].mxu1  ;;  %v1850_v19 = vld [vmem:[#allocation16 + $0x278] sm:$0xff] }
 0x815   :  { %v1641_v2 = vsub.f32 %v1627_v1, %v1637_v21  ;;  %v3712_v21 = vpack.c.bf16 %v1845_v11, %v1843_v8  ;;  %v1847_v1 = vld [vmem:[#allocation16 + $0x260] sm:$0xff] }
 0x816   :  { %v1644_v9 = vmax.f32 %v1640_v58, 0.0  ;;  %v3714_v58 = vpack.c.bf16 %v1850_v19, %v1848_v18  ;;  %v1883_v11 = vld [vmem:[#allocation16 + $0x380] sm:$0xff]  ;;  %v1888_v18 = vld [vmem:[#allocation16 + $0x3a8] sm:$0xff]  ;;  %v1890_v19 = vld [vmem:[#allocation16 + $0x3b8] sm:$0xff] }
 0x817   :  { %v1645_v15 = vmax.f32 %v1641_v2, 0.0  ;;  %v1631_v16 = vpop.f32.mrb[34].mxu1  ;;  %v1849_v2 = vld [vmem:[#allocation16 + $0x270] sm:$0xff] }
 0x818   :  { %v1652_v24 = vadd.f32 1e-05, %v1644_v9  ;;  %v1642_v26 = vsub.f32 %v1631_v16, %v1638_v4  ;;  %v1633_v30 = vpop.f32.mrb[35].mxu1  ;;  %v1852_v9 = vld [vmem:[#allocation16 + $0x288] sm:$0xff] }
 0x819   :  { %v1653_v53 = vadd.f32 1e-05, %v1645_v15  ;;  %v1643_v35 = vsub.f32 %v1633_v30, %v1639_v10  ;;  %v1854_v10 = vld [vmem:[#allocation16 + $0x298] sm:$0xff]  ;;  %v3716_v15 = vpack.c.bf16 %v1849_v2, %v1847_v1  ;;  %v1856_v30 = vld [vmem:[#allocation16 + $0x2a8] sm:$0xff]  ;;  %v1887_v1 = vld [vmem:[#allocation16 + $0x3a0] sm:$0xff] }
 0x81a   :  { %4112 = vrsqrt.f32 %v1652_v24  ;;  %v1646_v49 = vmax.f32 %v1642_v26, 0.0  ;;  %v3718_v16 = vpack.c.bf16 %v1854_v10, %v1852_v9  ;;  %v1851_v24 = vld [vmem:[#allocation16 + $0x280] sm:$0xff]  ;;  %v1853_v26 = vld [vmem:[#allocation16 + $0x290] sm:$0xff]  ;;  %v1892_v9 = vld [vmem:[#allocation16 + $0x3c8] sm:$0xff] }
 0x81b   :  { %4114 = vrsqrt.f32 %v1653_v53  ;;  %v1647_v41 = vmax.f32 %v1643_v35, 0.0  ;;  %v1858_v53 = vld [vmem:[#allocation16 + $0x2b8] sm:$0xff]  ;;  %v3720_v35 = vpack.c.bf16 %v1853_v26, %v1851_v24  ;;  %v1889_v2 = vld [vmem:[#allocation16 + $0x3b0] sm:$0xff]  ;;  %v1891_v24 = vld [vmem:[#allocation16 + $0x3c0] sm:$0xff] }
 0x81c   :  { %v1654_v20 = vadd.f32 1e-05, %v1646_v49  ;;  %v3722_v49 = vpack.c.bf16 %v1858_v53, %v1856_v30  ;;  %v1894_v10 = vld [vmem:[#allocation16 + $0x3d8] sm:$0xff]  ;;  %v1893_v26 = vld [vmem:[#allocation16 + $0x3d0] sm:$0xff]  ;;  %v1896_v30 = vld [vmem:[#allocation16 + $0x3e8] sm:$0xff] }
 0x81d   :  { %v1655_v17 = vadd.f32 1e-05, %v1647_v41  ;;  %v1855_v41 = vld [vmem:[#allocation16 + $0x2a0] sm:$0xff]  ;;  %v1898_v53 = vld [vmem:[#allocation16 + $0x3f8] sm:$0xff] }
 0x81e   :  { %4116 = vrsqrt.f32 %v1654_v20  ;;  %v1857_v20 = vld [vmem:[#allocation16 + $0x2b0] sm:$0xff] }
 0x81f   :  { %4118 = vrsqrt.f32 %v1655_v17  ;;  %v1860_v17 = vld [vmem:[#allocation16 + $0x2c8] sm:$0xff] }
 0x824   :  { %v4113_v54 = vpop.eup %4112 }
 0x825   :  { %v4115_v5 = vpop.eup %4114  ;;  %v1660_v6 = vmul.f32 %v4113_v54, %v1648_v63  ;;  %v1862_v54 = vld [vmem:[#allocation16 + $0x2d8] sm:$0xff] }
 0x826   :  { %v1661_v13 = vmul.f32 %v4115_v5, %v1649_v47  ;;  %v3724_v5 = vpack.c.bf16 %v1857_v20, %v1855_v41  ;;  %v1895_v41 = vld [vmem:[#allocation16 + $0x3e0] sm:$0xff]  ;;  %v1897_v20 = vld [vmem:[#allocation16 + $0x3f0] sm:$0xff] }
 0x827   :  { %v1668_v28 = vmul.f32 0.2, %v1660_v6  ;;  %vm1664_vm12 = vcmp.ge.f32.partialorder %v1660_v6, 0.0 }
 0x828   :  { %v4117_v14 = vpop.eup %4116  ;;  %v1669_v29 = vmul.f32 0.2, %v1661_v13  ;;  %vm1665_vm13 = vcmp.ge.f32.partialorder %v1661_v13, 0.0 }
 0x829   :  { %v4119_v23 = vpop.eup %4118  ;;  %v1662_v27 = vmul.f32 %v4117_v14, %v1650_v52  ;;  %v1672_v40 = vsel %vm1664_vm12, %v1660_v6, %v1668_v28  ;;  %v1836_v52 = vld [vmem:[#allocation16 + $0x208] sm:$0xff]  ;;  %v3726_v6 = vpack.c.bf16 %v1862_v54, %v1860_v17  ;;  %v1861_v14 = vld [vmem:[#allocation16 + $0x2d0] sm:$0xff]  ;;  %v1902_v54 = vld [vmem:[#allocation16 + $0x418] sm:$0xff] }
 0x82a   :  { %v1663_v42 = vmul.f32 %v4119_v23, %v1651_v57  ;;  %v1673_v45 = vsel %vm1665_vm13, %v1661_v13, %v1669_v29  ;;  %v3702_v57 = vpack.c.bf16 %v1838_v55, %v1836_v52  ;;  %v1859_v13 = vld [vmem:[#allocation16 + $0x2c0] sm:$0xff]  ;;  %v1864_v23 = vld [vmem:[#allocation16 + $0x2e8] sm:$0xff]  ;;  %v1873_v55 = vld [vmem:[#allocation16 + $0x330] sm:$0xff] }
 0x82b   :  { %vm1666_vm14 = vcmp.ge.f32.partialorder %v1662_v27, 0.0  ;;  %v1670_v39 = vmul.f32 0.2, %v1662_v27  ;;  %v3728_v28 = vpack.c.bf16 %v1861_v14, %v1859_v13  ;;  %v1863_v29 = vld [vmem:[#allocation16 + $0x2e0] sm:$0xff]  ;;  %v1900_v17 = vld [vmem:[#allocation16 + $0x408] sm:$0xff]  ;;  %v1901_v14 = vld [vmem:[#allocation16 + $0x410] sm:$0xff] }
 0x82c   :  { %vm1667_vm15 = vcmp.ge.f32.partialorder %v1663_v42, 0.0  ;;  %v1671_v44 = vmul.f32 0.2, %v1663_v42  ;;  %3703 = vmatprep.subr.bf16.mxu1 %v3702_v57  ;;  %v1871_v52 = vld [vmem:[#allocation16 + $0x320] sm:$0xff]  ;;  %v1876_v57 = vld [vmem:[#allocation16 + $0x348] sm:$0xff] }
 0x82d   :  { %v1674_v63 = vsel %vm1666_vm14, %v1662_v27, %v1670_v39  ;;  %v1866_v27 = vld [vmem:[#allocation16 + $0x2f8] sm:$0xff]  ;;  %v1865_v39 = vld [vmem:[#allocation16 + $0x2f0] sm:$0xff]  ;;  %v3740_v34 = vpack.c.bf16 %v1873_v55, %v1871_v52  ;;  %v3742_v36 = vpack.c.bf16 %v1878_v33, %v1876_v57  ;;  %v1899_v13 = vld [vmem:[#allocation16 + $0x400] sm:$0xff] }
 0x82e   :  { %v1675_v47 = vsel %vm1667_vm15, %v1663_v42, %v1671_v44  ;;  %v3636_v31 = vpack.c.bf16 %v1674_v63, %v1672_v40  ;;  %v3730_v42 = vpack.c.bf16 %v1866_v27, %v1864_v23  ;;  %v1868_v44 = vld [vmem:[#allocation16 + $0x308] sm:$0xff]  ;;  %v1870_v40 = vld [vmem:[#allocation16 + $0x318] sm:$0xff]  ;;  %v3732_v63 = vpack.c.bf16 %v1865_v39, %v1863_v29  ;;  %v1903_v29 = vld [vmem:[#allocation16 + $0x420] sm:$0xff] }
 0x82f   :  { %v3634_v32 = vpack.c.bf16 %v1675_v47, %v1673_v45  ;;  %v3734_v45 = vpack.c.bf16 %v1870_v40, %v1868_v44  ;;  %v1867_v47 = vld [vmem:[#allocation16 + $0x300] sm:$0xff]  ;;  %v1904_v23 = vld [vmem:[#allocation16 + $0x428] sm:$0xff]  ;;  %v1906_v27 = vld [vmem:[#allocation16 + $0x438] sm:$0xff] }
 0x830   :  { %v1905_v39 = vld [vmem:[#allocation16 + $0x430] sm:$0xff]  ;;  %v1908_v44 = vld [vmem:[#allocation16 + $0x448] sm:$0xff]  ;;  %v1910_v40 = vld [vmem:[#allocation16 + $0x458] sm:$0xff] }
 0x831   :  { %3635 = vmatprep.subr.bf16.mxu0 %v3634_v32  ;;  %v1872_v32 = vld [vmem:[#allocation16 + $0x328] sm:$0xff]  ;;  %v1911_v52 = vld [vmem:[#allocation16 + $0x460] sm:$0xff]  ;;  %v1913_v55 = vld [vmem:[#allocation16 + $0x470] sm:$0xff] }
 0x832   :  { %3637 = vmatpush1.bf16.msra.mxu0 %v3636_v31  ;;  %v1869_v31 = vld [vmem:[#allocation16 + $0x310] sm:$0xff]  ;;  %v1916_v57 = vld [vmem:[#allocation16 + $0x488] sm:$0xff]  ;;  %v1918_v33 = vld [vmem:[#allocation16 + $0x498] sm:$0xff] }
 0x835   :  { %2996 = vmatmul.mubr.msk.f32.vlgmr.msra.gmra.mrb[28].mxu0 %vm1253_vm11, %v1676_v43  ;;  %v1874_v43 = vld [vmem:[#allocation16 + $0x338] sm:$0xff] }
 0x836   :  { %1758 = vmatprep.mubr.f32.mxu0 %v4445_v59 }
 0x839   :  { %2997 = vmatmul.mubr.msk.f32.gmra.mrb[30].mxu0 %vm1253_vm11, %v1677_v3  ;;  %v3736_v3 = vpack.c.bf16 %v1869_v31, %v1867_v47  ;;  %v1907_v47 = vld [vmem:[#allocation16 + $0x440] sm:$0xff]  ;;  %v1909_v31 = vld [vmem:[#allocation16 + $0x450] sm:$0xff] }
 0x83a   :  { %1764 = vmatprep.mubr.f32.mxu0 %v4445_v59 }
 0x83d   :  { %2998 = vmatmul.mubr.msk.f32.gmra.mrb[32].mxu0 %vm1253_vm11, %v1678_v48  ;;  %v3738_v48 = vpack.c.bf16 %v1874_v43, %v1872_v32  ;;  %v1912_v32 = vld [vmem:[#allocation16 + $0x468] sm:$0xff]  ;;  %v1914_v43 = vld [vmem:[#allocation16 + $0x478] sm:$0xff] }
 0x83e   :  { %2245 = vmatprep.mubr.f32.mxu0 %v4445_v59 }
 0x908   :  { %v1754_v60 = vpop.f32.mrb[28].mxu0 }
 0x909   :  { %v1756_v56 = vpop.f32.mrb[29].mxu0 }
 0x90a   :  { %2027 = vmatprep.mubr.f32.mxu1 %v1756_v56  ;;  %v1882_v56 = vld [vmem:[#allocation16 + $0x378] sm:$0xff] }
 0x90b   :  { %2028 = vmatmul.mubr.f32.vlgmr.msra.gmra.mrb[36].mxu1 %v1754_v60  ;;  %v1877_v60 = vld [vmem:[#allocation16 + $0x350] sm:$0xff] }
 0x90c   :  { %3705 = vmatpush1.bf16.msra.mxu1 %v3704_v38  ;;  %v5019_v0 = vpop.f32.mrb[30].mxu0  ;;  %v1880_v38 = vld [vmem:[#allocation16 + $0x368] sm:$0xff] }
 0x90d   :  { %3707 = vmatprep.subr.bf16.mxu1 %v3706_v46  ;;  %v1762_v12 = vpop.f32.mrb[31].mxu0  ;;  %v3744_v46 = vpack.c.bf16 %v1877_v60, %v1875_v37  ;;  %v3746_v50 = vpack.c.bf16 %v1882_v56, %v1880_v38  ;;  %v1920_v37 = vld [vmem:[#allocation16 + $0x4a8] sm:$0xff]  ;;  %v1922_v60 = vld [vmem:[#allocation16 + $0x4b8] sm:$0xff] }
 0x90e   :  { %2098 = vmatprep.mubr.f32.mxu1 %v1762_v12  ;;  %v1885_v12 = vld [vmem:[#allocation16 + $0x390] sm:$0xff]  ;;  %v3786_v56 = vpack.c.bf16 %v1922_v60, %v1920_v37 }
 0x910   :  { %3709 = vmatpush1.bf16.msra.mxu1 %v3708_v22  ;;  %v5021_v25 = vpop.f32.mrb[32].mxu0  ;;  %v1886_v22 = vld [vmem:[#allocation16 + $0x398] sm:$0xff] }
 0x911   :  { %3711 = vmatprep.subr.bf16.mxu1 %v3710_v7  ;;  %v5023_v4 = vpop.f32.mrb[33].mxu0  ;;  %v3748_v7 = vpack.c.bf16 %v1881_v61, %v1879_v51  ;;  %v3750_v8 = vpack.c.bf16 %v1886_v22, %v1884_v62  ;;  %v1924_v51 = vld [vmem:[#allocation16 + $0x4c8] sm:$0xff]  ;;  %v1926_v61 = vld [vmem:[#allocation16 + $0x4d8] sm:$0xff] }
 0x912   :  { %v3790_v22 = vpack.c.bf16 %v1926_v61, %v1924_v51  ;;  %v2255_v51 = vld [vmem:[#allocation19 + $0x18] sm:$0xff]  ;;  %v2252_v61 = vld [vmem:[#allocation19] sm:$0xff] }
 0x914   :  { %3713 = vmatpush1.bf16.msra.mxu1 %v3712_v21  ;;  %v3752_v21 = vpack.c.bf16 %v1885_v12, %v1883_v11  ;;  %v1928_v11 = vld [vmem:[#allocation16 + $0x4e8] sm:$0xff]  ;;  %v1930_v12 = vld [vmem:[#allocation16 + $0x4f8] sm:$0xff] }
 0x915   :  { %3715 = vmatprep.subr.bf16.mxu1 %v3714_v58  ;;  %v3754_v58 = vpack.c.bf16 %v1890_v19, %v1888_v18  ;;  %v3794_v19 = vpack.c.bf16 %v1930_v12, %v1928_v11 }
 0x918   :  { %3717 = vmatpush1.bf16.msra.mxu1 %v3716_v15  ;;  %v3756_v15 = vpack.c.bf16 %v1889_v2, %v1887_v1  ;;  %v1932_v1 = vld [vmem:[#allocation16 + $0x508] sm:$0xff]  ;;  %v1934_v2 = vld [vmem:[#allocation16 + $0x518] sm:$0xff] }
 0x919   :  { %3719 = vmatprep.subr.bf16.mxu1 %v3718_v16  ;;  %v3758_v16 = vpack.c.bf16 %v1894_v10, %v1892_v9  ;;  %v3798_v10 = vpack.c.bf16 %v1934_v2, %v1932_v1  ;;  %v2261_v1 = vld [vmem:[#allocation19 + $0x48] sm:$0xff]  ;;  %v2263_v2 = vld [vmem:[#allocation19 + $0x58] sm:$0xff] }
 0x91c   :  { %3721 = vmatpush1.bf16.msra.mxu1 %v3720_v35  ;;  %v3760_v35 = vpack.c.bf16 %v1893_v26, %v1891_v24  ;;  %v1936_v24 = vld [vmem:[#allocation16 + $0x528] sm:$0xff]  ;;  %v1938_v26 = vld [vmem:[#allocation16 + $0x538] sm:$0xff] }
 0x91d   :  { %3723 = vmatprep.subr.bf16.mxu1 %v3722_v49  ;;  %v3762_v49 = vpack.c.bf16 %v1898_v53, %v1896_v30  ;;  %v3802_v53 = vpack.c.bf16 %v1938_v26, %v1936_v24  ;;  %v2265_v24 = vld [vmem:[#allocation19 + $0x68] sm:$0xff]  ;;  %v2267_v26 = vld [vmem:[#allocation19 + $0x78] sm:$0xff] }
 0x920   :  { %3725 = vmatpush1.bf16.msra.mxu1 %v3724_v5  ;;  %v3764_v5 = vpack.c.bf16 %v1897_v20, %v1895_v41  ;;  %v1940_v41 = vld [vmem:[#allocation16 + $0x548] sm:$0xff]  ;;  %v1942_v20 = vld [vmem:[#allocation16 + $0x558] sm:$0xff] }
 0x921   :  { %3727 = vmatprep.subr.bf16.mxu1 %v3726_v6  ;;  %v3766_v6 = vpack.c.bf16 %v1902_v54, %v1900_v17  ;;  %v3806_v54 = vpack.c.bf16 %v1942_v20, %v1940_v41  ;;  %v2269_v41 = vld [vmem:[#allocation19 + $0x88] sm:$0xff]  ;;  %v2271_v20 = vld [vmem:[#allocation19 + $0x98] sm:$0xff] }
 0x924   :  { %3729 = vmatpush1.bf16.msra.mxu1 %v3728_v28  ;;  %v3768_v28 = vpack.c.bf16 %v1901_v14, %v1899_v13  ;;  %v1944_v13 = vld [vmem:[#allocation16 + $0x568] sm:$0xff]  ;;  %v1946_v14 = vld [vmem:[#allocation16 + $0x578] sm:$0xff] }
 0x925   :  { %3731 = vmatprep.subr.bf16.mxu1 %v3730_v42  ;;  %v3770_v42 = vpack.c.bf16 %v1906_v27, %v1904_v23  ;;  %v3810_v27 = vpack.c.bf16 %v1946_v14, %v1944_v13  ;;  %v2273_v13 = vld [vmem:[#allocation19 + $0xa8] sm:$0xff]  ;;  %v2275_v14 = vld [vmem:[#allocation19 + $0xb8] sm:$0xff] }
 0x928   :  { %3733 = vmatpush1.bf16.msra.mxu1 %v3732_v63  ;;  %v3772_v63 = vpack.c.bf16 %v1905_v39, %v1903_v29  ;;  %v1948_v29 = vld [vmem:[#allocation16 + $0x588] sm:$0xff]  ;;  %v1950_v39 = vld [vmem:[#allocation16 + $0x598] sm:$0xff] }
 0x929   :  { %3735 = vmatprep.subr.bf16.mxu1 %v3734_v45  ;;  %v3774_v45 = vpack.c.bf16 %v1910_v40, %v1908_v44  ;;  %v3814_v40 = vpack.c.bf16 %v1950_v39, %v1948_v29  ;;  %v2277_v29 = vld [vmem:[#allocation19 + $0xc8] sm:$0xff]  ;;  %v2279_v39 = vld [vmem:[#allocation19 + $0xd8] sm:$0xff] }
 0x92c   :  { %3737 = vmatpush1.bf16.msra.mxu1 %v3736_v3  ;;  %v3776_v3 = vpack.c.bf16 %v1909_v31, %v1907_v47  ;;  %v1952_v47 = vld [vmem:[#allocation16 + $0x5a8] sm:$0xff]  ;;  %v1954_v31 = vld [vmem:[#allocation16 + $0x5b8] sm:$0xff] }
 0x92d   :  { %3739 = vmatprep.subr.bf16.mxu1 %v3738_v48  ;;  %v3778_v48 = vpack.c.bf16 %v1914_v43, %v1912_v32  ;;  %v3818_v43 = vpack.c.bf16 %v1954_v31, %v1952_v47  ;;  %v2281_v47 = vld [vmem:[#allocation19 + $0xe8] sm:$0xff]  ;;  %v2283_v31 = vld [vmem:[#allocation19 + $0xf8] sm:$0xff] }
 0x930   :  { %3741 = vmatpush1.bf16.msra.mxu1 %v3740_v34  ;;  %v3782_v34 = vpack.c.bf16 %v1918_v33, %v1916_v57 }
 0x931   :  { %3743 = vmatprep.subr.bf16.mxu1 %v3742_v36  ;;  %v1915_v36 = vld [vmem:[#allocation16 + $0x480] sm:$0xff] }
 0x934   :  { %3745 = vmatpush1.bf16.msra.mxu1 %v3744_v46  ;;  %v1919_v46 = vld [vmem:[#allocation16 + $0x4a0] sm:$0xff] }
 0x935   :  { %3747 = vmatprep.subr.bf16.mxu1 %v3746_v50  ;;  %v1921_v50 = vld [vmem:[#allocation16 + $0x4b0] sm:$0xff] }
 0x936   :  { %v3788_v62 = vpack.c.bf16 %v1921_v50, %v1919_v46  ;;  %v2253_v50 = vld [vmem:[#allocation19 + $0x8] sm:$0xff] }
 0x937   :  { %v5030_v11 = vpack.c.bf16 %v2255_v51, %v2253_v50  ;;  %v2295_v50 = vld [vmem:[#allocation19 + $0x158] sm:$0xff] }
 0x938   :  { %3749 = vmatpush1.bf16.msra.mxu1 %v3748_v7  ;;  %v1923_v7 = vld [vmem:[#allocation16 + $0x4c0] sm:$0xff] }
 0x939   :  { %3751 = vmatprep.subr.bf16.mxu1 %v3750_v8  ;;  %v1925_v8 = vld [vmem:[#allocation16 + $0x4d0] sm:$0xff] }
 0x93a   :  { %v3792_v18 = vpack.c.bf16 %v1925_v8, %v1923_v7  ;;  %v2259_v7 = vld [vmem:[#allocation19 + $0x38] sm:$0xff] }
 0x93c   :  { %3753 = vmatpush1.bf16.msra.mxu1 %v3752_v21  ;;  %v1927_v21 = vld [vmem:[#allocation16 + $0x4e0] sm:$0xff] }
 0x93d   :  { %3755 = vmatprep.subr.bf16.mxu1 %v3754_v58  ;;  %v1929_v58 = vld [vmem:[#allocation16 + $0x4f0] sm:$0xff] }
 0x93e   :  { %v3796_v9 = vpack.c.bf16 %v1929_v58, %v1927_v21  ;;  %v2256_v21 = vld [vmem:[#allocation19 + $0x20] sm:$0xff]  ;;  %v2258_v58 = vld [vmem:[#allocation19 + $0x30] sm:$0xff] }
 0x940   :  { %3757 = vmatpush1.bf16.msra.mxu1 %v3756_v15  ;;  %v1931_v15 = vld [vmem:[#allocation16 + $0x500] sm:$0xff] }
 0x941   :  { %3759 = vmatprep.subr.bf16.mxu1 %v3758_v16  ;;  %v1933_v16 = vld [vmem:[#allocation16 + $0x510] sm:$0xff] }
 0x942   :  { %v3800_v30 = vpack.c.bf16 %v1933_v16, %v1931_v15  ;;  %v2260_v15 = vld [vmem:[#allocation19 + $0x40] sm:$0xff]  ;;  %v2262_v16 = vld [vmem:[#allocation19 + $0x50] sm:$0xff] }
 0x944   :  { %3761 = vmatpush1.bf16.msra.mxu1 %v3760_v35  ;;  %v1935_v35 = vld [vmem:[#allocation16 + $0x520] sm:$0xff] }
 0x945   :  { %3763 = vmatprep.subr.bf16.mxu1 %v3762_v49  ;;  %v1937_v49 = vld [vmem:[#allocation16 + $0x530] sm:$0xff] }
 0x946   :  { %v3804_v17 = vpack.c.bf16 %v1937_v49, %v1935_v35  ;;  %v2264_v35 = vld [vmem:[#allocation19 + $0x60] sm:$0xff]  ;;  %v2266_v49 = vld [vmem:[#allocation19 + $0x70] sm:$0xff] }
 0x948   :  { %3765 = vmatpush1.bf16.msra.mxu1 %v3764_v5  ;;  %v1939_v5 = vld [vmem:[#allocation16 + $0x540] sm:$0xff] }
 0x949   :  { %3767 = vmatprep.subr.bf16.mxu1 %v3766_v6  ;;  %v1941_v6 = vld [vmem:[#allocation16 + $0x550] sm:$0xff] }
 0x94a   :  { %v3808_v23 = vpack.c.bf16 %v1941_v6, %v1939_v5  ;;  %v2268_v5 = vld [vmem:[#allocation19 + $0x80] sm:$0xff]  ;;  %v2270_v6 = vld [vmem:[#allocation19 + $0x90] sm:$0xff] }
 0x94b   :  { %2099 = vmatmul.mubr.f32.vlgmr.msra.gmra.mrb[36].mxu1 %v5019_v0  ;;  %v3780_v0 = vpack.c.bf16 %v1913_v55, %v1911_v52  ;;  %v1956_v52 = vld [vmem:[#allocation16 + $0x5c8] sm:$0xff]  ;;  %v1958_v55 = vld [vmem:[#allocation16 + $0x5d8] sm:$0xff] }
 0x94c   :  { %3769 = vmatpush1.bf16.msra.mxu1 %v3768_v28  ;;  %2169 = vmatprep.mubr.f32.mxu1 %v5023_v4  ;;  %v1917_v4 = vld [vmem:[#allocation16 + $0x490] sm:$0xff]  ;;  %v1943_v28 = vld [vmem:[#allocation16 + $0x560] sm:$0xff]  ;;  %v3822_v33 = vpack.c.bf16 %v1958_v55, %v1956_v52 }
 0x94d   :  { %3771 = vmatprep.subr.bf16.mxu1 %v3770_v42  ;;  %v3784_v38 = vpack.c.bf16 %v1917_v4, %v1915_v36  ;;  %v1945_v42 = vld [vmem:[#allocation16 + $0x570] sm:$0xff]  ;;  %v1960_v36 = vld [vmem:[#allocation16 + $0x5e8] sm:$0xff]  ;;  %v1962_v4 = vld [vmem:[#allocation16 + $0x5f8] sm:$0xff] }
 0x94e   :  { %v3812_v44 = vpack.c.bf16 %v1945_v42, %v1943_v28  ;;  %v3826_v60 = vpack.c.bf16 %v1962_v4, %v1960_v36  ;;  %v2272_v28 = vld [vmem:[#allocation19 + $0xa0] sm:$0xff]  ;;  %v2274_v42 = vld [vmem:[#allocation19 + $0xb0] sm:$0xff]  ;;  %v2285_v52 = vld [vmem:[#allocation19 + $0x108] sm:$0xff] }
 0x94f   :  { %v2287_v55 = vld [vmem:[#allocation19 + $0x118] sm:$0xff]  ;;  %v2289_v36 = vld [vmem:[#allocation19 + $0x128] sm:$0xff] }
 0x950   :  { %3773 = vmatpush1.bf16.msra.mxu1 %v3772_v63  ;;  %v1947_v63 = vld [vmem:[#allocation16 + $0x580] sm:$0xff] }
 0x951   :  { %3775 = vmatprep.subr.bf16.mxu1 %v3774_v45  ;;  %v1949_v45 = vld [vmem:[#allocation16 + $0x590] sm:$0xff]  ;;  %v2291_v4 = vld [vmem:[#allocation19 + $0x138] sm:$0xff] }
 0x952   :  { %v3816_v32 = vpack.c.bf16 %v1949_v45, %v1947_v63  ;;  %v2276_v63 = vld [vmem:[#allocation19 + $0xc0] sm:$0xff]  ;;  %v2278_v45 = vld [vmem:[#allocation19 + $0xd0] sm:$0xff] }
 0x954   :  { %3777 = vmatpush1.bf16.msra.mxu1 %v3776_v3  ;;  %v1951_v3 = vld [vmem:[#allocation16 + $0x5a0] sm:$0xff] }
 0x955   :  { %3779 = vmatprep.subr.bf16.mxu1 %v3778_v48  ;;  %v1953_v48 = vld [vmem:[#allocation16 + $0x5b0] sm:$0xff] }
 0x956   :  { %v3820_v57 = vpack.c.bf16 %v1953_v48, %v1951_v3  ;;  %v2280_v3 = vld [vmem:[#allocation19 + $0xe0] sm:$0xff]  ;;  %v2282_v48 = vld [vmem:[#allocation19 + $0xf0] sm:$0xff] }
 0x958   :  { %3781 = vmatpush1.bf16.msra.mxu1 %v3780_v0  ;;  %v1955_v0 = vld [vmem:[#allocation16 + $0x5c0] sm:$0xff] }
 0x959   :  { %3783 = vmatprep.subr.bf16.mxu1 %v3782_v34  ;;  %v1957_v34 = vld [vmem:[#allocation16 + $0x5d0] sm:$0xff] }
 0x95a   :  { %v3824_v37 = vpack.c.bf16 %v1957_v34, %v1955_v0  ;;  %v2284_v0 = vld [vmem:[#allocation19 + $0x100] sm:$0xff]  ;;  %v2286_v34 = vld [vmem:[#allocation19 + $0x110] sm:$0xff] }
 0x95c   :  { %3785 = vmatpush1.bf16.msra.mxu1 %v3784_v38  ;;  %v1959_v38 = vld [vmem:[#allocation16 + $0x5e0] sm:$0xff] }
 0x95d   :  { %3787 = vmatprep.subr.bf16.mxu1 %v3786_v56  ;;  %v1961_v56 = vld [vmem:[#allocation16 + $0x5f0] sm:$0xff] }
 0x95e   :  { %v3828_v46 = vpack.c.bf16 %v1961_v56, %v1959_v38  ;;  %v2288_v38 = vld [vmem:[#allocation19 + $0x120] sm:$0xff]  ;;  %v2290_v56 = vld [vmem:[#allocation19 + $0x130] sm:$0xff] }
 0x95f   :  { %v5094_v51 = vpack.c.bf16 %v2290_v56, %v2288_v38 }
 0x960   :  { %3789 = vmatpush1.bf16.msra.mxu1 %v3788_v62  ;;  %v2254_v62 = vld [vmem:[#allocation19 + $0x10] sm:$0xff] }
 0x961   :  { %3791 = vmatprep.subr.bf16.mxu1 %v3790_v22  ;;  %v2257_v22 = vld [vmem:[#allocation19 + $0x28] sm:$0xff] }
 0x964   :  { %3793 = vmatpush1.bf16.msra.mxu1 %v3792_v18  ;;  %v5034_v18 = vld [vmem:[#allocation17] sm:$0xff] }
 0x965   :  { %3795 = vmatprep.subr.bf16.mxu1 %v3794_v19  ;;  %v5036_v19 = vpack.c.bf16 %v2254_v62, %v2252_v61  ;;  %v2292_v62 = vld [vmem:[#allocation19 + $0x140] sm:$0xff] }
 0x968   :  { %3797 = vmatpush1.bf16.msra.mxu1 %v3796_v9  ;;  %v5046_v9 = vpack.c.bf16 %v2258_v58, %v2256_v21  ;;  %v2299_v21 = vld [vmem:[#allocation19 + $0x178] sm:$0xff] }
 0x969   :  { %3799 = vmatprep.subr.bf16.mxu1 %v3798_v10  ;;  %v5049_v10 = vpack.c.bf16 %v2263_v2, %v2261_v1  ;;  %v2296_v2 = vld [vmem:[#allocation19 + $0x160] sm:$0xff] }
 0x96c   :  { %3801 = vmatpush1.bf16.msra.mxu1 %v3800_v30  ;;  %v5052_v30 = vpack.c.bf16 %v2262_v16, %v2260_v15  ;;  %v2298_v15 = vld [vmem:[#allocation19 + $0x170] sm:$0xff]  ;;  %v2301_v16 = vld [vmem:[#allocation19 + $0x188] sm:$0xff] }
 0x96d   :  { %3803 = vmatprep.subr.bf16.mxu1 %v3802_v53  ;;  %v5055_v53 = vpack.c.bf16 %v2267_v26, %v2265_v24  ;;  %v2303_v24 = vld [vmem:[#allocation19 + $0x198] sm:$0xff]  ;;  %v5106_v26 = vpack.c.bf16 %v2298_v15, %v2296_v2 }
 0x970   :  { %3805 = vmatpush1.bf16.msra.mxu1 %v3804_v17  ;;  %v5058_v17 = vpack.c.bf16 %v2266_v49, %v2264_v35  ;;  %v5109_v35 = vpack.c.bf16 %v2303_v24, %v2301_v16  ;;  %v2300_v49 = vld [vmem:[#allocation19 + $0x180] sm:$0xff]  ;;  %v2648_v16 = vld [vmem:[#allocation20 + $0x10] sm:$0xff]  ;;  %v2649_v24 = vld [vmem:[#allocation20 + $0x18] sm:$0xff] }
 0x971   :  { %3807 = vmatprep.subr.bf16.mxu1 %v3806_v54  ;;  %v5061_v54 = vpack.c.bf16 %v2271_v20, %v2269_v41  ;;  %v2302_v41 = vld [vmem:[#allocation19 + $0x190] sm:$0xff]  ;;  %v2305_v20 = vld [vmem:[#allocation19 + $0x1a8] sm:$0xff] }
 0x974   :  { %3809 = vmatpush1.bf16.msra.mxu1 %v3808_v23  ;;  %v5064_v23 = vpack.c.bf16 %v2270_v6, %v2268_v5  ;;  %v2307_v5 = vld [vmem:[#allocation19 + $0x1b8] sm:$0xff]  ;;  %v3880_v6 = vpack.c.bf16 %v2302_v41, %v2300_v49  ;;  %v3964_v41 = vpack.c.bf16 %v2649_v24, %v2648_v16  ;;  %v2716_v24 = vld [vmem:[#allocation20 + $0x230] sm:$0xff] }
 0x975   :  { %3811 = vmatprep.subr.bf16.mxu1 %v3810_v27  ;;  %v5067_v27 = vpack.c.bf16 %v2275_v14, %v2273_v13  ;;  %v3882_v13 = vpack.c.bf16 %v2307_v5, %v2305_v20  ;;  %v2304_v14 = vld [vmem:[#allocation19 + $0x1a0] sm:$0xff] }
 0x976   :  { %v2552_v49 = vld [vmem:[%s5189_s12 + $0x8] sm:$0xff] }
 0x977   :  { %v2650_v5 = vld [vmem:[#allocation20 + $0x20] sm:$0xff] }
 0x978   :  { %3813 = vmatpush1.bf16.msra.mxu1 %v3812_v44  ;;  %v5070_v44 = vpack.c.bf16 %v2274_v42, %v2272_v28  ;;  %v2306_v28 = vld [vmem:[#allocation19 + $0x1b0] sm:$0xff]  ;;  %v2309_v42 = vld [vmem:[#allocation19 + $0x1c8] sm:$0xff] }
 0x979   :  { %3815 = vmatprep.subr.bf16.mxu1 %v3814_v40  ;;  %v5073_v40 = vpack.c.bf16 %v2279_v39, %v2277_v29  ;;  %v2311_v29 = vld [vmem:[#allocation19 + $0x1d8] sm:$0xff]  ;;  %v3884_v39 = vpack.c.bf16 %v2306_v28, %v2304_v14  ;;  %v2553_v28 = vld [vmem:[%s5189_s12 + $0x10] sm:$0xff] }
 0x97a   :  { %v2669_v14 = vld [vmem:[#allocation20 + $0xb8] sm:$0xff] }
 0x97c   :  { %3817 = vmatpush1.bf16.msra.mxu1 %v3816_v32  ;;  %v5076_v32 = vpack.c.bf16 %v2278_v45, %v2276_v63  ;;  %v3886_v63 = vpack.c.bf16 %v2311_v29, %v2309_v42  ;;  %v2308_v45 = vld [vmem:[#allocation19 + $0x1c0] sm:$0xff] }
 0x97d   :  { %3819 = vmatprep.subr.bf16.mxu1 %v3818_v43  ;;  %v5079_v43 = vpack.c.bf16 %v2283_v31, %v2281_v47  ;;  %v2310_v47 = vld [vmem:[#allocation19 + $0x1d0] sm:$0xff]  ;;  %v2313_v31 = vld [vmem:[#allocation19 + $0x1e8] sm:$0xff] }
 0x980   :  { %3821 = vmatpush1.bf16.msra.mxu1 %v3820_v57  ;;  %v5082_v57 = vpack.c.bf16 %v2282_v48, %v2280_v3  ;;  %v2315_v3 = vld [vmem:[#allocation19 + $0x1f8] sm:$0xff]  ;;  %v3888_v48 = vpack.c.bf16 %v2310_v47, %v2308_v45  ;;  %v2670_v45 = vld [vmem:[#allocation20 + $0xc0] sm:$0xff]  ;;  %v2671_v47 = vld [vmem:[#allocation20 + $0xc8] sm:$0xff] }
 0x981   :  { %3823 = vmatprep.subr.bf16.mxu1 %v3822_v33  ;;  %v5085_v33 = vpack.c.bf16 %v2287_v55, %v2285_v52  ;;  %v3890_v52 = vpack.c.bf16 %v2315_v3, %v2313_v31  ;;  %v2312_v55 = vld [vmem:[#allocation19 + $0x1e0] sm:$0xff]  ;;  %v3974_v3 = vpack.c.bf16 %v2671_v47, %v2670_v45  ;;  %v2739_v47 = vld [vmem:[#allocation20 + $0x2e8] sm:$0xff] }
 0x982   :  { %v2738_v45 = vld [vmem:[#allocation20 + $0x2e0] sm:$0xff] }
 0x984   :  { %3825 = vmatpush1.bf16.msra.mxu1 %v3824_v37  ;;  %v5088_v37 = vpack.c.bf16 %v2286_v34, %v2284_v0  ;;  %v2314_v0 = vld [vmem:[#allocation19 + $0x1f0] sm:$0xff] }
 0x985   :  { %3827 = vmatprep.subr.bf16.mxu1 %v3826_v60  ;;  %v5091_v60 = vpack.c.bf16 %v2291_v4, %v2289_v36  ;;  %v3892_v34 = vpack.c.bf16 %v2314_v0, %v2312_v55  ;;  %v2673_v55 = vld [vmem:[#allocation20 + $0xd8] sm:$0xff] }
 0x988   :  { %3829 = vmatpush1.bf16.msra.mxu1 %v3828_v46  ;;  %v2293_v46 = vld [vmem:[#allocation19 + $0x148] sm:$0xff] }
 0x989   :  { %v5097_v61 = vpack.c.bf16 %v2295_v50, %v2293_v46  ;;  %v2646_v50 = vld [vmem:[#allocation20] sm:$0xff] }
 0x98b   :  { %2170 = vmatmul.mubr.f32.vlgmr.msra.gmra.mrb[36].mxu1 %v5021_v25  ;;  %v5039_v25 = vpack.c.bf16 %v2259_v7, %v2257_v22  ;;  %v2294_v22 = vld [vmem:[#allocation19 + $0x150] sm:$0xff]  ;;  %v2297_v7 = vld [vmem:[#allocation19 + $0x168] sm:$0xff] }
 0x98c   :  { %v5100_v58 = vpack.c.bf16 %v2294_v22, %v2292_v62  ;;  %v5103_v1 = vpack.c.bf16 %v2299_v21, %v2297_v7  ;;  %v2664_v62 = vld [vmem:[#allocation20 + $0x90] sm:$0xff]  ;;  %v2665_v22 = vld [vmem:[#allocation20 + $0x98] sm:$0xff] }
 0x98d   :  { %v3962_v15 = vpack.c.bf16 %v2665_v22, %v2664_v62  ;;  %v2730_v62 = vld [vmem:[#allocation20 + $0x2a0] sm:$0xff]  ;;  %v2731_v22 = vld [vmem:[#allocation20 + $0x2a8] sm:$0xff] }
 0xa5e   :  { %v5028_v8 = vpop.f32.mrb[36].mxu1 }
 0xa5f   :  { %v5032_v12 = vpop.f32.mrb[37].mxu1  ;;  %v2387_v56 = vmul.f32 %v5028_v8, %v5028_v8 }
 0xa60   :  { %2181 = vmatprep.subr.mxu0 %v5032_v12  ;;  %v2388_v36 = vmul.f32 %v5032_v12, %v5032_v12 }
 0xa61   :  { %2182 = vmatpush1.msra.mxu0 %v5028_v8 }
 0xa62   :  { %2999 = vmatmul.mubr.msk.f32.vlgmr.msra.gmra.mrb[34].mxu0 %vm2177_vm0, %v5034_v18  ;;  %3831 = vmatprep.subr.bf16.mxu0 %v5030_v11 }
 0xa63   :  { %3833 = vmatpush1.bf16.msra.mxu0 %v5036_v19 }
 0xa64   :  { %3835 = vmatprep.subr.bf16.mxu0 %v5039_v25 }
 0xa67   :  { %3837 = vmatpush1.bf16.msra.mxu0 %v5046_v9 }
 0xa68   :  { %3839 = vmatprep.subr.bf16.mxu0 %v5049_v10 }
 0xa6b   :  { %3841 = vmatpush1.bf16.msra.mxu0 %v5052_v30 }
 0xa6c   :  { %3843 = vmatprep.subr.bf16.mxu0 %v5055_v53 }
 0xa6f   :  { %3845 = vmatpush1.bf16.msra.mxu0 %v5058_v17 }
 0xa70   :  { %3847 = vmatprep.subr.bf16.mxu0 %v5061_v54 }
 0xa73   :  { %3849 = vmatpush1.bf16.msra.mxu0 %v5064_v23 }
 0xa74   :  { %3851 = vmatprep.subr.bf16.mxu0 %v5067_v27 }
 0xa77   :  { %3853 = vmatpush1.bf16.msra.mxu0 %v5070_v44 }
 0xa78   :  { %3855 = vmatprep.subr.bf16.mxu0 %v5073_v40 }
 0xa7b   :  { %3857 = vmatpush1.bf16.msra.mxu0 %v5076_v32 }
 0xa7c   :  { %3859 = vmatprep.subr.bf16.mxu0 %v5079_v43 }
 0xa7f   :  { %3861 = vmatpush1.bf16.msra.mxu0 %v5082_v57 }
 0xa80   :  { %3863 = vmatprep.subr.bf16.mxu0 %v5085_v33 }
 0xa83   :  { %3865 = vmatpush1.bf16.msra.mxu0 %v5088_v37 }
 0xa84   :  { %3867 = vmatprep.subr.bf16.mxu0 %v5091_v60 }
 0xa87   :  { %3869 = vmatpush1.bf16.msra.mxu0 %v5094_v51 }
 0xa88   :  { %3871 = vmatprep.subr.bf16.mxu0 %v5097_v61 }
 0xa8b   :  { %3873 = vmatpush1.bf16.msra.mxu0 %v5100_v58 }
 0xa8c   :  { %3875 = vmatprep.subr.bf16.mxu0 %v5103_v1 }
 0xa8f   :  { %3877 = vmatpush1.bf16.msra.mxu0 %v5106_v26 }
 0xa90   :  { %3879 = vmatprep.subr.bf16.mxu0 %v5109_v35 }
 0xa93   :  { %3881 = vmatpush1.bf16.msra.mxu0 %v3880_v6 }
 0xa94   :  { %3883 = vmatprep.subr.bf16.mxu0 %v3882_v13 }
 0xa97   :  { %3885 = vmatpush1.bf16.msra.mxu0 %v3884_v39 }
 0xa98   :  { %3887 = vmatprep.subr.bf16.mxu0 %v3886_v63 }
 0xa9b   :  { %3889 = vmatpush1.bf16.msra.mxu0 %v3888_v48 }
 0xa9c   :  { %3891 = vmatprep.subr.bf16.mxu0 %v3890_v52 }
 0xa9f   :  { %3893 = vmatpush1.bf16.msra.mxu0 %v3892_v34 }
 0xaa0   :  { %2389 = vmatprep.subr.mxu0 %v2388_v36  ;;  %v2656_v36 = vld [vmem:[#allocation20 + $0x50] sm:$0xff] }
 0xb35   :  { %v2247_v4 = vpop.f32.mrb[34].mxu0 }
 0xb36   :  { %v2249_v38 = vpop.f32.mrb[35].mxu0 }
 0xb37   :  { %2380 = vmatprep.mubr.f32.mxu0 %v2249_v38  ;;  %v2674_v38 = vld [vmem:[#allocation20 + $0xe0] sm:$0xff] }
 0xb38   :  { %2381 = vmatmul.mubr.f32.vlgmr.msra.gmra.mrb[36].mxu0 %v2247_v4  ;;  %v2657_v4 = vld [vmem:[#allocation20 + $0x58] sm:$0xff] }
 0xb39   :  { %2390 = vmatpush1.msra.mxu0 %v2387_v56  ;;  %2453 = vmatprep.mubr.f32.mxu0 %v4445_v59  ;;  %v2675_v56 = vld [vmem:[#allocation20 + $0xe8] sm:$0xff] }
 0xb3a   :  { %3895 = vmatprep.subr.bf16.mxu0 %v5030_v11 }
 0xb3c   :  { %3000 = vmatmul.mubr.msk.f32.vlgmr.msra.gmra.mrb[38].mxu0 %vm2177_vm0, %v5034_v18 }
 0xb3d   :  { %3897 = vmatpush1.bf16.msra.mxu0 %v5036_v19 }
 0xb3e   :  { %3899 = vmatprep.subr.bf16.mxu0 %v5039_v25 }
 0xb41   :  { %3901 = vmatpush1.bf16.msra.mxu0 %v5046_v9 }
 0xb42   :  { %3903 = vmatprep.subr.bf16.mxu0 %v5049_v10 }
 0xb45   :  { %3905 = vmatpush1.bf16.msra.mxu0 %v5052_v30 }
 0xb46   :  { %3907 = vmatprep.subr.bf16.mxu0 %v5055_v53 }
 0xb49   :  { %3909 = vmatpush1.bf16.msra.mxu0 %v5058_v17 }
 0xb4a   :  { %3911 = vmatprep.subr.bf16.mxu0 %v5061_v54 }
 0xb4d   :  { %3913 = vmatpush1.bf16.msra.mxu0 %v5064_v23 }
 0xb4e   :  { %3915 = vmatprep.subr.bf16.mxu0 %v5067_v27 }
 0xb51   :  { %3917 = vmatpush1.bf16.msra.mxu0 %v5070_v44 }
 0xb52   :  { %3919 = vmatprep.subr.bf16.mxu0 %v5073_v40 }
 0xb55   :  { %3921 = vmatpush1.bf16.msra.mxu0 %v5076_v32 }
 0xb56   :  { %3923 = vmatprep.subr.bf16.mxu0 %v5079_v43 }
 0xb59   :  { %3925 = vmatpush1.bf16.msra.mxu0 %v5082_v57 }
 0xb5a   :  { %3927 = vmatprep.subr.bf16.mxu0 %v5085_v33 }
 0xb5d   :  { %3929 = vmatpush1.bf16.msra.mxu0 %v5088_v37  ;;  %v2662_v37 = vld [vmem:[#allocation20 + $0x80] sm:$0xff] }
 0xb5e   :  { %3931 = vmatprep.subr.bf16.mxu0 %v5091_v60  ;;  %v2663_v60 = vld [vmem:[#allocation20 + $0x88] sm:$0xff] }
 0xb5f   :  { %v3958_v7 = vpack.c.bf16 %v2663_v60, %v2662_v37  ;;  %v2728_v37 = vld [vmem:[#allocation20 + $0x290] sm:$0xff]  ;;  %v2729_v60 = vld [vmem:[#allocation20 + $0x298] sm:$0xff] }
 0xb61   :  { %3933 = vmatpush1.bf16.msra.mxu0 %v5094_v51  ;;  %v2647_v51 = vld [vmem:[#allocation20 + $0x8] sm:$0xff] }
 0xb62   :  { %3935 = vmatprep.subr.bf16.mxu0 %v5097_v61 }
 0xb65   :  { %3937 = vmatpush1.bf16.msra.mxu0 %v5100_v58  ;;  %v2551_v58 = vld [vmem:[%s5189_s12] sm:$0xff] }
 0xb66   :  { %3939 = vmatprep.subr.bf16.mxu0 %v5103_v1  ;;  %v3960_v1 = vpack.c.bf16 %v2647_v51, %v2646_v50  ;;  %v2712_v50 = vld [vmem:[#allocation20 + $0x210] sm:$0xff]  ;;  %v2713_v51 = vld [vmem:[#allocation20 + $0x218] sm:$0xff] }
 0xb69   :  { %3941 = vmatpush1.bf16.msra.mxu0 %v5106_v26  ;;  %v2666_v26 = vld [vmem:[#allocation20 + $0xa0] sm:$0xff] }
 0xb6a   :  { %3943 = vmatprep.subr.bf16.mxu0 %v5109_v35  ;;  %v2667_v35 = vld [vmem:[#allocation20 + $0xa8] sm:$0xff] }
 0xb6b   :  { %v3966_v20 = vpack.c.bf16 %v2667_v35, %v2666_v26  ;;  %v2717_v26 = vld [vmem:[#allocation20 + $0x238] sm:$0xff] }
 0xb6c   :  { %v4036_v35 = vpack.c.bf16 %v2717_v26, %v2716_v24  ;;  %v2689_v24 = vld [vmem:[#allocation20 + $0x158] sm:$0xff]  ;;  %v2706_v26 = vld [vmem:[#allocation20 + $0x1e0] sm:$0xff] }
 0xb6d   :  { %3945 = vmatpush1.bf16.msra.mxu0 %v3880_v6  ;;  %v2651_v6 = vld [vmem:[#allocation20 + $0x28] sm:$0xff] }
 0xb6e   :  { %3947 = vmatprep.subr.bf16.mxu0 %v3882_v13  ;;  %v2668_v13 = vld [vmem:[#allocation20 + $0xb0] sm:$0xff]  ;;  %v3968_v42 = vpack.c.bf16 %v2651_v6, %v2650_v5  ;;  %v2718_v5 = vld [vmem:[#allocation20 + $0x240] sm:$0xff]  ;;  %v2719_v6 = vld [vmem:[#allocation20 + $0x248] sm:$0xff] }
 0xb6f   :  { %v3970_v29 = vpack.c.bf16 %v2669_v14, %v2668_v13  ;;  %v4040_v13 = vpack.c.bf16 %v2719_v6, %v2718_v5  ;;  %v2736_v14 = vld [vmem:[#allocation20 + $0x2d0] sm:$0xff]  ;;  %v2691_v5 = vld [vmem:[#allocation20 + $0x168] sm:$0xff] }
 0xb70   :  { %v2708_v6 = vld [vmem:[#allocation20 + $0x1f0] sm:$0xff] }
 0xb71   :  { %3949 = vmatpush1.bf16.msra.mxu0 %v3884_v39  ;;  %v2652_v39 = vld [vmem:[#allocation20 + $0x30] sm:$0xff] }
 0xb72   :  { %3951 = vmatprep.subr.bf16.mxu0 %v3886_v63  ;;  %v2653_v63 = vld [vmem:[#allocation20 + $0x38] sm:$0xff] }
 0xb73   :  { %v3972_v31 = vpack.c.bf16 %v2653_v63, %v2652_v39  ;;  %v2721_v39 = vld [vmem:[#allocation20 + $0x258] sm:$0xff] }
 0xb75   :  { %3953 = vmatpush1.bf16.msra.mxu0 %v3888_v48  ;;  %v2654_v48 = vld [vmem:[#allocation20 + $0x40] sm:$0xff] }
 0xb76   :  { %3955 = vmatprep.subr.bf16.mxu0 %v3890_v52  ;;  %v2672_v52 = vld [vmem:[#allocation20 + $0xd0] sm:$0xff] }
 0xb79   :  { %3957 = vmatpush1.bf16.msra.mxu0 %v3892_v34  ;;  %v3978_v34 = vpack.c.bf16 %v2673_v55, %v2672_v52  ;;  %v2740_v52 = vld [vmem:[#allocation20 + $0x2f0] sm:$0xff]  ;;  %v2741_v55 = vld [vmem:[#allocation20 + $0x2f8] sm:$0xff] }
 0xc0b   :  { %v2382_v11 = vpop.f32.mrb[36].mxu0 }
 0xc0c   :  { %v2537_v18 = vsub.f32 %v5028_v8, %v2382_v11  ;;  %v2384_v19 = vpop.f32.mrb[37].mxu0  ;;  %v2531_v30 = vmul.f32 %v2382_v11, %v2382_v11  ;;  %v3980_v11 = vpack.c.bf16 %v2657_v4, %v2656_v36  ;;  %v2725_v36 = vld [vmem:[#allocation20 + $0x278] sm:$0xff] }
 0xc0d   :  { %v2538_v25 = vsub.f32 %v5032_v12, %v2384_v19  ;;  %v2532_v53 = vmul.f32 %v2384_v19, %v2384_v19  ;;  %v2658_v19 = vld [vmem:[#allocation20 + $0x60] sm:$0xff] }
 0xc0f   :  { %v2455_v9 = vpop.f32.mrb[38].mxu0 }
 0xc10   :  { %v2457_v10 = vpop.f32.mrb[39].mxu0 }
 0xc11   :  { %2524 = vmatprep.mubr.f32.mxu0 %v2457_v10  ;;  %v2677_v10 = vld [vmem:[#allocation20 + $0xf8] sm:$0xff] }
 0xc12   :  { %2525 = vmatmul.mubr.f32.vlgmr.msra.gmra.mrb[40].mxu0 %v2455_v9  ;;  %v2676_v9 = vld [vmem:[#allocation20 + $0xf0] sm:$0xff] }
 0xc13   :  { %2627 = vmatprep.mubr.f32.mxu0 %v4445_v59 }
 0xce5   :  { %v2526_v17 = vpop.f32.mrb[40].mxu0 }
 0xce6   :  { %v2533_v54 = vsub.f32 %v2526_v17, %v2531_v30  ;;  %v2528_v23 = vpop.f32.mrb[41].mxu0  ;;  %v2660_v17 = vld [vmem:[#allocation20 + $0x70] sm:$0xff] }
 0xce7   :  { %v2534_v27 = vsub.f32 %v2528_v23, %v2532_v53  ;;  %v3986_v53 = vpack.c.bf16 %v2677_v10, %v2676_v9 }
 0xce8   :  { %v2535_v44 = vmax.f32 %v2533_v54, 0.0  ;;  %v2661_v54 = vld [vmem:[#allocation20 + $0x78] sm:$0xff] }
 0xce9   :  { %v2536_v40 = vmax.f32 %v2534_v27, 0.0  ;;  %v3988_v23 = vpack.c.bf16 %v2661_v54, %v2660_v17  ;;  %v2726_v27 = vld [vmem:[#allocation20 + $0x280] sm:$0xff]  ;;  %v2699_v54 = vld [vmem:[#allocation20 + $0x1a8] sm:$0xff] }
 0xcea   :  { %v2539_v32 = vadd.f32 1e-05, %v2535_v44  ;;  %v2727_v44 = vld [vmem:[#allocation20 + $0x288] sm:$0xff]  ;;  %v2698_v17 = vld [vmem:[#allocation20 + $0x1a0] sm:$0xff] }
 0xceb   :  { %v2540_v43 = vadd.f32 1e-05, %v2536_v40  ;;  %v2694_v40 = vld [vmem:[#allocation20 + $0x180] sm:$0xff] }
 0xcec   :  { %4120 = vrsqrt.f32 %v2539_v32  ;;  %v2695_v32 = vld [vmem:[#allocation20 + $0x188] sm:$0xff] }
 0xced   :  { %4122 = vrsqrt.f32 %v2540_v43  ;;  %v4022_v43 = vpack.c.bf16 %v2727_v44, %v2726_v27  ;;  %v3998_v44 = vpack.c.bf16 %v2699_v54, %v2698_v17 }
 0xcef   :  { %4023 = vmatprep.subr.bf16.mxu1 %v4022_v43 }
 0xcf6   :  { %v4121_v8 = vpop.eup %4120 }
 0xcf7   :  { %v4123_v12 = vpop.eup %4122  ;;  %v2543_v57 = vmul.f32 %v4121_v8, %v2537_v18  ;;  %v3982_v18 = vpack.c.bf16 %v2675_v56, %v2674_v38  ;;  %v2710_v8 = vld [vmem:[#allocation20 + $0x200] sm:$0xff]  ;;  %v2679_v56 = vld [vmem:[#allocation20 + $0x108] sm:$0xff] }
 0xcf8   :  { %v2544_v33 = vmul.f32 %v4123_v12, %v2538_v25  ;;  %v2659_v25 = vld [vmem:[#allocation20 + $0x68] sm:$0xff]  ;;  %v3990_v12 = vpack.c.bf16 %v2695_v32, %v2694_v40  ;;  %v2678_v38 = vld [vmem:[#allocation20 + $0x100] sm:$0xff] }
 0xcf9   :  { %v2547_v46 = vmul.f32 0.2, %v2543_v57  ;;  %vm2545_vm2 = vcmp.ge.f32.partialorder %v2543_v57, 0.0  ;;  %v3984_v30 = vpack.c.bf16 %v2659_v25, %v2658_v19  ;;  %v3992_v25 = vpack.c.bf16 %v2679_v56, %v2678_v38  ;;  %v2682_v40 = vld [vmem:[#allocation20 + $0x120] sm:$0xff]  ;;  %v2683_v32 = vld [vmem:[#allocation20 + $0x128] sm:$0xff] }
 0xcfa   :  { %vm2546_vm1 = vcmp.ge.f32.partialorder %v2544_v33, 0.0  ;;  %v2548_v61 = vmul.f32 0.2, %v2544_v33 }
 0xcfb   :  { %v2549_v2 = vsel %vm2545_vm2, %v2543_v57, %v2547_v46  ;;  %v2711_v57 = vld [vmem:[#allocation20 + $0x208] sm:$0xff]  ;;  %v4026_v46 = vpack.c.bf16 %v2729_v60, %v2728_v37  ;;  %v2684_v60 = vld [vmem:[#allocation20 + $0x130] sm:$0xff] }
 0xcfc   :  { %v2550_v21 = vsel %vm2546_vm1, %v2544_v33, %v2548_v61  ;;  %v4024_v33 = vpack.c.bf16 %v2711_v57, %v2710_v8  ;;  %v4028_v61 = vpack.c.bf16 %v2713_v51, %v2712_v50  ;;  %v2700_v8 = vld [vmem:[#allocation20 + $0x1b0] sm:$0xff]  ;;  %v4000_v57 = vpack.c.bf16 %v2683_v32, %v2682_v40  ;;  %v2702_v51 = vld [vmem:[#allocation20 + $0x1c0] sm:$0xff] }
 0xcfd   :  { %2563 = vmatprep.subr.mxu0 %v2550_v21  ;;  %v2714_v21 = vld [vmem:[#allocation20 + $0x220] sm:$0xff] }
 0xcfe   :  { %2564 = vmatpush1.msra.mxu0 %v2549_v2  ;;  %4025 = vmatpush3.bf16.msra.mxu1 %v4024_v33  ;;  %v2732_v2 = vld [vmem:[#allocation20 + $0x2b0] sm:$0xff] }
 0xcff   :  { %3001 = vmatmul.mubr.msk.f32.vlgmr.msra.gmra.mrb[42].mxu0 %vm2177_vm0, %v2551_v58  ;;  %3959 = vmatprep.subr.bf16.mxu0 %v3958_v7  ;;  %v4030_v7 = vpack.c.bf16 %v2731_v22, %v2730_v62  ;;  %v2715_v58 = vld [vmem:[#allocation20 + $0x228] sm:$0xff] }
 0xd00   :  { %2633 = vmatprep.mubr.f32.mxu0 %v4445_v59  ;;  %3961 = vmatpush3.bf16.msra.mxu0 %v3960_v1  ;;  %v4032_v1 = vpack.c.bf16 %v2715_v58, %v2714_v21  ;;  %v2687_v21 = vld [vmem:[#allocation20 + $0x148] sm:$0xff]  ;;  %v2704_v58 = vld [vmem:[#allocation20 + $0x1d0] sm:$0xff] }
 0xd01   :  { %3963 = vmatprep.subr.bf16.mxu0 %v3962_v15  ;;  %4027 = vmatprep.subr.bf16.mxu1 %v4026_v46  ;;  %v2733_v15 = vld [vmem:[#allocation20 + $0x2b8] sm:$0xff] }
 0xd02   :  { %4029 = vmatpush3.bf16.msra.mxu1 %v4028_v61  ;;  %v4034_v16 = vpack.c.bf16 %v2733_v15, %v2732_v2  ;;  %v2685_v46 = vld [vmem:[#allocation20 + $0x138] sm:$0xff]  ;;  %v2703_v61 = vld [vmem:[#allocation20 + $0x1c8] sm:$0xff] }
 0xd03   :  { %3002 = vmatmul.mubr.msk.f32.gmra.mrb[44].mxu0 %vm2177_vm0, %v2552_v49  ;;  %4031 = vmatprep.subr.bf16.mxu1 %v4030_v7  ;;  %v2734_v49 = vld [vmem:[#allocation20 + $0x2c0] sm:$0xff]  ;;  %v4004_v62 = vpack.c.bf16 %v2685_v46, %v2684_v60  ;;  %v4006_v22 = vpack.c.bf16 %v2703_v61, %v2702_v51 }
 0xd04   :  { %2639 = vmatprep.mubr.f32.mxu0 %v4445_v59  ;;  %3965 = vmatpush3.bf16.msra.mxu0 %v3964_v41  ;;  %v2655_v59 = vld [vmem:[#allocation20 + $0x48] sm:$0xff]  ;;  %v2686_v7 = vld [vmem:[#allocation20 + $0x140] sm:$0xff] }
 0xd05   :  { %3967 = vmatprep.subr.bf16.mxu0 %v3966_v20  ;;  %v3976_v0 = vpack.c.bf16 %v2655_v59, %v2654_v48  ;;  %v2735_v41 = vld [vmem:[#allocation20 + $0x2c8] sm:$0xff]  ;;  %v4008_v2 = vpack.c.bf16 %v2687_v21, %v2686_v7 }
 0xd06   :  { %4033 = vmatpush3.bf16.msra.mxu1 %v4032_v1  ;;  %v4038_v20 = vpack.c.bf16 %v2735_v41, %v2734_v49  ;;  %v2723_v48 = vld [vmem:[#allocation20 + $0x268] sm:$0xff]  ;;  %v2705_v1 = vld [vmem:[#allocation20 + $0x1d8] sm:$0xff] }
 0xd07   :  { %3003 = vmatmul.mubr.msk.f32.gmra.mrb[46].mxu0 %vm2177_vm0, %v2553_v28  ;;  %4035 = vmatprep.subr.bf16.mxu1 %v4034_v16  ;;  %v2737_v28 = vld [vmem:[#allocation20 + $0x2d8] sm:$0xff]  ;;  %v4010_v15 = vpack.c.bf16 %v2705_v1, %v2704_v58  ;;  %v2688_v16 = vld [vmem:[#allocation20 + $0x150] sm:$0xff] }
 0xd08   :  { %3969 = vmatpush3.bf16.msra.mxu0 %v3968_v42  ;;  %v4042_v42 = vpack.c.bf16 %v2737_v28, %v2736_v14  ;;  %v4012_v49 = vpack.c.bf16 %v2689_v24, %v2688_v16 }
 0xd09   :  { %3971 = vmatprep.subr.bf16.mxu0 %v3970_v29  ;;  %v2720_v29 = vld [vmem:[#allocation20 + $0x250] sm:$0xff] }
 0xd0a   :  { %4037 = vmatpush3.bf16.msra.mxu1 %v4036_v35  ;;  %v4044_v63 = vpack.c.bf16 %v2721_v39, %v2720_v29  ;;  %v2707_v35 = vld [vmem:[#allocation20 + $0x1e8] sm:$0xff]  ;;  %v2693_v29 = vld [vmem:[#allocation20 + $0x178] sm:$0xff] }
 0xd0b   :  { %4039 = vmatprep.subr.bf16.mxu1 %v4038_v20  ;;  %v4014_v41 = vpack.c.bf16 %v2707_v35, %v2706_v26  ;;  %v2690_v20 = vld [vmem:[#allocation20 + $0x160] sm:$0xff] }
 0xd0c   :  { %3973 = vmatpush3.bf16.msra.mxu0 %v3972_v31  ;;  %v4046_v31 = vpack.c.bf16 %v2739_v47, %v2738_v45  ;;  %v4016_v14 = vpack.c.bf16 %v2691_v5, %v2690_v20 }
 0xd0d   :  { %3975 = vmatprep.subr.bf16.mxu0 %v3974_v3  ;;  %v2722_v3 = vld [vmem:[#allocation20 + $0x260] sm:$0xff] }
 0xd0e   :  { %4041 = vmatpush3.bf16.msra.mxu1 %v4040_v13  ;;  %v4048_v59 = vpack.c.bf16 %v2723_v48, %v2722_v3  ;;  %v2709_v13 = vld [vmem:[#allocation20 + $0x1f8] sm:$0xff] }
 0xd0f   :  { %4043 = vmatprep.subr.bf16.mxu1 %v4042_v42  ;;  %v4018_v28 = vpack.c.bf16 %v2709_v13, %v2708_v6  ;;  %v2692_v42 = vld [vmem:[#allocation20 + $0x170] sm:$0xff] }
 0xd10   :  { %3977 = vmatpush3.bf16.msra.mxu0 %v3976_v0  ;;  %v4050_v0 = vpack.c.bf16 %v2741_v55, %v2740_v52  ;;  %v4020_v39 = vpack.c.bf16 %v2693_v29, %v2692_v42 }
 0xd11   :  { %3979 = vmatprep.subr.bf16.mxu0 %v3978_v34  ;;  %v2724_v34 = vld [vmem:[#allocation20 + $0x270] sm:$0xff] }
 0xd12   :  { %4045 = vmatpush3.bf16.msra.mxu1 %v4044_v63  ;;  %v4052_v4 = vpack.c.bf16 %v2725_v36, %v2724_v34 }
 0xd13   :  { %4047 = vmatprep.subr.bf16.mxu1 %v4046_v31 }
 0xd14   :  { %3981 = vmatpush3.bf16.msra.mxu0 %v3980_v11  ;;  %v2696_v11 = vld [vmem:[#allocation20 + $0x190] sm:$0xff] }
 0xd15   :  { %3983 = vmatprep.subr.bf16.mxu0 %v3982_v18  ;;  %v2697_v18 = vld [vmem:[#allocation20 + $0x198] sm:$0xff] }
 0xd16   :  { %4049 = vmatpush3.bf16.msra.mxu1 %v4048_v59  ;;  %v3994_v10 = vpack.c.bf16 %v2697_v18, %v2696_v11  ;;  %v3004_v59 = vld [vmem:[%s5191_s14] ss:$0 sm:$0xff] }
 0xd17   :  { %4051 = vmatprep.subr.bf16.mxu1 %v4050_v0 }
 0xd18   :  { %3985 = vmatpush3.bf16.msra.mxu0 %v3984_v30  ;;  %v2680_v30 = vld [vmem:[#allocation20 + $0x110] sm:$0xff] }
 0xd19   :  { %3987 = vmatprep.subr.bf16.mxu0 %v3986_v53  ;;  %v2681_v53 = vld [vmem:[#allocation20 + $0x118] sm:$0xff] }
 0xd1a   :  { %4053 = vmatpush3.bf16.msra.mxu1 %v4052_v4 }
 0xd1c   :  { %3989 = vmatpush3.bf16.msra.mxu0 %v3988_v23  ;;  %v3996_v23 = vpack.c.bf16 %v2681_v53, %v2680_v30 }
 0xd1d   :  { %3991 = vmatprep.subr.bf16.mxu0 %v3990_v12  ;;  %v2701_v12 = vld [vmem:[#allocation20 + $0x1b8] sm:$0xff] }
 0xd1e   :  { %v4002_v37 = vpack.c.bf16 %v2701_v12, %v2700_v8 }
 0xdd2   :  { %v2629_v19 = vpop.f32.mrb[42].mxu0 }
 0xdd3   :  { %v2631_v9 = vpop.f32.mrb[43].mxu0 }
 0xdd4   :  { %2813 = vmatprep.mubr.f32.mxu0 %v2631_v9 }
 0xdd5   :  { %2814 = vmatmul.mubr.f32.vlgmr.msra.gmra.mrb[48].mxu0 %v2629_v19 }
 0xdd6   :  { %3993 = vmatpush3.bf16.msra.mxu0 %v3992_v25  ;;  %v2635_v27 = vpop.f32.mrb[44].mxu0 }
 0xdd7   :  { %3995 = vmatprep.subr.bf16.mxu0 %v3994_v10  ;;  %v2637_v43 = vpop.f32.mrb[45].mxu0 }
 0xdd8   :  { %2883 = vmatprep.mubr.f32.mxu0 %v2637_v43 }
 0xdda   :  { %3997 = vmatpush3.bf16.msra.mxu0 %v3996_v23  ;;  %v2641_v33 = vpop.f32.mrb[46].mxu0 }
 0xddb   :  { %3999 = vmatprep.subr.bf16.mxu0 %v3998_v44  ;;  %v2643_v50 = vpop.f32.mrb[47].mxu0 }
 0xddc   :  { %2953 = vmatprep.mubr.f32.mxu1 %v2643_v50 }
 0xddd   :  { %2954 = vmatmul.mubr.f32.vlgmr.msra.gmra.mrb[38].mxu1 %v2641_v33 }
 0xdde   :  { %4001 = vmatpush3.bf16.msra.mxu0 %v4000_v57 }
 0xddf   :  { %4003 = vmatprep.subr.bf16.mxu0 %v4002_v37 }
 0xde2   :  { %4005 = vmatpush3.bf16.msra.mxu0 %v4004_v62 }
 0xde3   :  { %4007 = vmatprep.subr.bf16.mxu0 %v4006_v22 }
 0xde6   :  { %4009 = vmatpush3.bf16.msra.mxu0 %v4008_v2 }
 0xde7   :  { %4011 = vmatprep.subr.bf16.mxu0 %v4010_v15 }
 0xdea   :  { %4013 = vmatpush3.bf16.msra.mxu0 %v4012_v49 }
 0xdeb   :  { %4015 = vmatprep.subr.bf16.mxu0 %v4014_v41 }
 0xdee   :  { %4017 = vmatpush3.bf16.msra.mxu0 %v4016_v14 }
 0xdef   :  { %4019 = vmatprep.subr.bf16.mxu0 %v4018_v28 }
 0xdf2   :  { %4021 = vmatpush3.bf16.msra.mxu0 %v4020_v39 }
 0xdf5   :  { %2884 = vmatmul.mubr.f32.vlgmr.msra.gmra.mrb[50].mxu0 %v2635_v27 }
 0xea8   :  { %v3077_v63 = vpop.f32.mrb[48].mxu0 }
 0xea9   :  { %v3078_v45 = vpop.f32.mrb[49].mxu0 }
 0xeaa   :  { %v3079_v47 = vadd.f32 %v3078_v45, %v3077_v63 }
 0xeac   :  { %v2816_v0 = vadd.f32 %v3079_v47, %v3004_v59 }
 0xeb0   :  { %v3147_v31 = vpop.f32.mrb[38].mxu1 }
 0xeb1   :  { %v3148_v3 = vpop.f32.mrb[39].mxu1 }
 0xeb2   :  { %v3149_v48 = vadd.f32 %v3148_v3, %v3147_v31 }
 0xec8   :  { %v3112_v52 = vpop.f32.mrb[50].mxu0 }
 0xec9   :  { %v3113_v55 = vpop.f32.mrb[51].mxu0 }
 0xeca   :  { %v3114_v34 = vadd.f32 %v3113_v55, %v3112_v52 }
 0xecc   :  { %v2886_v36 = vadd.f32 %v3114_v34, %v2816_v0 }
 0xece   :  { %v2956_v4 = vadd.f32 %v3149_v48, %v2886_v36 }
 0xed0   :  { %2960 = vst.msk [vmem:[#allocation22] sm:$0xff] %vm2959_vm3, %v2956_v4 }
 0xed1   :  { %4399 = shalt.err (!%p4396_p2)
}
 0xed2   :  { %s4400_s29 = scalar_lea.hbm %s5192_s15, 128 }
 0xed3   :  { %p4401_p3 = scmp.ne.s32.totalorder %s5192_s15, %s4400_s29  ;;  %p4404_p4 = scmp.lt.u32.totalorder %s4400_s29, %s5192_s15 }
 0xed5   :  { %p4406_p5 = pnand %p4404_p4, %p4401_p3 }
 0xed7   :  { %4409 = shalt.err (!%p4406_p5)
}
 0xed8   :  { %2970 = dma.vmem_to_hbm [thread:$0]  %s2968_s3, 128, %s5192_s15, [#allocation4]  }
 0xed9   :  { %4424 = dma.done.wait [#allocation4], 128  }
 0xeda   :  { %4425 = vsyncadd [#allocation4], 4294967168 }
 0xedb   :  { %2974 = vsyncpa [#allocation3], 1 }
 0xedc   :  { %2975 = vsyncpa [#allocation6], 1 }
 0xedd   :  { %2976 = vsyncpa [#allocation9], 1 }
 0xede   :  { %2977 = vsyncpa [#allocation12], 1 }
 0xedf   :  { %2978 = vsyncpa [#allocation15], 1 }
 0xee0   :  { %2979 = vsyncpa [#allocation18], 1 }
 0xee1   :  { %2980 = vsyncpa [#allocation21], 1 }
 0xee2   :  { %2981 = vsyncpa [#allocation4], 1 }

</bundles_post_ra>
